<compile_context>
chip_gen: v6e
topology: v6e:2x2x1
jax: 0.10.0
libtpu: 0.0.40
codegen_flags: <defaults>
</compile_context>

<pallas_src>
import jax
import jax.numpy as jnp
from jax.experimental import pallas as pl
from jax.experimental.pallas import tpu as pltpu

IN_PLANES = 2048
BN_EPS = 1e-5


def _pick_tn(num_classes):
    """Largest 128-multiple tile that divides num_classes with >= 2 grid steps."""
    for tn in (1024, 512, 256, 128):
        if num_classes % tn == 0 and num_classes // tn >= 2:
            return tn
    return num_classes  # single full-width block (valid even if not %128)


def pipline_kernel(gf_ref, bf_ref, pf_ref, gamma_ref, beta_ref,
                   wg_ref, w_ref,
                   cls_g_ref, cls_gb_ref, cls_gp_ref,
                   gb_feat_ref, gp_feat_ref,
                   gf_bf16, lhs_bf16):
    j = pl.program_id(0)
    B = gf_ref.shape[0]

    @pl.when(j == 0)
    def _prologue():
        gf = gf_ref[...]                               # (B, C) f32
        gf_bf16[...] = gf.astype(jnp.bfloat16)
        gamma = gamma_ref[...]                         # (1, C)
        beta = beta_ref[...]                           # (1, C)
        # Process the two fusion branches sequentially so only one (B, C)
        # branch (+ its centered copy) is live at a time (vreg pressure).
        for idx, (branch_ref, feat_ref) in enumerate(
                ((bf_ref, gb_feat_ref), (pf_ref, gp_feat_ref))):
            fused = gf + branch_ref[...]               # g_b_feature / g_p_feature
            feat_ref[...] = fused
            # PyTorch BatchNorm1d (training mode): batch stats, biased variance.
            mean = jnp.mean(fused, axis=0, keepdims=True)
            centered = fused - mean
            var = jnp.mean(centered * centered, axis=0, keepdims=True)
            scale = gamma * jax.lax.rsqrt(var + BN_EPS)   # fold gamma into scale
            lhs_bf16[pl.ds(idx * B, B), :] = (
                centered * scale + beta).astype(jnp.bfloat16)

    # Steady state per N tile: one fused (2B, C) @ (C, TN) matmul for the
    # shared classifier + one (B, C) @ (C, TN) matmul for the glabole
    # classifier. bf16 operands, f32 accumulation on the MXU.
    scores = jnp.dot(lhs_bf16[...], w_ref[...],
                     preferred_element_type=jnp.float32)   # (2B, TN)
    cls_gb_ref[...] = scores[:B, :]
    cls_gp_ref[...] = scores[B:, :]
    cls_g_ref[...] = jnp.dot(gf_bf16[...], wg_ref[...],
                             preferred_element_type=jnp.float32)


def pipline_head(global_feature, body_feature, paw_feature,
                 bn_gamma, bn_beta, glabole_cls_w_t, cls_weight_t):
    """Pallas-accelerated head of Pipline.forward (plus fused glabole classifier).

    Args:
      global_feature, body_feature, paw_feature: (B, 2048) f32
      bn_gamma, bn_beta: (2048,) f32   (BatchNorm1d affine params)
      glabole_cls_w_t:  (2048, num_classes)  glabole classifier weight (transposed)
      cls_weight_t:     (2048, num_classes)  shared classifier weight (transposed)
    Returns:
      cls_score_g, cls_score_gb, cls_score_gp, g_b_feature, g_p_feature
    """
    B, C = global_feature.shape
    num_classes = cls_weight_t.shape[1]
    assert glabole_cls_w_t.shape == (C, num_classes)

    tn = _pick_tn(num_classes)
    grid = (num_classes // tn,)

    gamma2d = bn_gamma.reshape(1, C).astype(jnp.float32)
    beta2d = bn_beta.reshape(1, C).astype(jnp.float32)
    # Stream classifier weights as bf16 (f32 accumulation inside the kernel).
    wg_bf16 = glabole_cls_w_t.astype(jnp.bfloat16)
    w_bf16 = cls_weight_t.astype(jnp.bfloat16)

    feat_spec = pl.BlockSpec((B, C), lambda j: (0, 0))
    vec_spec = pl.BlockSpec((1, C), lambda j: (0, 0))
    w_spec = pl.BlockSpec((C, tn), lambda j: (0, j))
    score_spec = pl.BlockSpec((B, tn), lambda j: (0, j))

    flops = 6 * B * C * num_classes           # three classifier matmuls
    bytes_accessed = (3 * B * C * 4 + 2 * C * 4 + 2 * C * num_classes * 2
                      + 3 * B * num_classes * 4 + 2 * B * C * 4)
    # Rough per-invocation VMEM footprint (resident feats + double-buffered
    # weight/score tiles + bf16 scratch); used to raise the scoped VMEM limit
    # when needed (v5e default 16 MiB, v6e/v7x 32 MiB).
    vmem_est = (3 * B * C * 4 + 2 * C * 4
                + 2 * 2 * C * tn * 2
                + 2 * 3 * B * tn * 4
                + 2 * B * C * 4
                + 3 * B * C * 2)
    vmem_limit = int(min(max(2 * vmem_est, 32 * 1024 * 1024), 64 * 1024 * 1024))

    out = pl.pallas_call(
        pipline_kernel,
        grid=grid,
        out_shape=(
            jax.ShapeDtypeStruct((B, num_classes), jnp.float32),  # cls_score_g
            jax.ShapeDtypeStruct((B, num_classes), jnp.float32),  # cls_score_gb
            jax.ShapeDtypeStruct((B, num_classes), jnp.float32),  # cls_score_gp
            jax.ShapeDtypeStruct((B, C), jnp.float32),            # g_b_feature
            jax.ShapeDtypeStruct((B, C), jnp.float32),            # g_p_feature
        ),
        in_specs=[feat_spec, feat_spec, feat_spec, vec_spec, vec_spec,
                  w_spec, w_spec],
        out_specs=(score_spec, score_spec, score_spec, feat_spec, feat_spec),
        scratch_shapes=[pltpu.VMEM((B, C), jnp.bfloat16),        # gf (bf16)
                        pltpu.VMEM((2 * B, C), jnp.bfloat16)],   # [gb_n; gp_n]
        compiler_params=pltpu.CompilerParams(
            dimension_semantics=("arbitrary",),
            vmem_limit_bytes=vmem_limit),
        cost_estimate=pl.CostEstimate(flops=flops, transcendentals=0,
                                      bytes_accessed=bytes_accessed),
    )(global_feature, body_feature, paw_feature, gamma2d, beta2d,
      wg_bf16, w_bf16)
    return out


# ---------------------------------------------------------------------------
# Synthetic stand-ins for the external sub-models (plain JAX glue).
# Each backbone: global average pool over H,W of an NCHW image, then a
# deterministic linear projection to 2048 features.
# ---------------------------------------------------------------------------
def stub_backbone(img_nchw, proj):
    pooled = jnp.mean(img_nchw, axis=(2, 3))          # (B, Cin)
    return pooled @ proj                              # (B, 2048)


def pipline_forward(params, img, img_body, img_part):
    # glabole(img) -> (cls_score_g, global_feature); classifier fused in kernel.
    global_feature = stub_backbone(img, params["proj_g"])
    # part_body(img_body) -> body_feature ; part_paw(img_part) -> paw_feature
    body_feature = stub_backbone(img_body, params["proj_b"])
    paw_feature = stub_backbone(img_part, params["proj_p"])

    (cls_score_g, cls_score_gb, cls_score_gp,
     g_b_feature, g_p_feature) = pipline_head(
        global_feature, body_feature, paw_feature,
        params["bn_gamma"], params["bn_beta"],
        params["glabole_cls_w_t"], params["cls_w_t"])

    return (cls_score_g, cls_score_gb, cls_score_gp,
            global_feature, g_b_feature, g_p_feature)


if __name__ == "__main__":
    key = jax.random.PRNGKey(0)
    B, Cin, H, W = 8, 4, 16, 16          # B multiple of 8 -> clean sublane tiles
    num_classes = 256                    # multiple of 128 -> 2-step N grid

    k = jax.random.split(key, 10)
    img = jax.random.normal(k[0], (B, Cin, H, W), jnp.float32)
    img_body = jax.random.normal(k[1], (B, Cin, H, W), jnp.float32)
    img_part = jax.random.normal(k[2], (B, Cin, H, W), jnp.float32)

    params = {
        # synthetic backbone projections (deterministic)
        "proj_g": jax.random.normal(k[3], (Cin, IN_PLANES), jnp.float32) * 0.05,
        "proj_b": jax.random.normal(k[4], (Cin, IN_PLANES), jnp.float32) * 0.05,
        "proj_p": jax.random.normal(k[5], (Cin, IN_PLANES), jnp.float32) * 0.05,
        "glabole_cls_w_t": jax.random.normal(
            k[6], (IN_PLANES, num_classes), jnp.float32) * 0.001,
        # bottleneck BatchNorm1d: kaiming init gives weight=1, bias=0; use
        # slightly perturbed values so the affine path is actually validated.
        "bn_gamma": 1.0 + 0.1 * jax.random.normal(k[8], (IN_PLANES,), jnp.float32),
        "bn_beta": 0.05 * jax.random.normal(k[9], (IN_PLANES,), jnp.float32),
        # classifier Linear(2048, num_classes, bias=False): N(0, std=0.001)
        "cls_w_t": jax.random.normal(
            k[7], (IN_PLANES, num_classes), jnp.float32) * 0.001,
    }

    outs = pipline_forward(params, img, img_body, img_part)
    outs = jax.block_until_ready(outs)

    # ------------------------------------------------------------------
    # Sanity checks against a pure-JAX reference of the head.
    # ------------------------------------------------------------------
    gf = stub_backbone(img, params["proj_g"])
    bf = stub_backbone(img_body, params["proj_b"])
    pf = stub_backbone(img_part, params["proj_p"])
    gb = gf + bf
    gp = gf + pf

    def ref_bn(x):
        m = x.mean(0, keepdims=True)
        v = ((x - m) ** 2).mean(0, keepdims=True)
        return ((x - m) / jnp.sqrt(v + BN_EPS)) * params["bn_gamma"] \
            + params["bn_beta"]

    def bf16_matmul(a, w):
        return jnp.dot(a.astype(jnp.bfloat16), w.astype(jnp.bfloat16),
                       preferred_element_type=jnp.float32)

    ref_g_score = bf16_matmul(gf, params["glabole_cls_w_t"])
    ref_gb_score = bf16_matmul(ref_bn(gb), params["cls_w_t"])
    ref_gp_score = bf16_matmul(ref_bn(gp), params["cls_w_t"])

    assert jnp.allclose(outs[0], ref_g_score, atol=2e-3, rtol=2e-2)
    assert jnp.allclose(outs[1], ref_gb_score, atol=2e-3, rtol=2e-2)
    assert jnp.allclose(outs[2], ref_gp_score, atol=2e-3, rtol=2e-2)
    assert jnp.allclose(outs[3], gf, atol=1e-5)
    assert jnp.allclose(outs[4], gb, atol=1e-5)
    assert jnp.allclose(outs[5], gp, atol=1e-5)

    print("KERNEL_OK")
</pallas_src>

<mosaic_0001>
module attributes {stable_mosaic.version = 11 : i64} {
  func.func @pipline_kernel(%arg0: i32, %arg1: memref<8x2048xf32, #tpu.memory_space<vmem>>, %arg2: memref<8x2048xf32, #tpu.memory_space<vmem>>, %arg3: memref<8x2048xf32, #tpu.memory_space<vmem>>, %arg4: memref<1x2048xf32, #tpu.memory_space<vmem>>, %arg5: memref<1x2048xf32, #tpu.memory_space<vmem>>, %arg6: memref<2048x128xbf16, #tpu.memory_space<vmem>>, %arg7: memref<2048x128xbf16, #tpu.memory_space<vmem>>, %arg8: memref<8x128xf32, #tpu.memory_space<vmem>>, %arg9: memref<8x128xf32, #tpu.memory_space<vmem>>, %arg10: memref<8x128xf32, #tpu.memory_space<vmem>>, %arg11: memref<8x2048xf32, #tpu.memory_space<vmem>>, %arg12: memref<8x2048xf32, #tpu.memory_space<vmem>>, %arg13: memref<8x2048xbf16, #tpu.memory_space<vmem>>, %arg14: memref<16x2048xbf16, #tpu.memory_space<vmem>>) attributes {dimension_semantics = [#tpu.dimension_semantics<arbitrary>], iteration_bounds = array<i64: 2>, scalar_prefetch = 0 : i64, scratch_operands = 2 : i64, tpu.core_type = #tpu.core_type<tc>, window_params = [{pipeline_mode = #tpu.pipeline_mode<synchronous>, transform_indices = @transform_0, window_bounds = array<i64: 8, 2048>}, {pipeline_mode = #tpu.pipeline_mode<synchronous>, transform_indices = @transform_1, window_bounds = array<i64: 8, 2048>}, {pipeline_mode = #tpu.pipeline_mode<synchronous>, transform_indices = @transform_2, window_bounds = array<i64: 8, 2048>}, {pipeline_mode = #tpu.pipeline_mode<synchronous>, transform_indices = @transform_3, window_bounds = array<i64: 1, 2048>}, {pipeline_mode = #tpu.pipeline_mode<synchronous>, transform_indices = @transform_4, window_bounds = array<i64: 1, 2048>}, {transform_indices = @transform_5, window_bounds = array<i64: 2048, 128>}, {transform_indices = @transform_6, window_bounds = array<i64: 2048, 128>}, {transform_indices = @transform_7, window_bounds = array<i64: 8, 128>}, {transform_indices = @transform_8, window_bounds = array<i64: 8, 128>}, {transform_indices = @transform_9, window_bounds = array<i64: 8, 128>}, {pipeline_mode = #tpu.pipeline_mode<synchronous>, transform_indices = @transform_10, window_bounds = array<i64: 8, 2048>}, {pipeline_mode = #tpu.pipeline_mode<synchronous>, transform_indices = @transform_11, window_bounds = array<i64: 8, 2048>}]} {
    %c0_i32 = arith.constant 0 : i32
    %0 = arith.cmpi eq, %arg0, %c0_i32 : i32
    %1 = arith.extui %0 : i1 to i32
    %c0_i32_0 = arith.constant 0 : i32
    %2 = arith.cmpi ne, %1, %c0_i32_0 : i32
    scf.if %2 {
      %c0_15 = arith.constant 0 : index
      %c0_16 = arith.constant 0 : index
      %14 = vector.load %arg1[%c0_15, %c0_16] : memref<8x2048xf32, #tpu.memory_space<vmem>>, vector<8x2048xf32>
      %15 = arith.truncf %14 : vector<8x2048xf32> to vector<8x2048xbf16>
      %c0_17 = arith.constant 0 : index
      %c0_18 = arith.constant 0 : index
      %16 = vector.load %arg13[%c0_17, %c0_18] : memref<8x2048xbf16, #tpu.memory_space<vmem>>, vector<8x2048xbf16>
      tpu.vector_store %arg13[%c0_17, %c0_18], %15 {strides = array<i32>} : memref<8x2048xbf16, #tpu.memory_space<vmem>>, vector<8x2048xbf16>,
      %c0_19 = arith.constant 0 : index
      %c0_20 = arith.constant 0 : index
      %17 = vector.load %arg4[%c0_19, %c0_20] : memref<1x2048xf32, #tpu.memory_space<vmem>>, vector<1x2048xf32>
      %c0_21 = arith.constant 0 : index
      %c0_22 = arith.constant 0 : index
      %18 = vector.load %arg5[%c0_21, %c0_22] : memref<1x2048xf32, #tpu.memory_space<vmem>>, vector<1x2048xf32>
      %c0_23 = arith.constant 0 : index
      %c0_24 = arith.constant 0 : index
      %19 = vector.load %arg2[%c0_23, %c0_24] : memref<8x2048xf32, #tpu.memory_space<vmem>>, vector<8x2048xf32>
      %20 = arith.addf %14, %19 : vector<8x2048xf32>
      %c0_25 = arith.constant 0 : index
      %c0_26 = arith.constant 0 : index
      %21 = vector.load %arg11[%c0_25, %c0_26] : memref<8x2048xf32, #tpu.memory_space<vmem>>, vector<8x2048xf32>
      tpu.vector_store %arg11[%c0_25, %c0_26], %20 {strides = array<i32>} : memref<8x2048xf32, #tpu.memory_space<vmem>>, vector<8x2048xf32>,
      %cst_27 = arith.constant dense<0.000000e+00> : vector<2048xf32>
      %22 = vector.multi_reduction <add>, %20, %cst_27 [0] : vector<8x2048xf32> to vector<2048xf32>
      %23 = vector.shape_cast %22 : vector<2048xf32> to vector<1x2048xf32>
      %cst_28 = arith.constant 8.000000e+00 : f32
      %24 = vector.broadcast %cst_28 : f32 to vector<1x2048xf32>
      %25 = arith.divf %23, %24 : vector<1x2048xf32>
      %26 = vector.broadcast %25 : vector<1x2048xf32> to vector<8x2048xf32>
      %27 = arith.subf %20, %26 : vector<8x2048xf32>
      %28 = arith.mulf %27, %27 : vector<8x2048xf32>
      %cst_29 = arith.constant dense<0.000000e+00> : vector<2048xf32>
      %29 = vector.multi_reduction <add>, %28, %cst_29 [0] : vector<8x2048xf32> to vector<2048xf32>
      %30 = vector.shape_cast %29 : vector<2048xf32> to vector<1x2048xf32>
      %cst_30 = arith.constant 8.000000e+00 : f32
      %31 = vector.broadcast %cst_30 : f32 to vector<1x2048xf32>
      %32 = arith.divf %30, %31 : vector<1x2048xf32>
      %cst_31 = arith.constant 9.99999974E-6 : f32
      %33 = vector.broadcast %cst_31 : f32 to vector<1x2048xf32>
      %34 = arith.addf %32, %33 : vector<1x2048xf32>
      %35 = math.rsqrt %34 : vector<1x2048xf32>
      %36 = arith.mulf %17, %35 : vector<1x2048xf32>
      %37 = vector.broadcast %36 : vector<1x2048xf32> to vector<8x2048xf32>
      %38 = arith.mulf %27, %37 : vector<8x2048xf32>
      %39 = vector.broadcast %18 : vector<1x2048xf32> to vector<8x2048xf32>
      %40 = arith.addf %38, %39 : vector<8x2048xf32>
      %41 = arith.truncf %40 : vector<8x2048xf32> to vector<8x2048xbf16>
      %c0_32 = arith.constant 0 : index
      %c0_33 = arith.constant 0 : index
      %42 = vector.load %arg14[%c0_32, %c0_33] : memref<16x2048xbf16, #tpu.memory_space<vmem>>, vector<8x2048xbf16>
      tpu.vector_store %arg14[%c0_32, %c0_33], %41 {strides = array<i32>} : memref<16x2048xbf16, #tpu.memory_space<vmem>>, vector<8x2048xbf16>,
      %c0_34 = arith.constant 0 : index
      %c0_35 = arith.constant 0 : index
      %43 = vector.load %arg3[%c0_34, %c0_35] : memref<8x2048xf32, #tpu.memory_space<vmem>>, vector<8x2048xf32>
      %44 = arith.addf %14, %43 : vector<8x2048xf32>
      %c0_36 = arith.constant 0 : index
      %c0_37 = arith.constant 0 : index
      %45 = vector.load %arg12[%c0_36, %c0_37] : memref<8x2048xf32, #tpu.memory_space<vmem>>, vector<8x2048xf32>
      tpu.vector_store %arg12[%c0_36, %c0_37], %44 {strides = array<i32>} : memref<8x2048xf32, #tpu.memory_space<vmem>>, vector<8x2048xf32>,
      %cst_38 = arith.constant dense<0.000000e+00> : vector<2048xf32>
      %46 = vector.multi_reduction <add>, %44, %cst_38 [0] : vector<8x2048xf32> to vector<2048xf32>
      %47 = vector.shape_cast %46 : vector<2048xf32> to vector<1x2048xf32>
      %cst_39 = arith.constant 8.000000e+00 : f32
      %48 = vector.broadcast %cst_39 : f32 to vector<1x2048xf32>
      %49 = arith.divf %47, %48 : vector<1x2048xf32>
      %50 = vector.broadcast %49 : vector<1x2048xf32> to vector<8x2048xf32>
      %51 = arith.subf %44, %50 : vector<8x2048xf32>
      %52 = arith.mulf %51, %51 : vector<8x2048xf32>
      %cst_40 = arith.constant dense<0.000000e+00> : vector<2048xf32>
      %53 = vector.multi_reduction <add>, %52, %cst_40 [0] : vector<8x2048xf32> to vector<2048xf32>
      %54 = vector.shape_cast %53 : vector<2048xf32> to vector<1x2048xf32>
      %cst_41 = arith.constant 8.000000e+00 : f32
      %55 = vector.broadcast %cst_41 : f32 to vector<1x2048xf32>
      %56 = arith.divf %54, %55 : vector<1x2048xf32>
      %cst_42 = arith.constant 9.99999974E-6 : f32
      %57 = vector.broadcast %cst_42 : f32 to vector<1x2048xf32>
      %58 = arith.addf %56, %57 : vector<1x2048xf32>
      %59 = math.rsqrt %58 : vector<1x2048xf32>
      %60 = arith.mulf %17, %59 : vector<1x2048xf32>
      %61 = vector.broadcast %60 : vector<1x2048xf32> to vector<8x2048xf32>
      %62 = arith.mulf %51, %61 : vector<8x2048xf32>
      %63 = vector.broadcast %18 : vector<1x2048xf32> to vector<8x2048xf32>
      %64 = arith.addf %62, %63 : vector<8x2048xf32>
      %65 = arith.truncf %64 : vector<8x2048xf32> to vector<8x2048xbf16>
      %c8 = arith.constant 8 : index
      %c0_43 = arith.constant 0 : index
      %66 = vector.load %arg14[%c8, %c0_43] : memref<16x2048xbf16, #tpu.memory_space<vmem>>, vector<8x2048xbf16>
      tpu.vector_store %arg14[%c8, %c0_43], %65 {strides = array<i32>} : memref<16x2048xbf16, #tpu.memory_space<vmem>>, vector<8x2048xbf16>,
    } else {
    }
    %c0 = arith.constant 0 : index
    %c0_1 = arith.constant 0 : index
    %3 = vector.load %arg14[%c0, %c0_1] : memref<16x2048xbf16, #tpu.memory_space<vmem>>, vector<16x2048xbf16>
    %c0_2 = arith.constant 0 : index
    %c0_3 = arith.constant 0 : index
    %4 = vector.load %arg7[%c0_2, %c0_3] : memref<2048x128xbf16, #tpu.memory_space<vmem>>, vector<2048x128xbf16>
    %cst = arith.constant dense<0.000000e+00> : vector<16x128xf32>
    %5 = tpu.matmul %3, %4, %cst {dimension_numbers = #tpu.dot_dimension_numbers<[1], [0], [0], [1], [0, 0, 1, 1], [], []>} : vector<16x2048xbf16>, vector<2048x128xbf16>, vector<16x128xf32> -> vector<16x128xf32>
    %6 = vector.extract_strided_slice %5 {offsets = [0, 0], sizes = [8, 128], strides = [1, 1]} : vector<16x128xf32> to vector<8x128xf32>
    %c0_4 = arith.constant 0 : index
    %c0_5 = arith.constant 0 : index
    %7 = vector.load %arg9[%c0_4, %c0_5] : memref<8x128xf32, #tpu.memory_space<vmem>>, vector<8x128xf32>
    tpu.vector_store %arg9[%c0_4, %c0_5], %6 {strides = array<i32>} : memref<8x128xf32, #tpu.memory_space<vmem>>, vector<8x128xf32>,
    %8 = vector.extract_strided_slice %5 {offsets = [8, 0], sizes = [8, 128], strides = [1, 1]} : vector<16x128xf32> to vector<8x128xf32>
    %c0_6 = arith.constant 0 : index
    %c0_7 = arith.constant 0 : index
    %9 = vector.load %arg10[%c0_6, %c0_7] : memref<8x128xf32, #tpu.memory_space<vmem>>, vector<8x128xf32>
    tpu.vector_store %arg10[%c0_6, %c0_7], %8 {strides = array<i32>} : memref<8x128xf32, #tpu.memory_space<vmem>>, vector<8x128xf32>,
    %c0_8 = arith.constant 0 : index
    %c0_9 = arith.constant 0 : index
    %10 = vector.load %arg13[%c0_8, %c0_9] : memref<8x2048xbf16, #tpu.memory_space<vmem>>, vector<8x2048xbf16>
    %c0_10 = arith.constant 0 : index
    %c0_11 = arith.constant 0 : index
    %11 = vector.load %arg6[%c0_10, %c0_11] : memref<2048x128xbf16, #tpu.memory_space<vmem>>, vector<2048x128xbf16>
    %cst_12 = arith.constant dense<0.000000e+00> : vector<8x128xf32>
    %12 = tpu.matmul %10, %11, %cst_12 {dimension_numbers = #tpu.dot_dimension_numbers<[1], [0], [0], [1], [0, 0, 1, 1], [], []>} : vector<8x2048xbf16>, vector<2048x128xbf16>, vector<8x128xf32> -> vector<8x128xf32>
    %c0_13 = arith.constant 0 : index
    %c0_14 = arith.constant 0 : index
    %13 = vector.load %arg8[%c0_13, %c0_14] : memref<8x128xf32, #tpu.memory_space<vmem>>, vector<8x128xf32>
    tpu.vector_store %arg8[%c0_13, %c0_14], %12 {strides = array<i32>} : memref<8x128xf32, #tpu.memory_space<vmem>>, vector<8x128xf32>,
    return
  }
  func.func @transform_0(%arg0: i32) -> (i32, i32) {
    %c0_i32 = arith.constant 0 : i32
    %c0_i32_0 = arith.constant 0 : i32
    %c0_i32_1 = arith.constant 0 : i32
    return %c0_i32, %c0_i32_0 : i32, i32
  }
  func.func @transform_1(%arg0: i32) -> (i32, i32) {
    %c0_i32 = arith.constant 0 : i32
    %c0_i32_0 = arith.constant 0 : i32
    %c0_i32_1 = arith.constant 0 : i32
    return %c0_i32, %c0_i32_0 : i32, i32
  }
  func.func @transform_2(%arg0: i32) -> (i32, i32) {
    %c0_i32 = arith.constant 0 : i32
    %c0_i32_0 = arith.constant 0 : i32
    %c0_i32_1 = arith.constant 0 : i32
    return %c0_i32, %c0_i32_0 : i32, i32
  }
  func.func @transform_3(%arg0: i32) -> (i32, i32) {
    %c0_i32 = arith.constant 0 : i32
    %c0_i32_0 = arith.constant 0 : i32
    %c0_i32_1 = arith.constant 0 : i32
    return %c0_i32, %c0_i32_0 : i32, i32
  }
  func.func @transform_4(%arg0: i32) -> (i32, i32) {
    %c0_i32 = arith.constant 0 : i32
    %c0_i32_0 = arith.constant 0 : i32
    %c0_i32_1 = arith.constant 0 : i32
    return %c0_i32, %c0_i32_0 : i32, i32
  }
  func.func @transform_5(%arg0: i32) -> (i32, i32) {
    %c0_i32 = arith.constant 0 : i32
    %c0_i32_0 = arith.constant 0 : i32
    return %c0_i32, %arg0 : i32, i32
  }
  func.func @transform_6(%arg0: i32) -> (i32, i32) {
    %c0_i32 = arith.constant 0 : i32
    %c0_i32_0 = arith.constant 0 : i32
    return %c0_i32, %arg0 : i32, i32
  }
  func.func @transform_7(%arg0: i32) -> (i32, i32) {
    %c0_i32 = arith.constant 0 : i32
    %c0_i32_0 = arith.constant 0 : i32
    return %c0_i32, %arg0 : i32, i32
  }
  func.func @transform_8(%arg0: i32) -> (i32, i32) {
    %c0_i32 = arith.constant 0 : i32
    %c0_i32_0 = arith.constant 0 : i32
    return %c0_i32, %arg0 : i32, i32
  }
  func.func @transform_9(%arg0: i32) -> (i32, i32) {
    %c0_i32 = arith.constant 0 : i32
    %c0_i32_0 = arith.constant 0 : i32
    return %c0_i32, %arg0 : i32, i32
  }
  func.func @transform_10(%arg0: i32) -> (i32, i32) {
    %c0_i32 = arith.constant 0 : i32
    %c0_i32_0 = arith.constant 0 : i32
    %c0_i32_1 = arith.constant 0 : i32
    return %c0_i32, %c0_i32_0 : i32, i32
  }
  func.func @transform_11(%arg0: i32) -> (i32, i32) {
    %c0_i32 = arith.constant 0 : i32
    %c0_i32_0 = arith.constant 0 : i32
    %c0_i32_1 = arith.constant 0 : i32
    return %c0_i32, %c0_i32_0 : i32, i32
  }
}

</mosaic_0001>

<bundles_post_ra>
// kernel: tpu_custom_call.1
= control target key start
LH: loop header
LB: loop body
LE: loop exit
PB: predicated region body
PF: predicated region fallthrough
CT: control target
= control target key end

     0   :  { %s8016_s0 = inlined_call_operand.hbm [shape: f32[8,2048], index: 0, kind: input, shape index: {}]   ;;  %s8017_s1 = inlined_call_operand.hbm [shape: f32[8,2048], index: 1, kind: input, shape index: {}]   ;;  %s8018_s2 = inlined_call_operand.hbm [shape: f32[8,2048], index: 2, kind: input, shape index: {}]   ;;  %s8019_s3 = inlined_call_operand.hbm [shape: f32[1,2048], index: 3, kind: input, shape index: {}]   ;;  %s8020_s4 = inlined_call_operand.hbm [shape: f32[1,2048], index: 4, kind: input, shape index: {}]   ;;  %s8021_s5 = inlined_call_operand.hbm [shape: bf16[2048,256], index: 5, kind: input, shape index: {}]   ;;  %s8022_s6 = inlined_call_operand.hbm [shape: bf16[2048,256], index: 6, kind: input, shape index: {}]   ;;  %s8023_s7 = inlined_call_operand.hbm [shape: f32[8,256], index: 7, kind: output, shape index: {0}]   ;;  %s8024_s8 = inlined_call_operand.hbm [shape: f32[8,256], index: 8, kind: output, shape index: {1}]   ;;  %s8025_s9 = inlined_call_operand.hbm [shape: f32[8,256], index: 9, kind: output, shape index: {2}]   ;;  %s8026_s10 = inlined_call_operand.hbm [shape: f32[8,2048], index: 10, kind: output, shape index: {3}]   ;;  %s8027_s11 = inlined_call_operand.hbm [shape: f32[8,2048], index: 11, kind: output, shape index: {4}]  }
   0x1   :  { %8065 = sst [smem:[#allocation53_spill]] %s8017_s1 }
   0x2   :  { %8066 = sst [smem:[#allocation54_spill]] %s8019_s3 }
   0x3   :  { %8067 = sst [smem:[#allocation55_spill]] %s8021_s5 }
   0x4   :  { %8068 = sst [smem:[#allocation56_spill]] %s8023_s7 }
   0x5   :  { %8069 = sst [smem:[#allocation57_spill]] %s8024_s8 }
   0x6   :  { %8070 = sst [smem:[#allocation58_spill]] %s8025_s9 }
   0x7   :  { %8071 = sst [smem:[#allocation59_spill]] %s8026_s10 }
   0x8   :  { %8072 = sst [smem:[#allocation60_spill]] %s8027_s11 }
   0x9   :  { %17 = vsyncpa [#allocation5], 0 }
   0xa   :  { %18 = vsyncpa [#allocation8], 0 }
   0xb   :  { %19 = vsyncpa [#allocation11], 0 }
   0xc   :  { %20 = vsyncpa [#allocation14], 0 }
   0xd   :  { %22 = vsyncpa [#allocation14 + $0x1], 0 }
   0xe   :  { %23 = vsyncpa [#allocation6], 0 }
   0xf   :  { %25 = vsyncpa [#allocation6 + $0x1], 0 }
  0x10   :  { %26 = vsyncpa [#allocation18], 0 }
  0x11   :  { %28 = vsyncpa [#allocation18 + $0x1], 0 }
  0x12   :  { %29 = vsyncpa [#allocation21], 0  ;;  %s6792_s17 = smov 0   ;;  %s6794_s18 = smov 0  }
  0x13   :  { %s6796_s19 = smov 0   ;;  %s6798_s20 = smov 0  }
  0x14 LB: > { %8073 = sst [smem:[#allocation30_spill]] %s6702_s17  ;;  %s6813_s21 = sadd.s32 4294967295, %s6714_s20   ;;  %s6714_s20 = sphi %s6798_s20, %s8164_s20   ;;  %s6710_s19 = sphi %s6796_s19, %s8166_s19   ;;  %s6706_s18 = sphi %s6794_s18, %s8168_s18   ;;  %s6702_s17 = sphi %s6792_s17, %s8167_s17  }
  0x15   : > { %8074 = sst [smem:[#allocation31_spill]] %s6710_s19  ;;  %s8031_s22 = sadd.s32 4294967294, %s6714_s20  }
  0x16   : > { %p160_p0 = scmp.ne.s32.totalorder %s6706_s18, %s6702_s17  ;;  %p8028_p1 = scmp.eq.s32.totalorder %s6813_s21, 0 }
  0x17   : > { %p216_p3 = scmp.eq.s32.totalorder %s8031_s22, 1  ;;  %p5130_p5 = scmp.ge.s32.totalorder %s6714_s20, 1 }
  0x18   : > { %p6824_p4 = por %p8028_p1, %p160_p0  ;;  %p317_p7 = scmp.lt.s32.totalorder %s6714_s20, 3 }
  0x19   : > { %p6829_p6 = por %p216_p3, %p160_p0  ;;  %s6716_s26 = smov [#allocation7]  }
  0x1a   : > { %s8075_s23 = scalar_select %p6824_p4, 1, 0 }
  0x1b   : > { %s8076_s24 = scalar_select %p6829_p6, 1, 0 }
  0x1c   : > { %p6835_p9 = pnand %p5130_p5, %p317_p7  ;;  %s341_s27 = sshll.u32 %s6716_s26, 4  ;;  %s342_s27 = int_to_ptr.vmem [resolvable:$true] %s341_s27 }
  0x1d   : > { %8077 = sst [smem:[#allocation32_spill]] %s8076_s24  ;;  %s6717_s28 = smov [#allocation10]  }
  0x1e   : > { %s8078_s25 = scalar_select %p6835_p9, 1, 0 }
  0x1f   : > { %p5891_p11 = pneg %p6835_p9  ;;  %s363_s29 = sshll.u32 %s6717_s28, 4  ;;  %s364_s29 = int_to_ptr.vmem [resolvable:$true] %s363_s29 }
  0x20   : > { %s6849_s12 = sadd.s32 1, %s6714_s20   ;;  %s6355_s15 = scalar_lea.vmem %s342_s27, 2048 }
  0x21   : > { %p6844_p12 = pnand %p5891_p11, %p8028_p1  ;;  %8080 = sst [smem:[#allocation33_spill]] %s6849_s12 }
  0x22   : > { %s144_s13 = ssub.s32 %s6714_s20, %s6849_s12  ;;  %p6356_p0 = scmp.ne.s32.totalorder %s342_s27, %s6355_s15 }
  0x23   : > { %s8079_s30 = scalar_select %p6844_p12, 1, 0 }
  0x24   : > { %p6855_p13 = pneg %p6844_p12  ;;  %p6363_p7 = scmp.lt.s32.totalorder %s342_s27, %s342_s27 }
  0x25   : > { %p6364_p11 = scmp.lt.s32.totalorder %s6355_s15, %s6355_s15 }
  0x26   : > { %p6358_p3 = pnand %p6356_p0, %p6855_p13 }
  0x27   : > { %p6365_p10 = por %p6364_p11, %p6363_p7 }
  0x28   : > { %p6359_p5 = pneg %p6358_p3 }
  0x2a   : > { %p6366_p8 = pnand %p6365_p10, %p6359_p5 }
  0x2c   : > { %6369 = shalt.err (!%p6366_p8)
}
  0x2d   : > { %s8082_s1 = sld [smem:[#allocation53_spill]]  ;;  %s6381_s28 = scalar_lea.vmem %s364_s29, 256 }
  0x2e   : > { %p6382_p1 = scmp.ne.s32.totalorder %s364_s29, %s6381_s28  ;;  %p6389_p4 = scmp.lt.s32.totalorder %s364_s29, %s364_s29 }
  0x2f   : > { %p6390_p0 = scmp.lt.s32.totalorder %s6381_s28, %s6381_s28 }
  0x30   : > { %p6384_p2 = pnand %p6382_p1, %p6855_p13 }
  0x31   : > { %p6391_p3 = por %p6390_p0, %p6389_p4 }
  0x32   : > { %p6385_p6 = pneg %p6384_p2 }
  0x33   : > { %5897 = dma.hbm_to_vmem [thread:$0]  (!%p6844_p12), %s8082_s1, 2048, %s342_s27, [#allocation8]  }
  0x34   : > { %p6392_p9 = pnand %p6391_p3, %p6385_p6 }
  0x36   : > { %6395 = shalt.err (!%p6392_p9)
}
  0x37   : > { %s8083_s3 = sld [smem:[#allocation54_spill]]  ;;  %p145_p1 = scmp.eq.s32.totalorder %s144_s13, 0 }
  0x38   : > { %s147_s27 = sadd.s32 1, %s6710_s19  ;;  %p154_p2 = scmp.ne.s32.totalorder %s6710_s19, %s6706_s18 }
  0x39   : > { %p155_p4 = scmp.eq.s32.totalorder %s6714_s20, 0  ;;  %p8085_p8 = scmp.eq.s32.totalorder %s6813_s21, 1 }
  0x3a   : > { %s6878_s16 = scalar_select %p145_p1, %s6710_s19, %s147_s27  }
  0x3b   : > { %p156_p6 = por %p155_p4, %p154_p2  ;;  %p6882_p9 = por %p8085_p8, %p154_p2 }
  0x3c   : > { %8084 = sst [smem:[#allocation34_spill]] %s6878_s16  ;;  %p5929_p10 = scmp.lt.s32.totalorder %s6714_s20, 2 }
  0x3d   : > { %5903 = dma.hbm_to_vmem [thread:$0]  (!%p6844_p12), %s8083_s3, 256, %s364_s29, [#allocation11]  }
  0x3e   : > { %s8086_s22 = scalar_select %p6882_p9, 1, 0 }
  0x3f   : > { %s385_s26 = sand.u32 1, %s6714_s20   ;;  %s387_s28 = sand.u32 1, %s6710_s19  }
  0x40   : > { %s6889_s15 = sshll.u32 %s387_s28, 10  ;;  %s8035_s1 = sshll.u32 %s6714_s20, 6 }
  0x41   : > { %s8087_s5 = sld [smem:[#allocation55_spill]]  ;;  %s389_s27 = scalar_lea.vmem [#allocation13], %s6889_s15 }
  0x42   : > { %s395_s16 = sshll.u32 %s389_s27, 4  ;;  %p6900_p5 = pnand %p5929_p10, %p156_p6  ;;  %s6904_s16 = int_to_ptr.vmem [resolvable:$true] %s395_s16 }
  0x43   : > { %s6906_s28 = scalar_lea.sflag [#allocation14], %s385_s26 }
  0x44   : > { %s8088_s12 = scalar_select %p6900_p5, 1, 0 }
  0x45   : > { %p8044_p11 = pneg %p6900_p5 }
  0x47   : > { %s6897_s3 = scalar_lea.hbm %s8087_s5, %s8035_s1  ;;  %s6401_s27 = scalar_lea.hbm %s8087_s5, 32768 }
  0x48   : > { %s6396_s19 = scalar_lea.hbm %s6897_s3, 16384  ;;  %p6402_p1 = scmp.lt.s32.totalorder %s6897_s3, %s8087_s5 }
  0x49   : > { %p6397_p7 = scmp.ne.s32.totalorder %s6897_s3, %s6396_s19  ;;  %p6403_p2 = scmp.lt.s32.totalorder %s6401_s27, %s6396_s19 }
  0x4b   : > { %p6399_p0 = pnand %p8044_p11, %p6397_p7  ;;  %p6404_p4 = por %p6403_p2, %p6402_p1 }
  0x4d   : > { %p6400_p3 = pneg %p6399_p0 }
  0x4f   : > { %p6405_p6 = pnand %p6404_p4, %p6400_p3 }
  0x51   : > { %6408 = shalt.err (!%p6405_p6)
}
  0x52   : > { %s6409_s26 = scalar_lea.vmem %s6904_s16, 16384  ;;  %s6718_s29 = smov [#allocation13]  }
  0x53   : > { %p6410_p8 = scmp.ne.s32.totalorder %s6904_s16, %s6409_s26  ;;  %s6414_s13 = sshll.u32 %s6718_s29, 4  ;;  %s6415_s13 = int_to_ptr.vmem [resolvable:$false] %s6414_s13 }
  0x54   : > { %s6416_s17 = scalar_lea.vmem %s6415_s13, 32768  ;;  %p6417_p0 = scmp.lt.s32.totalorder %s6904_s16, %s6415_s13 }
  0x55   : > { %p6412_p10 = pnand %p6410_p8, %p8044_p11  ;;  %p6418_p9 = scmp.lt.s32.totalorder %s6416_s17, %s6409_s26 }
  0x57   : > { %p6413_p7 = pneg %p6412_p10  ;;  %p6419_p12 = por %p6418_p9, %p6417_p0 }
  0x59   : > { %p6420_p1 = pnand %p6419_p12, %p6413_p7 }
  0x5b   : > { %6423 = shalt.err (!%p6420_p1)
}
  0x5c   : > { %s6719_s1 = smov 128   ;;  %s6720_s19 = smov 64  }
  0x5d   : > { %s6721_s24 = smov 4   ;;  %s8089_s27 = sshll.u32 %s6714_s20, 6 }
  0x5e   : > { %5910 = dma.hbm_to_vmem [thread:$0]  (!%p6900_p5), %s6897_s3, 16384, %s6904_s16, %s6906_s28, %s6719_s1, %s6720_s19, %s6721_s24  }
  0x5f   : > { %s6941_s29 = scalar_lea.hbm %s8022_s6, %s8089_s27  ;;  %s409_s13 = scalar_lea.vmem [#allocation15], %s6889_s15 }
  0x60   : > { %s415_s5 = sshll.u32 %s409_s13, 4  ;;  %s6722_s7 = smov [#allocation4]   ;;  %s6958_s5 = int_to_ptr.vmem [resolvable:$true] %s415_s5 }
  0x61   : > { %s330_s11 = sshll.u32 %s6722_s7, 4  ;;  %s6723_s9 = smov [#allocation9]   ;;  %s331_s11 = int_to_ptr.vmem [resolvable:$true] %s330_s11 }
  0x62   : > { %s352_s10 = sshll.u32 %s6723_s9, 4  ;;  %s6435_s8 = scalar_lea.vmem %s331_s11, 2048  ;;  %s353_s10 = int_to_ptr.vmem [resolvable:$true] %s352_s10 }
  0x63   : > { %p6436_p12 = scmp.ne.s32.totalorder %s331_s11, %s6435_s8  ;;  %p6443_p2 = scmp.lt.s32.totalorder %s331_s11, %s331_s11 }
  0x64   : > { %p6444_p4 = scmp.lt.s32.totalorder %s6435_s8, %s6435_s8 }
  0x65   : > { %p6438_p9 = pnand %p6436_p12, %p6855_p13 }
  0x66   : > { %p6445_p6 = por %p6444_p4, %p6443_p2 }
  0x67   : > { %p6439_p3 = pneg %p6438_p9 }
  0x69   : > { %p6446_p8 = pnand %p6445_p6, %p6439_p3 }
  0x6b   : > { %6449 = shalt.err (!%p6446_p8)
}
  0x6c   : > { %p8090_p10 = scmp.ne.s32.totalorder %s8079_s30, 0  ;;  %s6461_s7 = scalar_lea.vmem %s353_s10, 2048 }
  0x6d   : > { %p6462_p7 = scmp.ne.s32.totalorder %s353_s10, %s6461_s7  ;;  %p6469_p12 = scmp.lt.s32.totalorder %s353_s10, %s353_s10 }
  0x6e   : > { %5894 = dma.hbm_to_vmem [thread:$0]  (!%p8090_p10), %s8016_s0, 2048, %s331_s11, [#allocation5]  }
  0x6f   : > { %p6464_p0 = pnand %p6462_p7, %p6855_p13  ;;  %p6470_p9 = scmp.lt.s32.totalorder %s6461_s7, %s6461_s7 }
  0x71   : > { %p6465_p1 = pneg %p6464_p0  ;;  %p6471_p11 = por %p6470_p9, %p6469_p12 }
  0x73   : > { %p6472_p5 = pnand %p6471_p11, %p6465_p1 }
  0x75   : > { %6475 = shalt.err (!%p6472_p5)
}
  0x76   : > { %5900 = dma.hbm_to_vmem [thread:$0]  (!%p8090_p10), %s8018_s2, 2048, %s353_s10, [#allocation8]  }
  0x77   : > { %s6724_s11 = smov [#allocation12]  }
  0x78   : > { %s374_s15 = sshll.u32 %s6724_s11, 4  ;;  %s375_s15 = int_to_ptr.vmem [resolvable:$true] %s374_s15 }
  0x79   : > { %s6487_s27 = scalar_lea.vmem %s375_s15, 256  ;;  %p6495_p6 = scmp.lt.s32.totalorder %s375_s15, %s375_s15 }
  0x7a   : > { %p6488_p3 = scmp.ne.s32.totalorder %s375_s15, %s6487_s27  ;;  %p6496_p11 = scmp.lt.s32.totalorder %s6487_s27, %s6487_s27 }
  0x7c   : > { %p6490_p2 = pnand %p6488_p3, %p6855_p13  ;;  %p6497_p5 = por %p6496_p11, %p6495_p6 }
  0x7e   : > { %p6491_p4 = pneg %p6490_p2 }
  0x80   : > { %p6498_p8 = pnand %p6497_p5, %p6491_p4 }
  0x82   : > { %6501 = shalt.err (!%p6498_p8)
}
  0x83   : > { %5906 = dma.hbm_to_vmem [thread:$0]  (!%p8090_p10), %s8020_s4, 256, %s375_s15, [#allocation11]  }
  0x84   : > { %s6502_s10 = scalar_lea.hbm %s6941_s29, 16384  ;;  %p8091_p0 = scmp.ne.s32.totalorder %s8088_s12, 0 }
  0x85   : > { %p6503_p7 = scmp.ne.s32.totalorder %s6941_s29, %s6502_s10  ;;  %s6507_s3 = scalar_lea.hbm %s8022_s6, 32768 }
  0x86   : > { %p8092_p13 = pneg %p8091_p0  ;;  %p6508_p9 = scmp.lt.s32.totalorder %s6941_s29, %s8022_s6 }
  0x87   : > { %p6509_p3 = scmp.lt.s32.totalorder %s6507_s3, %s6502_s10 }
  0x88   : > { %p6505_p1 = pnand %p6503_p7, %p8092_p13 }
  0x89   : > { %p6510_p2 = por %p6509_p3, %p6508_p9 }
  0x8a   : > { %p6506_p12 = pneg %p6505_p1 }
  0x8c   : > { %p6511_p4 = pnand %p6510_p2, %p6506_p12 }
  0x8e   : > { %6514 = shalt.err (!%p6511_p4)
}
  0x8f   : > { %s6515_s7 = scalar_lea.vmem %s6958_s5, 16384  ;;  %p8093_p6 = pmov %p8092_p13 }
  0x90   : > { %p6516_p10 = scmp.ne.s32.totalorder %s6958_s5, %s6515_s7  ;;  %s6725_s8 = smov [#allocation15]  }
  0x91   : > { %s6520_s9 = sshll.u32 %s6725_s8, 4  ;;  %s6521_s9 = int_to_ptr.vmem [resolvable:$false] %s6520_s9 }
  0x92   : > { %p6518_p11 = pnand %p6516_p10, %p8093_p6  ;;  %s6522_s11 = scalar_lea.vmem %s6521_s9, 32768 }
  0x93   : > { %p6523_p8 = scmp.lt.s32.totalorder %s6958_s5, %s6521_s9  ;;  %p6524_p7 = scmp.lt.s32.totalorder %s6522_s11, %s6515_s7 }
  0x94   : > { %p6519_p5 = pneg %p6518_p11 }
  0x95   : > { %p6525_p13 = por %p6524_p7, %p6523_p8 }
  0x97   : > { %p6526_p1 = pnand %p6525_p13, %p6519_p5 }
  0x99   : > { %6529 = shalt.err (!%p6526_p1)
}
  0x9a   : > { %5913 = dma.hbm_to_vmem [thread:$0]  (!%p8091_p0), %s6941_s29, 16384, %s6958_s5, %s6906_s28, %s6719_s1, %s6720_s19, %s6721_s24  }
  0x9b   : > { %p8094_p12 = scmp.ne.s32.totalorder %s8078_s25, 0 }
  0x9c   : > { %p8095_p9 = scmp.eq.s32.totalorder (!%p8094_p12), %s6813_s21, 0 }
  0x9d   : > { %427 = sbr.rel (%p8094_p12) target bundleno = 889 (0x379), region = 48 }
  0xa2   : > { %6673 = dma.done.wait (%p8095_p9), [#allocation5], 2048   ;;  %p8096_p3 = pmov %p8095_p9 }
  0xa4   : > { %6675 = vsyncadd (%p8096_p3), [#allocation5], 4294965248  ;;  %p8097_p2 = pmov %p8096_p3 }
  0xa6   : > { %6677 = dma.done.wait (%p8097_p2), [#allocation8], 4096   ;;  %p8098_p4 = pmov %p8097_p2 }
  0xa7   : > { %p8099_p10 = pmov %p8097_p2 }
  0xa8   : > { %6679 = vsyncadd (%p8098_p4), [#allocation8], 4294963200 }
  0xa9   : > { %6681 = dma.done.wait (%p8099_p10), [#allocation11], 512   ;;  %p8100_p0 = pmov %p8097_p2 }
  0xaa   : > { %s449_s5 = sand.u32 1, %s6813_s21   ;;  %s7009_s25 = sand.u32 1, %s6706_s18  }
  0xab   : > { %6683 = vsyncadd (%p8100_p0), [#allocation11], 4294966784  ;;  %s5147_s12 = sshll.u32 %s7009_s25, 10  ;;  %s450_s28 = scalar_lea.sflag [#allocation14], %s449_s5 }
  0xac   : > { %s7014_s1 = scalar_lea.vmem [#allocation13], %s5147_s12  ;;  %p8101_p6 = scmp.ne.s32.totalorder %s8075_s23, 0 }
  0xae   : > { %6685 = dma.done.wait (%p8101_p6), %s450_s28, 32768  }
  0xaf   : > { %6687 = vsyncadd (%p8101_p6), %s450_s28, 4294934528  ;;  %s7021_s19 = sshll.u32 %s7009_s25, 3  ;;  %s7023_s24 = scalar_lea.vmem [#allocation15], %s5147_s12 }
  0xb0   : > { %s497_s29 = scalar_lea.vmem [#allocation16], %s7021_s19  ;;  %s504_s15 = scalar_lea.vmem [#allocation17], %s7021_s19 }
  0xb1   : > { %s511_s27 = scalar_lea.vmem [#allocation19], %s7021_s19  ;;  %p8102_p11 = scmp.ne.s32.totalorder %s6813_s21, 0 }
  0xb3   : > { %520 = sbr.rel (%p8102_p11) target bundleno = 412 (0x19c), region = 80 }
  0xb8   : > { %v521_v0 = vld [vmem:[#allocation4] sm:$0xff]  ;;  %v522_v1 = vld [vmem:[#allocation4 + $0x8] sm:$0xff]  ;;  %v523_v11 = vld [vmem:[#allocation4 + $0x10] sm:$0xff]  ;;  %v973_v14 = vlaneseq  ;;  %v6726_v24 = vmov 1966171168  }
  0xb9   : > { %v613_v2 = vld [vmem:[#allocation7] sm:$0xff]  ;;  %v5477_v3 = vpack.c.bf16 %v522_v1, %v521_v0  ;;  %v614_v4 = vld [vmem:[#allocation7 + $0x8] sm:$0xff]  ;;  %v524_v12 = vld [vmem:[#allocation4 + $0x18] sm:$0xff]  ;;  %v7034_v25 = vunpack.c.l.s4 %v6726_v24 }
  0xba   : > { %v629_v5 = vadd.f32 %v613_v2, %v521_v0  ;;  %v1336_v6 = vld [vmem:[#allocation9] sm:$0xff]  ;;  %v1337_v7 = vld [vmem:[#allocation9 + $0x8] sm:$0xff]  ;;  %v630_v8 = vadd.f32 %v614_v4, %v522_v1  ;;  %v615_v13 = vld [vmem:[#allocation7 + $0x10] sm:$0xff]  ;;  %v5478_v15 = vpack.c.bf16 %v524_v12, %v523_v11  ;;  %v7048_v36 = vshrl.u32 %v973_v14, 7 }
  0xbb   : > { %v1352_v9 = vadd.f32 %v1336_v6, %v521_v0  ;;  %v1353_v10 = vadd.f32 %v1337_v7, %v522_v1  ;;  %601 = vst [vmem:[#allocation2 + $0x30] sm:$0xff] %v5477_v3  ;;  %v616_v16 = vld [vmem:[#allocation7 + $0x18] sm:$0xff]  ;;  %v7030_v17 = vadd.f32 %v615_v13, %v523_v11  ;;  %v1338_v18 = vld [vmem:[#allocation9 + $0x10] sm:$0xff]  ;;  %v525_v21 = vld [vmem:[#allocation4 + $0x20] sm:$0xff] }
  0xbc   : > { %645 = vst [vmem:[#allocation20] sm:$0xff] %v629_v5  ;;  %v1339_v19 = vld [vmem:[#allocation9 + $0x18] sm:$0xff]  ;;  %646 = vst [vmem:[#allocation20 + $0x8] sm:$0xff] %v630_v8  ;;  %v7032_v20 = vadd.f32 %v616_v16, %v524_v12  ;;  %v526_v22 = vld [vmem:[#allocation4 + $0x28] sm:$0xff]  ;;  %v7037_v27 = vadd.f32 %v1338_v18, %v523_v11 }
  0xbd   : > { %1368 = vst [vmem:[#allocation22] sm:$0xff] %v1352_v9  ;;  %1369 = vst [vmem:[#allocation22 + $0x8] sm:$0xff] %v1353_v10  ;;  %v617_v23 = vld [vmem:[#allocation7 + $0x20] sm:$0xff]  ;;  %v673_v26 = vrot.slane %v7030_v17, 4  ;;  %v7039_v28 = vadd.f32 %v1339_v19, %v524_v12  ;;  %v5479_v29 = vpack.c.bf16 %v526_v22, %v525_v21  ;;  %v618_v30 = vld [vmem:[#allocation7 + $0x28] sm:$0xff] }
  0xbe   : > { %602 = vst [vmem:[#allocation2] sm:$0xff] %v5478_v15  ;;  %647 = vst [vmem:[#allocation20 + $0x10] sm:$0xff] %v7030_v17  ;;  %v1340_v31 = vld [vmem:[#allocation9 + $0x20] sm:$0xff]  ;;  %v1341_v32 = vld [vmem:[#allocation9 + $0x28] sm:$0xff]  ;;  %v679_v33 = vrot.slane %v7032_v20, 4  ;;  %v7044_v34 = vadd.f32 %v617_v23, %v525_v21  ;;  %v7046_v35 = vadd.f32 %v618_v30, %v526_v22  ;;  %v1396_v38 = vrot.slane %v7037_v27, 4 }
  0xbf   : > { %648 = vst [vmem:[#allocation20 + $0x18] sm:$0xff] %v7032_v20  ;;  %v674_v37 = vadd.f32 %v673_v26, %v7030_v17  ;;  %v1402_v39 = vrot.slane %v7039_v28, 4  ;;  %1370 = vst [vmem:[#allocation22 + $0x10] sm:$0xff] %v7037_v27  ;;  %v7055_v40 = vadd.f32 %v1340_v31, %v525_v21  ;;  %v7060_v44 = vadd.f32 %v1341_v32, %v526_v22 }
  0xc0   : > { %1371 = vst [vmem:[#allocation22 + $0x18] sm:$0xff] %v7039_v28  ;;  %603 = vst [vmem:[#allocation2 + $0x18] sm:$0xff] %v5479_v29  ;;  %v680_v41 = vadd.f32 %v679_v33, %v7032_v20  ;;  %v685_v42 = vrot.slane %v7044_v34, 4  ;;  %v691_v43 = vrot.slane %v7046_v35, 4  ;;  %v1397_v46 = vadd.f32 %v1396_v38, %v7037_v27 }
  0xc1   : > { %649 = vst [vmem:[#allocation20 + $0x20] sm:$0xff] %v7044_v34  ;;  %650 = vst [vmem:[#allocation20 + $0x28] sm:$0xff] %v7046_v35  ;;  %v675_v45 = vrot.slane %v674_v37, 2  ;;  %v1403_v47 = vadd.f32 %v1402_v39, %v7039_v28  ;;  %v1408_v48 = vrot.slane %v7055_v40, 4  ;;  %v1414_v52 = vrot.slane %v7060_v44, 4 }
  0xc2   : > { %1372 = vst [vmem:[#allocation22 + $0x20] sm:$0xff] %v7055_v40  ;;  %v681_v49 = vrot.slane %v680_v41, 2  ;;  %v686_v50 = vadd.f32 %v685_v42, %v7044_v34  ;;  %v692_v51 = vadd.f32 %v691_v43, %v7046_v35  ;;  %1373 = vst [vmem:[#allocation22 + $0x28] sm:$0xff] %v7060_v44  ;;  %v1398_v54 = vrot.slane %v1397_v46, 2 }
  0xc3   : > { %v676_v53 = vadd.f32 %v675_v45, %v674_v37  ;;  %v1404_v55 = vrot.slane %v1403_v47, 2  ;;  %v1409_v56 = vadd.f32 %v1408_v48, %v7055_v40  ;;  %v1415_v60 = vadd.f32 %v1414_v52, %v7060_v44 }
  0xc4   : > { %v682_v57 = vadd.f32 %v681_v49, %v680_v41  ;;  %v687_v58 = vrot.slane %v686_v50, 2  ;;  %v693_v59 = vrot.slane %v692_v51, 2  ;;  %v1399_v62 = vadd.f32 %v1398_v54, %v1397_v46 }
  0xc5   : > { %v677_v61 = vrot.slane %v676_v53, 1  ;;  %v1405_v63 = vadd.f32 %v1404_v55, %v1403_v47  ;;  %v1410_v0 = vrot.slane %v1409_v56, 2  ;;  %v1416_v4 = vrot.slane %v1415_v60, 2 }
  0xc6   : > { %v683_v1 = vrot.slane %v682_v57, 1  ;;  %v688_v2 = vadd.f32 %v687_v58, %v686_v50  ;;  %v694_v3 = vadd.f32 %v693_v59, %v692_v51  ;;  %v1400_v6 = vrot.slane %v1399_v62, 1 }
  0xc7   : > { %v678_v5 = vadd.f32 %v677_v61, %v676_v53  ;;  %v1406_v7 = vrot.slane %v1405_v63, 1  ;;  %v1411_v8 = vadd.f32 %v1410_v0, %v1409_v56  ;;  %v1417_v12 = vadd.f32 %v1416_v4, %v1415_v60 }
  0xc8   : > { %v684_v9 = vadd.f32 %v683_v1, %v682_v57  ;;  %v689_v10 = vrot.slane %v688_v2, 1  ;;  %v695_v11 = vrot.slane %v694_v3, 1  ;;  %v1401_v14 = vadd.f32 %v1400_v6, %v1399_v62 }
  0xc9   : > { %v760_v13 = vmul.f32 0.125, %v678_v5  ;;  %v1407_v15 = vadd.f32 %v1406_v7, %v1405_v63  ;;  %v1412_v16 = vrot.slane %v1411_v8, 1  ;;  %v1418_v22 = vrot.slane %v1417_v12, 1 }
  0xca   : > { %v761_v18 = vmul.f32 0.125, %v684_v9  ;;  %v690_v19 = vadd.f32 %v689_v10, %v688_v2  ;;  %v696_v21 = vadd.f32 %v695_v11, %v694_v3  ;;  %v1482_v24 = vmul.f32 0.125, %v1401_v14 }
  0xcb   : > { %v7075_v23 = vsub.f32 %v7030_v17, %v760_v13  ;;  %v1483_v26 = vmul.f32 0.125, %v1407_v15  ;;  %v1413_v29 = vadd.f32 %v1412_v16, %v1411_v8  ;;  %v1419_v33 = vadd.f32 %v1418_v22, %v1417_v12 }
  0xcc   : > { %v7078_v30 = vsub.f32 %v7032_v20, %v761_v18  ;;  %v762_v31 = vmul.f32 0.125, %v690_v19  ;;  %v763_v32 = vmul.f32 0.125, %v696_v21  ;;  %v7083_v38 = vsub.f32 %v7037_v27, %v1482_v24 }
  0xcd   : > { %v792_v37 = vmul.f32 %v7075_v23, %v7075_v23  ;;  %v7086_v39 = vsub.f32 %v7039_v28, %v1483_v26  ;;  %v1484_v17 = vmul.f32 0.125, %v1413_v29  ;;  %v1485_v43 = vmul.f32 0.125, %v1419_v33 }
  0xce   : > { %8103 = vst [vmem:[#allocation35_spill] sm:$0xff] %v7083_v38  ;;  %v793_v41 = vmul.f32 %v7078_v30, %v7078_v30  ;;  %v7091_v42 = vsub.f32 %v7044_v34, %v762_v31  ;;  %v7094_v20 = vsub.f32 %v7046_v35, %v763_v32  ;;  %v1514_v46 = vmul.f32 %v7083_v38, %v7083_v38 }
  0xcf   : > { %8104 = vst [vmem:[#allocation36_spill] sm:$0xff] %v7086_v39  ;;  %v818_v45 = vrot.slane %v792_v37, 4  ;;  %v1515_v27 = vmul.f32 %v7086_v39, %v7086_v39  ;;  %v7101_v28 = vsub.f32 %v7055_v40, %v1484_v17  ;;  %v7108_v35 = vsub.f32 %v7060_v44, %v1485_v43 }
  0xd0   : > { %v824_v47 = vrot.slane %v793_v41, 4  ;;  %v794_v48 = vmul.f32 %v7091_v42, %v7091_v42  ;;  %v795_v34 = vmul.f32 %v7094_v20, %v7094_v20  ;;  %v1540_v50 = vrot.slane %v1514_v46, 4 }
  0xd1   : > { %8105 = vst [vmem:[#allocation37_spill] sm:$0xff] %v7101_v28  ;;  %8106 = vst [vmem:[#allocation38_spill] sm:$0xff] %v7108_v35  ;;  %v819_v49 = vadd.f32 %v818_v45, %v792_v37  ;;  %v1546_v51 = vrot.slane %v1515_v27, 4  ;;  %v1516_v52 = vmul.f32 %v7101_v28, %v7101_v28  ;;  %v1517_v55 = vmul.f32 %v7108_v35, %v7108_v35 }
  0xd2   : > { %v825_v53 = vadd.f32 %v824_v47, %v793_v41  ;;  %v830_v54 = vrot.slane %v794_v48, 4  ;;  %v836_v40 = vrot.slane %v795_v34, 4  ;;  %v1541_v57 = vadd.f32 %v1540_v50, %v1514_v46 }
  0xd3   : > { %v820_v56 = vrot.slane %v819_v49, 2  ;;  %v1547_v58 = vadd.f32 %v1546_v51, %v1515_v27  ;;  %v1552_v59 = vrot.slane %v1516_v52, 4  ;;  %v1558_v62 = vrot.slane %v1517_v55, 4 }
  0xd4   : > { %v826_v60 = vrot.slane %v825_v53, 2  ;;  %v831_v61 = vadd.f32 %v830_v54, %v794_v48  ;;  %v837_v44 = vadd.f32 %v836_v40, %v795_v34  ;;  %v1542_v0 = vrot.slane %v1541_v57, 2  ;;  %v527_v48 = vld [vmem:[#allocation4 + $0x30] sm:$0xff]  ;;  %v528_v34 = vld [vmem:[#allocation4 + $0x38] sm:$0xff] }
  0xd5   : > { %v821_v63 = vadd.f32 %v820_v56, %v819_v49  ;;  %v1548_v1 = vrot.slane %v1547_v58, 2  ;;  %v1553_v2 = vadd.f32 %v1552_v59, %v1516_v52  ;;  %v1559_v6 = vadd.f32 %v1558_v62, %v1517_v55  ;;  %v620_v54 = vld [vmem:[#allocation7 + $0x38] sm:$0xff] }
  0xd6   : > { %v827_v3 = vadd.f32 %v826_v60, %v825_v53  ;;  %v832_v4 = vrot.slane %v831_v61, 2  ;;  %v838_v5 = vrot.slane %v837_v44, 2  ;;  %v1543_v8 = vadd.f32 %v1542_v0, %v1541_v57  ;;  %v619_v53 = vld [vmem:[#allocation7 + $0x30] sm:$0xff]  ;;  %v529_v0 = vld [vmem:[#allocation4 + $0x40] sm:$0xff] }
  0xd7   : > { %v822_v7 = vrot.slane %v821_v63, 1  ;;  %v1549_v9 = vadd.f32 %v1548_v1, %v1547_v58  ;;  %v1554_v10 = vrot.slane %v1553_v2, 2  ;;  %v1560_v14 = vrot.slane %v1559_v6, 2  ;;  %v1342_v57 = vld [vmem:[#allocation9 + $0x30] sm:$0xff]  ;;  %v621_v1 = vld [vmem:[#allocation7 + $0x40] sm:$0xff] }
  0xd8   : > { %v828_v11 = vrot.slane %v827_v3, 1  ;;  %v833_v12 = vadd.f32 %v832_v4, %v831_v61  ;;  %v839_v13 = vadd.f32 %v838_v5, %v837_v44  ;;  %v1544_v16 = vrot.slane %v1543_v8, 1  ;;  %v1343_v61 = vld [vmem:[#allocation9 + $0x38] sm:$0xff]  ;;  %v530_v5 = vld [vmem:[#allocation4 + $0x48] sm:$0xff] }
  0xd9   : > { %v823_v15 = vadd.f32 %v822_v7, %v821_v63  ;;  %v1550_v18 = vrot.slane %v1549_v9, 1  ;;  %v1555_v19 = vadd.f32 %v1554_v10, %v1553_v2  ;;  %v1561_v26 = vadd.f32 %v1560_v14, %v1559_v6  ;;  %v622_v6 = vld [vmem:[#allocation7 + $0x48] sm:$0xff] }
  0xda   : > { %v829_v21 = vadd.f32 %v828_v11, %v827_v3  ;;  %v834_v22 = vrot.slane %v833_v12, 1  ;;  %v840_v24 = vrot.slane %v839_v13, 1  ;;  %v1545_v31 = vadd.f32 %v1544_v16, %v1543_v8 }
  0xdb   : > { %v904_v29 = vmul.f32 0.125, %v823_v15  ;;  %v1551_v32 = vadd.f32 %v1550_v18, %v1549_v9  ;;  %v1556_v33 = vrot.slane %v1555_v19, 1  ;;  %v1562_v43 = vrot.slane %v1561_v26, 1  ;;  %v1345_v18 = vld [vmem:[#allocation9 + $0x48] sm:$0xff] }
  0xdc   : > { %v905_v37 = vmul.f32 0.125, %v829_v21  ;;  %v835_v17 = vadd.f32 %v834_v22, %v833_v12  ;;  %v841_v41 = vadd.f32 %v840_v24, %v839_v13  ;;  %v1626_v46 = vmul.f32 0.125, %v1545_v31  ;;  %v1344_v13 = vld [vmem:[#allocation9 + $0x40] sm:$0xff]  ;;  %v531_v24 = vld [vmem:[#allocation4 + $0x50] sm:$0xff] }
  0xdd   : > { %v920_v45 = vadd.f32 1e-05, %v904_v29  ;;  %v1627_v27 = vmul.f32 0.125, %v1551_v32  ;;  %v1557_v47 = vadd.f32 %v1556_v33, %v1555_v19  ;;  %v1563_v52 = vadd.f32 %v1562_v43, %v1561_v26  ;;  %v623_v26 = vld [vmem:[#allocation7 + $0x50] sm:$0xff]  ;;  %v532_v33 = vld [vmem:[#allocation4 + $0x58] sm:$0xff] }
  0xde   : > { %v921_v49 = vadd.f32 1e-05, %v905_v37  ;;  %v906_v50 = vmul.f32 0.125, %v835_v17  ;;  %v907_v51 = vmul.f32 0.125, %v841_v41  ;;  %v1642_v40 = vadd.f32 1e-05, %v1626_v46 }
  0xdf   : > { %5983 = vrsqrt.f32 %v920_v45  ;;  %v1643_v55 = vadd.f32 1e-05, %v1627_v27  ;;  %v1628_v56 = vmul.f32 0.125, %v1557_v47  ;;  %v1629_v60 = vmul.f32 0.125, %v1563_v52  ;;  %v624_v37 = vld [vmem:[#allocation7 + $0x58] sm:$0xff]  ;;  %v1346_v45 = vld [vmem:[#allocation9 + $0x50] sm:$0xff] }
  0xe0   : > { %5985 = vrsqrt.f32 %v921_v49  ;;  %v922_v58 = vadd.f32 1e-05, %v906_v50  ;;  %v923_v59 = vadd.f32 1e-05, %v907_v51  ;;  %v5480_v62 = vpack.c.bf16 %v528_v34, %v527_v48 }
  0xe1   : > { %5987 = vrsqrt.f32 %v1642_v40  ;;  %v1644_v44 = vadd.f32 1e-05, %v1628_v56  ;;  %v7114_v63 = vadd.f32 %v619_v53, %v527_v48  ;;  %v1645_v2 = vadd.f32 1e-05, %v1629_v60 }
  0xe2   : > { %5989 = vrsqrt.f32 %v1643_v55  ;;  %v7116_v3 = vadd.f32 %v620_v54, %v528_v34  ;;  %v7118_v4 = vadd.f32 %v1342_v57, %v527_v48  ;;  %604 = vst [vmem:[#allocation2 + $0x10] sm:$0xff] %v5480_v62  ;;  %v7121_v8 = vadd.f32 %v1343_v61, %v528_v34  ;;  %v1347_v48 = vld [vmem:[#allocation9 + $0x58] sm:$0xff] }
  0xe3   : > { %5991 = vrsqrt.f32 %v922_v58  ;;  %v697_v7 = vrot.slane %v7114_v63, 4  ;;  %651 = vst [vmem:[#allocation20 + $0x30] sm:$0xff] %v7114_v63  ;;  %v5481_v9 = vpack.c.bf16 %v530_v5, %v529_v0  ;;  %v7128_v12 = vadd.f32 %v621_v1, %v529_v0 }
  0xe4   : > { %5993 = vrsqrt.f32 %v923_v59  ;;  %v703_v10 = vrot.slane %v7116_v3, 4  ;;  %v1420_v11 = vrot.slane %v7118_v4, 4  ;;  %652 = vst [vmem:[#allocation20 + $0x38] sm:$0xff] %v7116_v3  ;;  %1374 = vst [vmem:[#allocation22 + $0x30] sm:$0xff] %v7118_v4  ;;  %v1426_v15 = vrot.slane %v7121_v8, 4 }
  0xe5   : > { %5995 = vrsqrt.f32 %v1644_v44  ;;  %v698_v14 = vadd.f32 %v697_v7, %v7114_v63  ;;  %1375 = vst [vmem:[#allocation22 + $0x38] sm:$0xff] %v7121_v8  ;;  %605 = vst [vmem:[#allocation2 + $0x8] sm:$0xff] %v5481_v9  ;;  %v7133_v16 = vadd.f32 %v622_v6, %v530_v5  ;;  %v972_v19 = vunpack.c.0.s8 %v7034_v25 }
  0xe6   : > { %5997 = vrsqrt.f32 %v1645_v2  ;;  %v704_v21 = vadd.f32 %v703_v10, %v7116_v3  ;;  %v1421_v22 = vadd.f32 %v1420_v11, %v7118_v4  ;;  %653 = vst [vmem:[#allocation20 + $0x40] sm:$0xff] %v7128_v12  ;;  %v1427_v31 = vadd.f32 %v1426_v15, %v7121_v8 }
  0xe7   : > { %v699_v29 = vrot.slane %v698_v14, 2  ;;  %v7140_v32 = vadd.f32 %v1344_v13, %v529_v0  ;;  %654 = vst [vmem:[#allocation20 + $0x48] sm:$0xff] %v7133_v16  ;;  %v7143_v41 = vadd.f32 %v1345_v18, %v530_v5  ;;  %v5482_v43 = vpack.c.bf16 %v532_v33, %v531_v24 }
  0xe8   : > { %v705_v17 = vrot.slane %v704_v21, 2  ;;  %v1422_v25 = vrot.slane %v1421_v22, 2  ;;  %v1428_v27 = vrot.slane %v1427_v31, 2  ;;  %v7146_v47 = vadd.f32 %v623_v26, %v531_v24 }
  0xe9   : > { %v700_v46 = vadd.f32 %v699_v29, %v698_v14  ;;  %1376 = vst [vmem:[#allocation22 + $0x40] sm:$0xff] %v7140_v32  ;;  %v7149_v34 = vsub.s32 %v972_v19, %v7048_v36  ;;  %1377 = vst [vmem:[#allocation22 + $0x48] sm:$0xff] %v7143_v41  ;;  %v7152_v51 = vadd.f32 %v624_v37, %v532_v33  ;;  %v1432_v38 = vrot.slane %v7140_v32, 4 }
  0xea   : > { %v706_v49 = vadd.f32 %v705_v17, %v704_v21  ;;  %v1423_v50 = vadd.f32 %v1422_v25, %v1421_v22  ;;  %606 = vst [vmem:[#allocation2 + $0x20] sm:$0xff] %v5482_v43  ;;  %v1429_v53 = vadd.f32 %v1428_v27, %v1427_v31  ;;  %v721_v54 = vrot.slane %v7146_v47, 4  ;;  %655 = vst [vmem:[#allocation20 + $0x50] sm:$0xff] %v7146_v47 }
  0xeb   : > { %v701_v52 = vrot.slane %v700_v46, 1  ;;  %v7155_v40 = vadd.f32 %v1346_v45, %v531_v24  ;;  %v727_v58 = vrot.slane %v7152_v51, 4  ;;  %v7161_v59 = vadd.f32 %v1347_v48, %v532_v33  ;;  %656 = vst [vmem:[#allocation20 + $0x58] sm:$0xff] %v7152_v51 }
  0xec   : > { %v7158_v55 = vpop.eup %5983  ;;  %v707_v56 = vrot.slane %v706_v49, 1  ;;  %v1424_v57 = vrot.slane %v1423_v50, 1  ;;  %v1430_v44 = vrot.slane %v1429_v53, 1  ;;  %v722_v62 = vadd.f32 %v721_v54, %v7146_v47 }
  0xed   : > { %v7164_v60 = vpop.eup %5985  ;;  %v702_v61 = vadd.f32 %v701_v52, %v700_v46  ;;  %v1444_v0 = vrot.slane %v7155_v40, 4  ;;  %1378 = vst [vmem:[#allocation22 + $0x50] sm:$0xff] %v7155_v40  ;;  %v728_v7 = vadd.f32 %v727_v58, %v7152_v51  ;;  %1379 = vst [vmem:[#allocation22 + $0x58] sm:$0xff] %v7161_v59 }
  0xee   : > { %v7169_v1 = vpop.eup %5987  ;;  %v708_v5 = vadd.f32 %v707_v56, %v706_v49  ;;  %v1425_v6 = vadd.f32 %v1424_v57, %v1423_v50  ;;  %v1431_v11 = vadd.f32 %v1430_v44, %v1429_v53  ;;  %v723_v13 = vrot.slane %v722_v62, 2 }
  0xef   : > { %v7175_v9 = vpop.eup %5989  ;;  %v764_v10 = vmul.f32 0.125, %v702_v61  ;;  %v1445_v14 = vadd.f32 %v1444_v0, %v7155_v40  ;;  %v729_v22 = vrot.slane %v728_v7, 2 }
  0xf0   : > { %v5992_v15 = vpop.eup %5991  ;;  %v765_v19 = vmul.f32 0.125, %v708_v5  ;;  %v1486_v21 = vmul.f32 0.125, %v1425_v6  ;;  %v1487_v29 = vmul.f32 0.125, %v1431_v11  ;;  %v724_v31 = vadd.f32 %v723_v13, %v722_v62 }
  0xf1   : > { %v5994_v24 = vpop.eup %5993  ;;  %v7181_v26 = vsub.f32 %v7114_v63, %v764_v10  ;;  %v1446_v33 = vrot.slane %v1445_v14, 2  ;;  %v730_v45 = vadd.f32 %v729_v22, %v728_v7  ;;  %v1450_v13 = vrot.slane %v7161_v59, 4 }
  0xf2   : > { %v5996_v37 = vpop.eup %5995  ;;  %v968_v17 = vcombine.low %v5992_v15, %v5994_v24  ;;  %v7184_v25 = vsub.f32 %v7116_v3, %v765_v19  ;;  %v7187_v43 = vsub.f32 %v7118_v4, %v1486_v21  ;;  %v7192_v48 = vsub.f32 %v7121_v8, %v1487_v29 }
  0xf3   : > { %v5998_v46 = vpop.eup %5997  ;;  %v796_v27 = vmul.f32 %v7181_v26, %v7181_v26  ;;  %v725_v63 = vrot.slane %v724_v31, 1  ;;  %v1447_v49 = vadd.f32 %v1446_v33, %v1445_v14  ;;  %v731_v57 = vrot.slane %v730_v45, 1 }
  0xf4   : > { %8107 = vst [vmem:[#allocation39_spill] sm:$0xff] %v7187_v43  ;;  %8108 = vst [vmem:[#allocation40_spill] sm:$0xff] %v7192_v48  ;;  %v7195_v50 = vrot.slane %v968_v17, %v7149_v34  ;;  %v1690_v52 = vcombine.low %v5996_v37, %v5998_v46  ;;  %v797_v3 = vmul.f32 %v7184_v25, %v7184_v25 }
  0xf5   : > { %v1518_v4 = vmul.f32 %v7187_v43, %v7187_v43  ;;  %v842_v53 = vrot.slane %v796_v27, 4  ;;  %v1519_v54 = vmul.f32 %v7192_v48, %v7192_v48  ;;  %v726_v56 = vadd.f32 %v725_v63, %v724_v31 }
  0xf6   : > { %v7204_v8 = vrot.slane %v1690_v52, %v7149_v34  ;;  %v848_v58 = vrot.slane %v797_v3, 4  ;;  %v1448_v44 = vrot.slane %v1447_v49, 1  ;;  %v732_v5 = vadd.f32 %v731_v57, %v730_v45 }
  0xf7   : > { %v1564_v61 = vrot.slane %v1518_v4, 4  ;;  %v843_v62 = vadd.f32 %v842_v53, %v796_v27  ;;  %v1570_v0 = vrot.slane %v1519_v54, 4  ;;  %v768_v6 = vmul.f32 0.125, %v726_v56 }
  0xf8   : > { %v849_v7 = vadd.f32 %v848_v58, %v797_v3  ;;  %v1449_v11 = vadd.f32 %v1448_v44, %v1447_v49  ;;  %v769_v19 = vmul.f32 0.125, %v732_v5  ;;  %v1451_v29 = vadd.f32 %v1450_v13, %v7161_v59 }
  0xf9   : > { %v1565_v10 = vadd.f32 %v1564_v61, %v1518_v4  ;;  %v844_v14 = vrot.slane %v843_v62, 2  ;;  %v1571_v15 = vadd.f32 %v1570_v0, %v1519_v54  ;;  %v7208_v21 = vsub.f32 %v7146_v47, %v768_v6 }
  0xfa   : > { %v850_v22 = vrot.slane %v849_v7, 2  ;;  %v1490_v31 = vmul.f32 0.125, %v1449_v11  ;;  %v7212_v17 = vsub.f32 %v7152_v51, %v769_v19  ;;  %v1452_v63 = vrot.slane %v1451_v29, 2 }
  0xfb   : > { %v1566_v24 = vrot.slane %v1565_v10, 2  ;;  %v845_v33 = vadd.f32 %v844_v14, %v843_v62  ;;  %v1572_v37 = vrot.slane %v1571_v15, 2  ;;  %v800_v45 = vmul.f32 %v7208_v21, %v7208_v21 }
  0xfc   : > { %v851_v46 = vadd.f32 %v850_v22, %v849_v7  ;;  %v7217_v49 = vsub.f32 %v7155_v40, %v1490_v31  ;;  %v801_v3 = vmul.f32 %v7212_v17, %v7212_v17  ;;  %v1453_v56 = vadd.f32 %v1452_v63, %v1451_v29 }
  0xfd   : > { %v1567_v27 = vadd.f32 %v1566_v24, %v1565_v10  ;;  %v846_v47 = vrot.slane %v845_v33, 1  ;;  %v1573_v52 = vadd.f32 %v1572_v37, %v1571_v15  ;;  %v866_v4 = vrot.slane %v800_v45, 4  ;;  %v625_v37 = vld [vmem:[#allocation7 + $0x60] sm:$0xff] }
  0xfe   : > { %8109 = vst [vmem:[#allocation41_spill] sm:$0xff] %v7217_v49  ;;  %v852_v53 = vrot.slane %v851_v46, 1  ;;  %v1522_v51 = vmul.f32 %v7217_v49, %v7217_v49  ;;  %v872_v44 = vrot.slane %v801_v3, 4  ;;  %v1454_v40 = vrot.slane %v1453_v56, 1 }
  0xff   : > { %v1568_v54 = vrot.slane %v1567_v27, 1  ;;  %v847_v57 = vadd.f32 %v846_v47, %v845_v33  ;;  %v1574_v58 = vrot.slane %v1573_v52, 1  ;;  %v867_v61 = vadd.f32 %v866_v4, %v800_v45  ;;  %v533_v33 = vld [vmem:[#allocation4 + $0x60] sm:$0xff] }
 0x100   : > { %v853_v62 = vadd.f32 %v852_v53, %v851_v46  ;;  %v1588_v5 = vrot.slane %v1522_v51, 4  ;;  %v873_v11 = vadd.f32 %v872_v44, %v801_v3  ;;  %v1455_v15 = vadd.f32 %v1454_v40, %v1453_v56  ;;  %v534_v53 = vld [vmem:[#allocation4 + $0x68] sm:$0xff] }
 0x101   : > { %v1569_v0 = vadd.f32 %v1568_v54, %v1567_v27  ;;  %v908_v6 = vmul.f32 0.125, %v847_v57  ;;  %v1575_v7 = vadd.f32 %v1574_v58, %v1573_v52  ;;  %v868_v10 = vrot.slane %v867_v61, 2  ;;  %v626_v3 = vld [vmem:[#allocation7 + $0x68] sm:$0xff]  ;;  %v1348_v57 = vld [vmem:[#allocation9 + $0x60] sm:$0xff] }
 0x102   : > { %v909_v13 = vmul.f32 0.125, %v853_v62  ;;  %v1589_v19 = vadd.f32 %v1588_v5, %v1522_v51  ;;  %v874_v31 = vrot.slane %v873_v11, 2  ;;  %v1491_v46 = vmul.f32 0.125, %v1455_v15  ;;  %v1349_v62 = vld [vmem:[#allocation9 + $0x68] sm:$0xff] }
 0x103   : > { %v1630_v14 = vmul.f32 0.125, %v1569_v0  ;;  %v924_v22 = vadd.f32 1e-05, %v908_v6  ;;  %v1631_v24 = vmul.f32 0.125, %v1575_v7  ;;  %v869_v29 = vadd.f32 %v868_v10, %v867_v61 }
 0x104   : > { %v925_v45 = vadd.f32 1e-05, %v909_v13  ;;  %v1590_v27 = vrot.slane %v1589_v19, 2  ;;  %v875_v52 = vadd.f32 %v874_v31, %v873_v11  ;;  %v7224_v54 = vsub.f32 %v7161_v59, %v1491_v46 }
 0x105   : > { %v1646_v63 = vadd.f32 1e-05, %v1630_v14  ;;  %5999 = vrsqrt.f32 %v924_v22  ;;  %v1647_v47 = vadd.f32 1e-05, %v1631_v24  ;;  %v870_v4 = vrot.slane %v869_v29, 1 }
 0x106   : > { %6001 = vrsqrt.f32 %v925_v45  ;;  %8110 = vst [vmem:[#allocation42_spill] sm:$0xff] %v7224_v54  ;;  %v1591_v56 = vadd.f32 %v1590_v27, %v1589_v19  ;;  %v5483_v51 = vpack.c.bf16 %v534_v53, %v533_v33  ;;  %v876_v61 = vrot.slane %v875_v52, 1 }
 0x107   : > { %6003 = vrsqrt.f32 %v1646_v63  ;;  %v871_v58 = vadd.f32 %v870_v4, %v869_v29  ;;  %v7226_v44 = vadd.f32 %v625_v37, %v533_v33  ;;  %v1523_v0 = vmul.f32 %v7224_v54, %v7224_v54  ;;  %v7247_v4 = vld [vmem:[#allocation4 + $0x78] sm:$0xff] }
 0x108   : > { %6005 = vrsqrt.f32 %v1647_v47  ;;  %v1592_v40 = vrot.slane %v1591_v56, 1  ;;  %607 = vst [vmem:[#allocation2 + $0x28] sm:$0xff] %v5483_v51  ;;  %v7230_v5 = vadd.f32 %v626_v3, %v534_v53  ;;  %v877_v6 = vadd.f32 %v876_v61, %v875_v52  ;;  %v535_v47 = vld [vmem:[#allocation4 + $0x70] sm:$0xff] }
 0x109   : > { %v912_v59 = vmul.f32 0.125, %v871_v58  ;;  %v733_v7 = vrot.slane %v7226_v44, 4  ;;  %v7233_v10 = vadd.f32 %v1348_v57, %v533_v33  ;;  %657 = vst [vmem:[#allocation20 + $0x60] sm:$0xff] %v7226_v44  ;;  %v1594_v13 = vrot.slane %v1523_v0, 4  ;;  %v627_v51 = vld [vmem:[#allocation7 + $0x70] sm:$0xff]  ;;  %v628_v57 = vld [vmem:[#allocation7 + $0x78] sm:$0xff] }
 0x10a   : > { %v1593_v11 = vadd.f32 %v1592_v40, %v1591_v56  ;;  %v739_v14 = vrot.slane %v7230_v5, 4  ;;  %v7237_v15 = vadd.f32 %v1349_v62, %v534_v53  ;;  %658 = vst [vmem:[#allocation20 + $0x68] sm:$0xff] %v7230_v5  ;;  %v913_v19 = vmul.f32 0.125, %v877_v6 }
 0x10b   : > { %v928_v22 = vadd.f32 1e-05, %v912_v59  ;;  %v734_v24 = vadd.f32 %v733_v7, %v7226_v44  ;;  %v1456_v29 = vrot.slane %v7233_v10, 4  ;;  %1380 = vst [vmem:[#allocation22 + $0x60] sm:$0xff] %v7233_v10  ;;  %v1595_v31 = vadd.f32 %v1594_v13, %v1523_v0  ;;  %v1350_v0 = vld [vmem:[#allocation9 + $0x70] sm:$0xff] }
 0x10c   : > { %v1634_v33 = vmul.f32 0.125, %v1593_v11  ;;  %v740_v37 = vadd.f32 %v739_v14, %v7230_v5  ;;  %v1462_v45 = vrot.slane %v7237_v15, 4  ;;  %1381 = vst [vmem:[#allocation22 + $0x68] sm:$0xff] %v7237_v15  ;;  %v929_v63 = vadd.f32 1e-05, %v913_v19 }
 0x10d   : > { %6007 = vrsqrt.f32 %v928_v22  ;;  %v735_v46 = vrot.slane %v734_v24, 2  ;;  %v1457_v27 = vadd.f32 %v1456_v29, %v7233_v10  ;;  %v1596_v52 = vrot.slane %v1595_v31, 2 }
 0x10e   : > { %v1650_v53 = vadd.f32 1e-05, %v1634_v33  ;;  %v741_v3 = vrot.slane %v740_v37, 2  ;;  %v1463_v56 = vadd.f32 %v1462_v45, %v7237_v15  ;;  %6009 = vrsqrt.f32 %v929_v63 }
 0x10f   : > { %v736_v58 = vadd.f32 %v735_v46, %v734_v24  ;;  %v1458_v61 = vrot.slane %v1457_v27, 2  ;;  %v5484_v62 = vpack.c.bf16 %v7247_v4, %v535_v47  ;;  %v1597_v40 = vadd.f32 %v1596_v52, %v1595_v31 }
 0x110   : > { %6011 = vrsqrt.f32 %v1650_v53  ;;  %v742_v6 = vadd.f32 %v741_v3, %v740_v37  ;;  %v1464_v59 = vrot.slane %v1463_v56, 2  ;;  %v7251_v13 = vadd.f32 %v627_v51, %v535_v47 }
 0x111   : > { %v737_v7 = vrot.slane %v736_v58, 1  ;;  %v1459_v11 = vadd.f32 %v1458_v61, %v1457_v27  ;;  %608 = vst [vmem:[#allocation2 + $0x38] sm:$0xff] %v5484_v62  ;;  %v7254_v14 = vadd.f32 %v628_v57, %v7247_v4  ;;  %v1598_v22 = vrot.slane %v1597_v40, 1 }
 0x112   : > { %v6000_v19 = vpop.eup %5999  ;;  %v743_v29 = vrot.slane %v742_v6, 1  ;;  %v1465_v24 = vadd.f32 %v1464_v59, %v1463_v56  ;;  %v7256_v33 = vadd.f32 %v1350_v0, %v535_v47  ;;  %v745_v37 = vrot.slane %v7251_v13, 4  ;;  %659 = vst [vmem:[#allocation20 + $0x70] sm:$0xff] %v7251_v13 }
 0x113   : > { %v6002_v45 = vpop.eup %6001  ;;  %v738_v63 = vadd.f32 %v737_v7, %v736_v58  ;;  %v1460_v31 = vrot.slane %v1459_v11, 1  ;;  %v751_v46 = vrot.slane %v7254_v14, 4  ;;  %660 = vst [vmem:[#allocation20 + $0x78] sm:$0xff] %v7254_v14  ;;  %v1599_v53 = vadd.f32 %v1598_v22, %v1597_v40 }
 0x114   : > { %v6004_v27 = vpop.eup %6003  ;;  %v969_v52 = vcombine.low %v6000_v19, %v6002_v45  ;;  %v744_v3 = vadd.f32 %v743_v29, %v742_v6  ;;  %v1466_v51 = vrot.slane %v1465_v24, 1  ;;  %1382 = vst [vmem:[#allocation22 + $0x70] sm:$0xff] %v7256_v33  ;;  %v746_v58 = vadd.f32 %v745_v37, %v7251_v13 }
 0x115   : > { %v6006_v47 = vpop.eup %6005  ;;  %v770_v56 = vmul.f32 0.125, %v738_v63  ;;  %v1461_v57 = vadd.f32 %v1460_v31, %v1459_v11  ;;  %v752_v61 = vadd.f32 %v751_v46, %v7254_v14  ;;  %v1635_v59 = vmul.f32 0.125, %v1599_v53  ;;  %v1351_v46 = vld [vmem:[#allocation9 + $0x78] sm:$0xff] }
 0x116   : > { %v7266_v62 = vrot.slane %v969_v52, %v7149_v34  ;;  %v1691_v0 = vcombine.low %v6004_v27, %v6006_v47  ;;  %v771_v7 = vmul.f32 0.125, %v744_v3  ;;  %v1467_v40 = vadd.f32 %v1466_v51, %v1465_v24 }
 0x117   : > { %v7269_v19 = vsub.f32 %v7226_v44, %v770_v56  ;;  %v1492_v6 = vmul.f32 0.125, %v1461_v57  ;;  %v747_v22 = vrot.slane %v746_v58, 2  ;;  %v1651_v45 = vadd.f32 1e-05, %v1635_v59 }
 0x118   : > { %v7274_v11 = vrot.slane %v1691_v0, %v7149_v34  ;;  %v7277_v63 = vsub.f32 %v7230_v5, %v771_v7  ;;  %v1493_v37 = vmul.f32 0.125, %v1467_v40  ;;  %v753_v5 = vrot.slane %v752_v61, 2 }
 0x119   : > { %v802_v31 = vmul.f32 %v7269_v19, %v7269_v19  ;;  %v7282_v44 = vsub.f32 %v7233_v10, %v1492_v6  ;;  %v748_v24 = vadd.f32 %v747_v22, %v746_v58  ;;  %6013 = vrsqrt.f32 %v1651_v45 }
 0x11a   : > { %v7284_v27 = vpop.eup %6007  ;;  %v803_v53 = vmul.f32 %v7277_v63, %v7277_v63  ;;  %v7291_v51 = vsub.f32 %v7237_v15, %v1493_v37  ;;  %v754_v58 = vadd.f32 %v753_v5, %v752_v61  ;;  %v7298_v0 = vadd.f32 %v1351_v46, %v7247_v4 }
 0x11b   : > { %8111 = vst [vmem:[#allocation43_spill] sm:$0xff] %v7282_v44  ;;  %v878_v3 = vrot.slane %v802_v31, 4  ;;  %v1524_v10 = vmul.f32 %v7282_v44, %v7282_v44  ;;  %v749_v47 = vrot.slane %v748_v24, 1  ;;  %v7295_v56 = vpop.eup %6009  ;;  %v1468_v59 = vrot.slane %v7256_v33, 4 }
 0x11c   : > { %8112 = vst [vmem:[#allocation44_spill] sm:$0xff] %v7291_v51  ;;  %v884_v57 = vrot.slane %v803_v53, 4  ;;  %v1525_v6 = vmul.f32 %v7291_v51, %v7291_v51  ;;  %v755_v52 = vrot.slane %v754_v58, 1  ;;  %1383 = vst [vmem:[#allocation22 + $0x78] sm:$0xff] %v7298_v0  ;;  %v1474_v18 = vrot.slane %v7298_v0, 4 }
 0x11d   : > { %v7301_v7 = vpop.eup %6011  ;;  %v879_v15 = vadd.f32 %v878_v3, %v802_v31  ;;  %v1600_v22 = vrot.slane %v1524_v10, 4  ;;  %v750_v37 = vadd.f32 %v749_v47, %v748_v24  ;;  %v1469_v61 = vadd.f32 %v1468_v59, %v7256_v33 }
 0x11e   : > { %8113 = vst [vmem:[#allocation45_spill] sm:$0xff] %v7301_v7  ;;  %v885_v45 = vadd.f32 %v884_v57, %v803_v53  ;;  %v1606_v5 = vrot.slane %v1525_v6, 4  ;;  %v756_v2 = vadd.f32 %v755_v52, %v754_v58  ;;  %v1475_v53 = vadd.f32 %v1474_v18, %v7298_v0 }
 0x11f   : > { %v880_v4 = vrot.slane %v879_v15, 2  ;;  %v1601_v46 = vadd.f32 %v1600_v22, %v1524_v10  ;;  %v772_v40 = vmul.f32 0.125, %v750_v37  ;;  %v1470_v31 = vrot.slane %v1469_v61, 2 }
 0x120   : > { %v886_v29 = vrot.slane %v885_v45, 2  ;;  %v1607_v51 = vadd.f32 %v1606_v5, %v1525_v6  ;;  %v773_v47 = vmul.f32 0.125, %v756_v2  ;;  %v1476_v49 = vrot.slane %v1475_v53, 2 }
 0x121   : > { %v881_v3 = vadd.f32 %v880_v4, %v879_v15  ;;  %v1602_v44 = vrot.slane %v1601_v46, 2  ;;  %v7312_v57 = vsub.f32 %v7251_v13, %v772_v40  ;;  %v1471_v59 = vadd.f32 %v1470_v31, %v1469_v61 }
 0x122   : > { %v887_v24 = vadd.f32 %v886_v29, %v885_v45  ;;  %v1608_v22 = vrot.slane %v1607_v51, 2  ;;  %v7315_v52 = vsub.f32 %v7254_v14, %v773_v47  ;;  %v1477_v2 = vadd.f32 %v1476_v49, %v1475_v53 }
 0x123   : > { %v882_v54 = vrot.slane %v881_v3, 1  ;;  %v1603_v10 = vadd.f32 %v1602_v44, %v1601_v46  ;;  %v804_v58 = vmul.f32 %v7312_v57, %v7312_v57  ;;  %v1472_v15 = vrot.slane %v1471_v59, 1  ;;  %v6047_v46 = vld [vmem:[#allocation20] sm:$0xff] }
 0x124   : > { %v888_v48 = vrot.slane %v887_v24, 1  ;;  %v1609_v29 = vadd.f32 %v1608_v22, %v1607_v51  ;;  %v805_v13 = vmul.f32 %v7315_v52, %v7315_v52  ;;  %v1478_v14 = vrot.slane %v1477_v2, 1 }
 0x125   : > { %v883_v6 = vadd.f32 %v882_v54, %v881_v3  ;;  %v1604_v18 = vrot.slane %v1603_v10, 1  ;;  %v1473_v40 = vadd.f32 %v1472_v15, %v1471_v59  ;;  %v661_v5 = vrot.slane %v6047_v46, 4 }
 0x126   : > { %v889_v45 = vadd.f32 %v888_v48, %v887_v24  ;;  %v7321_v44 = vpop.eup %6013  ;;  %v1610_v4 = vrot.slane %v1609_v29, 1  ;;  %v890_v3 = vrot.slane %v804_v58, 4  ;;  %v1479_v53 = vadd.f32 %v1478_v14, %v1477_v2  ;;  %v6048_v24 = vld [vmem:[#allocation20 + $0x8] sm:$0xff] }
 0x127   : > { %8114 = vst [vmem:[#allocation46_spill] sm:$0xff] %v7321_v44  ;;  %v914_v37 = vmul.f32 0.125, %v883_v6  ;;  %v1605_v61 = vadd.f32 %v1604_v18, %v1603_v10  ;;  %v667_v47 = vrot.slane %v6048_v24, 4  ;;  %v896_v22 = vrot.slane %v805_v13, 4 }
 0x128   : > { %v915_v54 = vmul.f32 0.125, %v889_v45  ;;  %v1611_v49 = vadd.f32 %v1610_v4, %v1609_v29  ;;  %v1494_v15 = vmul.f32 0.125, %v1473_v40  ;;  %v1495_v18 = vmul.f32 0.125, %v1479_v53 }
 0x129   : > { %v930_v51 = vadd.f32 1e-05, %v914_v37  ;;  %v1636_v48 = vmul.f32 0.125, %v1605_v61  ;;  %v891_v43 = vadd.f32 %v890_v3, %v804_v58  ;;  %v662_v2 = vadd.f32 %v6047_v46, %v661_v5 }
 0x12a   : > { %v931_v59 = vadd.f32 1e-05, %v915_v54  ;;  %v1637_v10 = vmul.f32 0.125, %v1611_v49  ;;  %v7326_v35 = vsub.f32 %v7256_v33, %v1494_v15  ;;  %v7329_v29 = vsub.f32 %v7298_v0, %v1495_v18 }
 0x12b   : > { %6015 = vrsqrt.f32 %v930_v51  ;;  %v1652_v6 = vadd.f32 1e-05, %v1636_v48  ;;  %v897_v37 = vadd.f32 %v896_v22, %v805_v13  ;;  %v668_v40 = vadd.f32 %v6048_v24, %v667_v47 }
 0x12c   : > { %6017 = vrsqrt.f32 %v931_v59  ;;  %8115 = vst [vmem:[#allocation47_spill] sm:$0xff] %v7326_v35  ;;  %v1653_v45 = vadd.f32 1e-05, %v1637_v10  ;;  %8116 = vst [vmem:[#allocation48_spill] sm:$0xff] %v7329_v29  ;;  %v1526_v61 = vmul.f32 %v7326_v35, %v7326_v35  ;;  %v1527_v4 = vmul.f32 %v7329_v29, %v7329_v29 }
 0x12d   : > { %6019 = vrsqrt.f32 %v1652_v6  ;;  %v663_v14 = vrot.slane %v662_v2, 2  ;;  %v669_v54 = vrot.slane %v668_v40, 2  ;;  %v892_v33 = vrot.slane %v891_v43, 2 }
 0x12e   : > { %6021 = vrsqrt.f32 %v1653_v45  ;;  %v1612_v58 = vrot.slane %v1526_v61, 4  ;;  %v1618_v3 = vrot.slane %v1527_v4, 4  ;;  %v898_v49 = vrot.slane %v897_v37, 2 }
 0x12f   : > { %v664_v51 = vadd.f32 %v663_v14, %v662_v2  ;;  %v670_v0 = vadd.f32 %v669_v54, %v668_v40  ;;  %v893_v22 = vadd.f32 %v892_v33, %v891_v43 }
 0x130   : > { %v1613_v48 = vadd.f32 %v1612_v58, %v1526_v61  ;;  %v1619_v53 = vadd.f32 %v1618_v3, %v1527_v4  ;;  %v899_v10 = vadd.f32 %v898_v49, %v897_v37  ;;  %v709_v61 = vrot.slane %v7128_v12, 4 }
 0x131   : > { %v665_v5 = vrot.slane %v664_v51, 1  ;;  %v671_v59 = vrot.slane %v670_v0, 1  ;;  %v894_v40 = vrot.slane %v893_v22, 1  ;;  %v715_v3 = vrot.slane %v7133_v16, 4 }
 0x132   : > { %v1614_v13 = vrot.slane %v1613_v48, 2  ;;  %v1620_v15 = vrot.slane %v1619_v53, 2  ;;  %v900_v58 = vrot.slane %v899_v10, 1 }
 0x133   : > { %v666_v47 = vadd.f32 %v665_v5, %v664_v51  ;;  %v672_v18 = vadd.f32 %v671_v59, %v670_v0 }
 0x134   : > { %v1615_v6 = vadd.f32 %v1614_v13, %v1613_v48  ;;  %v1621_v45 = vadd.f32 %v1620_v15, %v1619_v53  ;;  %v895_v53 = vadd.f32 %v894_v40, %v893_v22  ;;  %v901_v59 = vadd.f32 %v900_v58, %v899_v10  ;;  %v7359_v10 = vld [vmem:[#allocation22 + $0x8] sm:$0xff] }
 0x135   : > { %v758_v31 = vmul.f32 0.125, %v666_v47  ;;  %v759_v28 = vmul.f32 0.125, %v672_v18  ;;  %v7356_v18 = vld [vmem:[#allocation22] sm:$0xff]  ;;  %v1390_v58 = vrot.slane %v7359_v10, 4 }
 0x136   : > { %v1616_v35 = vrot.slane %v1615_v6, 1  ;;  %v1622_v4 = vrot.slane %v1621_v45, 1 }
 0x137   : > { %v7340_v14 = vsub.f32 %v6047_v46, %v758_v31  ;;  %v7346_v33 = vsub.f32 %v6048_v24, %v759_v28  ;;  %v710_v24 = vadd.f32 %v709_v61, %v7128_v12  ;;  %v917_v61 = vmul.f32 0.125, %v901_v59 }
 0x138   : > { %v7335_v29 = vpop.eup %6015  ;;  %v1617_v54 = vadd.f32 %v1616_v35, %v1615_v6  ;;  %v1623_v51 = vadd.f32 %v1622_v4, %v1621_v45  ;;  %v716_v6 = vadd.f32 %v715_v3, %v7133_v16  ;;  %v1384_v45 = vrot.slane %v7356_v18, 4 }
 0x139   : > { %v7337_v2 = vpop.eup %6017  ;;  %v790_v49 = vmul.f32 %v7340_v14, %v7340_v14  ;;  %v791_v46 = vmul.f32 %v7346_v33, %v7346_v33  ;;  %v1391_v39 = vadd.f32 %v7359_v10, %v1390_v58 }
 0x13a   : > { %v7342_v43 = vpop.eup %6019  ;;  %v1638_v0 = vmul.f32 0.125, %v1617_v54  ;;  %v1639_v5 = vmul.f32 0.125, %v1623_v51  ;;  %v711_v54 = vrot.slane %v710_v24, 2  ;;  %v717_v40 = vrot.slane %v716_v6, 2 }
 0x13b   : > { %v6022_v48 = vpop.eup %6021  ;;  %v806_v13 = vrot.slane %v790_v49, 4  ;;  %v812_v28 = vrot.slane %v791_v46, 4 }
 0x13c   : > { %v1739_v31 = vcombine.low %v7342_v43, %v6022_v48  ;;  %v1654_v35 = vadd.f32 1e-05, %v1638_v0  ;;  %v1655_v15 = vadd.f32 1e-05, %v1639_v5  ;;  %v916_v43 = vmul.f32 0.125, %v895_v53 }
 0x13d   : > { %v807_v47 = vadd.f32 %v806_v13, %v790_v49  ;;  %v813_v4 = vadd.f32 %v812_v28, %v791_v46  ;;  %v712_v49 = vadd.f32 %v711_v54, %v710_v24  ;;  %v718_v3 = vadd.f32 %v717_v40, %v716_v6 }
 0x13e   : > { %6023 = vrsqrt.f32 %v1654_v35  ;;  %v932_v13 = vadd.f32 1e-05, %v916_v43  ;;  %v1385_v46 = vadd.f32 %v7356_v18, %v1384_v45  ;;  %v933_v53 = vadd.f32 1e-05, %v917_v61 }
 0x13f   : > { %6025 = vrsqrt.f32 %v1655_v15  ;;  %v808_v22 = vrot.slane %v807_v47, 2  ;;  %v814_v51 = vrot.slane %v813_v4, 2  ;;  %v713_v5 = vrot.slane %v712_v49, 1 }
 0x140   : > { %v719_v35 = vrot.slane %v718_v3, 1  ;;  %v1386_v7 = vrot.slane %v1385_v46, 2  ;;  %v1438_v24 = vrot.slane %v7143_v41, 4  ;;  %6027 = vrsqrt.f32 %v932_v13 }
 0x141   : > { %v809_v48 = vadd.f32 %v808_v22, %v807_v47  ;;  %v815_v0 = vadd.f32 %v814_v51, %v813_v4  ;;  %v714_v15 = vadd.f32 %v713_v5, %v712_v49  ;;  %v1392_v4 = vrot.slane %v1391_v39, 2 }
 0x142   : > { %v720_v59 = vadd.f32 %v719_v35, %v718_v3  ;;  %v1387_v22 = vadd.f32 %v1386_v7, %v1385_v46  ;;  %6029 = vrsqrt.f32 %v933_v53  ;;  %v1433_v49 = vadd.f32 %v1432_v38, %v7140_v32 }
 0x143   : > { %v810_v37 = vrot.slane %v809_v48, 1  ;;  %v816_v28 = vrot.slane %v815_v0, 1  ;;  %v766_v6 = vmul.f32 0.125, %v714_v15  ;;  %v1393_v58 = vadd.f32 %v1392_v4, %v1391_v39 }
 0x144   : > { %v767_v43 = vmul.f32 0.125, %v720_v59  ;;  %v1388_v51 = vrot.slane %v1387_v22, 1  ;;  %v1434_v5 = vrot.slane %v1433_v49, 2  ;;  %v1439_v38 = vadd.f32 %v1438_v24, %v7143_v41 }
 0x145   : > { %v811_v44 = vadd.f32 %v810_v37, %v809_v48  ;;  %v817_v47 = vadd.f32 %v816_v28, %v815_v0  ;;  %v7367_v40 = vsub.f32 %v7128_v12, %v766_v6  ;;  %v7374_v48 = vrot.slane %v1739_v31, %v7149_v34 }
 0x146   : > { %v7370_v37 = vsub.f32 %v7133_v16, %v767_v43  ;;  %v1389_v12 = vadd.f32 %v1388_v51, %v1387_v22  ;;  %v1435_v28 = vadd.f32 %v1434_v5, %v1433_v49 }
 0x147   : > { %v902_v54 = vmul.f32 0.125, %v811_v44  ;;  %v903_v45 = vmul.f32 0.125, %v817_v47  ;;  %8117 = vst [vmem:[#allocation49_spill] sm:$0xff] %v7374_v48  ;;  %v798_v7 = vmul.f32 %v7367_v40, %v7367_v40  ;;  %v1394_v44 = vrot.slane %v1393_v58, 1 }
 0x148   : > { %v799_v39 = vmul.f32 %v7370_v37, %v7370_v37  ;;  %v1480_v53 = vmul.f32 0.125, %v1389_v12  ;;  %v1440_v47 = vrot.slane %v1439_v38, 2  ;;  %v1436_v43 = vrot.slane %v1435_v28, 1 }
 0x149   : > { %v918_v61 = vadd.f32 1e-05, %v902_v54  ;;  %v919_v3 = vadd.f32 1e-05, %v903_v45  ;;  %v854_v13 = vrot.slane %v798_v7, 4  ;;  %v1395_v35 = vadd.f32 %v1394_v44, %v1393_v58 }
 0x14a   : > { %v860_v46 = vrot.slane %v799_v39, 4  ;;  %v7385_v54 = vsub.f32 %v7356_v18, %v1480_v53  ;;  %v1441_v24 = vadd.f32 %v1440_v47, %v1439_v38  ;;  %v1437_v49 = vadd.f32 %v1436_v43, %v1435_v28 }
 0x14b   : > { %v6024_v0 = vpop.eup %6023  ;;  %6031 = vrsqrt.f32 %v918_v61  ;;  %v855_v15 = vadd.f32 %v854_v13, %v798_v7  ;;  %v1481_v59 = vmul.f32 0.125, %v1395_v35  ;;  %v7412_v53 = vsub.s32 1, %v7048_v36 }
 0x14c   : > { %v6026_v16 = vpop.eup %6025  ;;  %6033 = vrsqrt.f32 %v919_v3  ;;  %v861_v4 = vadd.f32 %v860_v46, %v799_v39  ;;  %v1512_v51 = vmul.f32 %v7385_v54, %v7385_v54  ;;  %v8119_v3 = vcombine.low %v7158_v55, %v7164_v60 }
 0x14d   : > { %v1740_v31 = vcombine.low %v6024_v0, %v6026_v16  ;;  %v856_v22 = vrot.slane %v855_v15, 2  ;;  %v7388_v45 = vsub.f32 %v7359_v10, %v1481_v59  ;;  %v1442_v10 = vrot.slane %v1441_v24, 1  ;;  %v7400_v0 = vld [vmem:[#allocation12] sm:$0xff]  ;;  %v6028_v35 = vpop.eup %6027 }
 0x14e   : > { %v862_v61 = vrot.slane %v861_v4, 2  ;;  %v983_v18 = vrot.slane %v8119_v3, %v7149_v34  ;;  %v8120_v39 = vcombine.low %v7195_v50, %v7266_v62  ;;  %v1528_v16 = vrot.slane %v1512_v51, 4 }
 0x14f   : > { %v7382_v6 = vrot.slane %v1740_v31, %v7149_v34  ;;  %v857_v7 = vadd.f32 %v856_v22, %v855_v15  ;;  %v1513_v44 = vmul.f32 %v7388_v45, %v7388_v45  ;;  %v1488_v13 = vmul.f32 0.125, %v1437_v49  ;;  %v6030_v46 = vpop.eup %6029 }
 0x150   : > { %v7406_v12 = vrot.slane %v8120_v39, %v7149_v34  ;;  %v863_v5 = vadd.f32 %v862_v61, %v861_v4  ;;  %v7409_v55 = vsub.s32 0, %v7048_v36  ;;  %v1443_v31 = vadd.f32 %v1442_v10, %v1441_v24 }
 0x151   : > { %8118 = vst [vmem:[#allocation50_spill] sm:$0xff] %v7382_v6  ;;  %v858_v60 = vrot.slane %v857_v7, 1  ;;  %v1534_v38 = vrot.slane %v1513_v44, 4  ;;  %v1529_v15 = vadd.f32 %v1528_v16, %v1512_v51  ;;  %v7415_v50 = vsub.f32 %v7140_v32, %v1488_v13 }
 0x152   : > { %v864_v28 = vrot.slane %v863_v5, 1  ;;  %v7419_v62 = vrot.slane %v7400_v0, %v7409_v55  ;;  %v1489_v4 = vmul.f32 0.125, %v1443_v31  ;;  %v7423_v43 = vrot.slane %v7400_v0, %v7412_v53 }
 0x153   : > { %8121 = vst [vmem:[#allocation51_spill] sm:$0xff] %v7415_v50  ;;  %v859_v59 = vadd.f32 %v858_v60, %v857_v7  ;;  %v1535_v47 = vadd.f32 %v1534_v38, %v1513_v44  ;;  %v1530_v24 = vrot.slane %v1529_v15, 2  ;;  %v1520_v61 = vmul.f32 %v7415_v50, %v7415_v50 }
 0x154   : > { %v865_v22 = vadd.f32 %v864_v28, %v863_v5  ;;  %v7428_v32 = vsub.s32 2, %v7048_v36  ;;  %v7431_v10 = vsub.f32 %v7143_v41, %v1489_v4  ;;  %v7434_v44 = vsub.s32 3, %v7048_v36 }
 0x155   : > { %v910_v49 = vmul.f32 0.125, %v859_v59  ;;  %v1536_v3 = vrot.slane %v1535_v47, 2  ;;  %v1531_v16 = vadd.f32 %v1530_v24, %v1529_v15  ;;  %v1576_v5 = vrot.slane %v1520_v61, 4 }
 0x156   : > { %8122 = vst [vmem:[#allocation52_spill] sm:$0xff] %v7431_v10  ;;  %v911_v39 = vmul.f32 0.125, %v865_v22  ;;  %v1521_v31 = vmul.f32 %v7431_v10, %v7431_v10  ;;  %v7440_v28 = vrot.slane %v7400_v0, %v7428_v32  ;;  %v1018_v15 = vcombine.low %v6028_v35, %v6030_v46 }
 0x157   : > { %v926_v60 = vadd.f32 1e-05, %v910_v49  ;;  %v1537_v38 = vadd.f32 %v1536_v3, %v1535_v47  ;;  %v1532_v41 = vrot.slane %v1531_v16, 1  ;;  %v1577_v4 = vadd.f32 %v1576_v5, %v1520_v61 }
 0x158   : > { %v6032_v51 = vpop.eup %6031  ;;  %v927_v59 = vadd.f32 1e-05, %v911_v39  ;;  %v1582_v22 = vrot.slane %v1521_v31, 4  ;;  %v7444_v49 = vsub.s32 4, %v7048_v36  ;;  %v7448_v39 = vrot.slane %v7400_v0, %v7434_v44 }
 0x159   : > { %v6034_v7 = vpop.eup %6033  ;;  %6035 = vrsqrt.f32 %v926_v60  ;;  %v1538_v50 = vrot.slane %v1537_v38, 1  ;;  %v1533_v24 = vadd.f32 %v1532_v41, %v1531_v16  ;;  %v7451_v61 = vsub.s32 5, %v7048_v36 }
 0x15a   : > { %v966_v13 = vcombine.low %v6032_v51, %v6034_v7  ;;  %6037 = vrsqrt.f32 %v927_v59  ;;  %v1578_v51 = vrot.slane %v1577_v4, 2  ;;  %v1583_v7 = vadd.f32 %v1582_v22, %v1521_v31 }
 0x15b   : > { %v1539_v3 = vadd.f32 %v1538_v50, %v1537_v38  ;;  %v1624_v5 = vmul.f32 0.125, %v1533_v24  ;;  %v7455_v46 = vsub.s32 6, %v7048_v36  ;;  %v8123_v50 = vcombine.low %v7335_v29, %v7337_v2  ;;  %v7464_v38 = vld [vmem:[#allocation10] sm:$0xff] }
 0x15c   : > { %v976_v58 = vrot.slane %v966_v13, %v7149_v34  ;;  %v1579_v13 = vadd.f32 %v1578_v51, %v1577_v4  ;;  %v1046_v60 = vrot.slane %v1018_v15, %v7149_v34  ;;  %v7468_v4 = vsub.s32 7, %v7048_v36 }
 0x15d   : > { %v7461_v16 = vrot.slane %v8123_v50, %v7149_v34  ;;  %v1640_v31 = vadd.f32 1e-05, %v1624_v5  ;;  %v7472_v51 = vrot.slane %v7400_v0, %v7444_v49  ;;  %v7476_v29 = vrot.slane %v7400_v0, %v7451_v61 }
 0x15e   : > { %v998_v47 = vcombine.low %v976_v58, %v983_v18  ;;  %v1625_v58 = vmul.f32 0.125, %v1539_v3  ;;  %v1584_v18 = vrot.slane %v1583_v7, 2  ;;  %v1580_v59 = vrot.slane %v1579_v13, 1 }
 0x15f   : > { %6039 = vrsqrt.f32 %v1640_v31  ;;  %v7485_v36 = vrot.slane %v7400_v0, %v7468_v4  ;;  %v8124_v3 = vcombine.low %v7284_v27, %v7295_v56 }
 0x160   : > { %v1006_v35 = vrot.slane %v998_v47, %v7149_v34  ;;  %v1641_v22 = vadd.f32 1e-05, %v1625_v58  ;;  %v1585_v24 = vadd.f32 %v1584_v18, %v1583_v7  ;;  %v1581_v2 = vadd.f32 %v1580_v59, %v1579_v13 }
 0x161   : > { %v1048_v47 = vcombine.low %v7461_v16, %v1046_v60  ;;  %v1032_v7 = vrot.slane %v8124_v3, %v7149_v34 }
 0x162   : > { %v1014_v41 = vcombine.low %v1006_v35, %v7406_v12  ;;  %v7481_v12 = vrot.slane %v7400_v0, %v7455_v46  ;;  %6041 = vrsqrt.f32 %v1641_v22  ;;  %v1586_v5 = vrot.slane %v1585_v24, 1 }
 0x163   : > { %v1632_v13 = vmul.f32 0.125, %v1581_v2 }
 0x164   : > { %v1066_v15 = vmul.f32 %v1014_v41, %v7464_v38 }
 0x166   : > { %v1073_v35 = vrot.slane %v1066_v15, %v7409_v55  ;;  %v1077_v58 = vrot.slane %v1066_v15, %v7412_v53  ;;  %v1081_v18 = vrot.slane %v1066_v15, %v7428_v32  ;;  %v1085_v50 = vrot.slane %v1066_v15, %v7434_v44  ;;  %v6036_v22 = vpop.eup %6035 }
 0x167   : > { %v1089_v0 = vrot.slane %v1066_v15, %v7444_v49  ;;  %v1093_v31 = vrot.slane %v1066_v15, %v7451_v61  ;;  %v1097_v16 = vrot.slane %v1066_v15, %v7455_v46  ;;  %v1101_v60 = vrot.slane %v1066_v15, %v7468_v4  ;;  %v6038_v48 = vpop.eup %6037 }
 0x168   : > { %v1150_v27 = vmul.f32 %v1073_v35, %v7340_v14  ;;  %v1151_v56 = vmul.f32 %v1077_v58, %v7346_v33  ;;  %v1152_v59 = vmul.f32 %v1081_v18, %v7075_v23  ;;  %v1153_v41 = vmul.f32 %v1085_v50, %v7078_v30 }
 0x169   : > { %v1154_v2 = vmul.f32 %v1089_v0, %v7091_v42  ;;  %v1155_v3 = vmul.f32 %v1093_v31, %v7094_v20  ;;  %v1156_v10 = vmul.f32 %v1097_v16, %v7181_v26  ;;  %v1157_v6 = vmul.f32 %v1101_v60, %v7184_v25 }
 0x16a   : > { %v1248_v15 = vadd.f32 %v7419_v62, %v1150_v27  ;;  %v1249_v14 = vadd.f32 %v7423_v43, %v1151_v56  ;;  %v1250_v33 = vadd.f32 %v7440_v28, %v1152_v59  ;;  %v1251_v23 = vadd.f32 %v7448_v39, %v1153_v41  ;;  %v612_v41 = vld [vmem:[#allocation12 + $0x8] sm:$0xff] }
 0x16b   : > { %v1252_v30 = vadd.f32 %v7472_v51, %v1154_v2  ;;  %v1253_v35 = vadd.f32 %v7476_v29, %v1155_v3  ;;  %v1254_v42 = vadd.f32 %v7481_v12, %v1156_v10  ;;  %v1255_v20 = vadd.f32 %v7485_v36, %v1157_v6 }
 0x16c   : > { %v5485_v26 = vpack.c.bf16 %v1249_v14, %v1248_v15  ;;  %v5486_v58 = vpack.c.bf16 %v1251_v23, %v1250_v33  ;;  %v1015_v25 = vcombine.low %v6036_v22, %v6038_v48  ;;  %v1587_v18 = vadd.f32 %v1586_v5, %v1585_v24  ;;  %v6040_v27 = vpop.eup %6039  ;;  %v7519_v5 = vld [vmem:[#allocation10 + $0x8] sm:$0xff] }
 0x16d   : > { %v5487_v50 = vpack.c.bf16 %v1253_v35, %v1252_v30  ;;  %v5488_v0 = vpack.c.bf16 %v1255_v20, %v1254_v42  ;;  %v1648_v31 = vadd.f32 1e-05, %v1632_v13  ;;  %v1062_v10 = vrot.slane %v1048_v47, %v7149_v34 }
 0x16e   : > { %1328 = vst [vmem:[#allocation3] sm:$0xff] %v5485_v26  ;;  %1329 = vst [vmem:[#allocation3 + $0x18] sm:$0xff] %v5486_v58  ;;  %v1025_v16 = vrot.slane %v1015_v25, %v7149_v34  ;;  %v1633_v60 = vmul.f32 0.125, %v1587_v18  ;;  %v8125_v13 = vcombine.low %v7169_v1, %v7175_v9  ;;  %v7527_v47 = vrot.slane %v612_v41, %v7409_v55 }
 0x16f   : > { %1330 = vst [vmem:[#allocation3 + $0x50] sm:$0xff] %v5487_v50  ;;  %1331 = vst [vmem:[#allocation3 + $0x60] sm:$0xff] %v5488_v0  ;;  %6043 = vrsqrt.f32 %v1648_v31  ;;  %v6042_v6 = vpop.eup %6041  ;;  %v7530_v3 = vrot.slane %v612_v41, %v7412_v53  ;;  %v7533_v15 = vrot.slane %v612_v41, %v7428_v32  ;;  %v7537_v33 = vrot.slane %v612_v41, %v7434_v44 }
 0x170   : > { %v1047_v56 = vcombine.low %v1025_v16, %v1032_v7  ;;  %v1649_v59 = vadd.f32 1e-05, %v1633_v60  ;;  %v1688_v24 = vcombine.low %v6040_v27, %v6042_v6  ;;  %v1705_v22 = vrot.slane %v8125_v13, %v7149_v34 }
 0x171   : > { %v7540_v1 = vrot.slane %v612_v41, %v7444_v49  ;;  %v7543_v9 = vrot.slane %v612_v41, %v7451_v61  ;;  %v7546_v23 = vrot.slane %v612_v41, %v7455_v46  ;;  %v7549_v30 = vrot.slane %v612_v41, %v7468_v4 }
 0x172   : > { %v1055_v48 = vrot.slane %v1047_v56, %v7149_v34  ;;  %6045 = vrsqrt.f32 %v1649_v59  ;;  %v1698_v7 = vrot.slane %v1688_v24, %v7149_v34  ;;  %v8126_v42 = vcombine.low %v7204_v8, %v7274_v11 }
 0x174   : > { %v1063_v2 = vcombine.low %v1055_v48, %v1062_v10  ;;  %v1720_v35 = vcombine.low %v1698_v7, %v1705_v22  ;;  %v1735_v20 = vrot.slane %v8126_v42, %v7149_v34 }
 0x176   : > { %v1067_v14 = vmul.f32 %v1063_v2, %v7519_v5 }
 0x178   : > { %v1105_v26 = vrot.slane %v1067_v14, %v7409_v55  ;;  %v1109_v58 = vrot.slane %v1067_v14, %v7412_v53  ;;  %v1113_v25 = vrot.slane %v1067_v14, %v7428_v32  ;;  %v1117_v18 = vrot.slane %v1067_v14, %v7434_v44 }
 0x179   : > { %v1121_v50 = vrot.slane %v1067_v14, %v7444_v49  ;;  %v1125_v0 = vrot.slane %v1067_v14, %v7451_v61  ;;  %v1129_v31 = vrot.slane %v1067_v14, %v7455_v46  ;;  %v1133_v16 = vrot.slane %v1067_v14, %v7468_v4 }
 0x17a   : > { %v1158_v60 = vmul.f32 %v1105_v26, %v7367_v40  ;;  %v1159_v8 = vmul.f32 %v1109_v58, %v7370_v37  ;;  %v1160_v11 = vmul.f32 %v1113_v25, %v7208_v21  ;;  %v1161_v27 = vmul.f32 %v1117_v18, %v7212_v17  ;;  %v8127_v25 = vld [vmem:[#allocation45_spill] sm:$0xff]  ;;  %v8128_v18 = vld [vmem:[#allocation46_spill] sm:$0xff] }
 0x17b   : > { %v1162_v56 = vmul.f32 %v1121_v50, %v7269_v19  ;;  %v1163_v10 = vmul.f32 %v1125_v0, %v7277_v63  ;;  %v1164_v59 = vmul.f32 %v1129_v31, %v7312_v57  ;;  %v1165_v6 = vmul.f32 %v1133_v16, %v7315_v52 }
 0x17c   : > { %v1256_v41 = vadd.f32 %v7527_v47, %v1158_v60  ;;  %v1257_v48 = vadd.f32 %v7530_v3, %v1159_v8  ;;  %v1258_v40 = vadd.f32 %v7533_v15, %v1160_v11  ;;  %v1259_v37 = vadd.f32 %v7537_v33, %v1161_v27  ;;  %v6044_v24 = vpop.eup %6043 }
 0x17d   : > { %v1260_v21 = vadd.f32 %v7540_v1, %v1162_v56  ;;  %v1261_v17 = vadd.f32 %v7543_v9, %v1163_v10  ;;  %v1262_v19 = vadd.f32 %v7546_v23, %v1164_v59  ;;  %v1263_v63 = vadd.f32 %v7549_v30, %v1165_v6  ;;  %v8130_v10 = vld [vmem:[#allocation35_spill] sm:$0xff]  ;;  %v8131_v6 = vld [vmem:[#allocation36_spill] sm:$0xff] }
 0x17e   : > { %v5489_v57 = vpack.c.bf16 %v1257_v48, %v1256_v41  ;;  %v5490_v13 = vpack.c.bf16 %v1259_v37, %v1258_v40  ;;  %v1728_v52 = vrot.slane %v1720_v35, %v7149_v34  ;;  %v8129_v50 = vcombine.low %v8127_v25, %v8128_v18  ;;  %v8132_v48 = vld [vmem:[#allocation37_spill] sm:$0xff]  ;;  %v8133_v37 = vld [vmem:[#allocation38_spill] sm:$0xff] }
 0x17f   : > { %v6046_v22 = vpop.eup %6045  ;;  %v5491_v2 = vpack.c.bf16 %v1261_v17, %v1260_v21  ;;  %v5492_v7 = vpack.c.bf16 %v1263_v63, %v1262_v19  ;;  %v8134_v21 = vld [vmem:[#allocation39_spill] sm:$0xff]  ;;  %v8135_v19 = vld [vmem:[#allocation40_spill] sm:$0xff]  ;;  %v8136_v25 = vld [vmem:[#allocation49_spill] sm:$0xff] }
 0x180   : > { %1332 = vst [vmem:[#allocation3 + $0x68] sm:$0xff] %v5489_v57  ;;  %1333 = vst [vmem:[#allocation3 + $0x20] sm:$0xff] %v5490_v13  ;;  %v1736_v14 = vcombine.low %v1728_v52, %v1735_v20  ;;  %v1737_v42 = vcombine.low %v6044_v24, %v6046_v22  ;;  %v1754_v0 = vrot.slane %v8129_v50, %v7149_v34 }
 0x181   : > { %1334 = vst [vmem:[#allocation3 + $0x70] sm:$0xff] %v5491_v2  ;;  %1335 = vst [vmem:[#allocation3 + $0x10] sm:$0xff] %v5492_v7 }
 0x182   : > { %v1788_v26 = vmul.f32 %v1736_v14, %v7464_v38  ;;  %v1747_v58 = vrot.slane %v1737_v42, %v7149_v34 }
 0x184   : > { %v1795_v35 = vrot.slane %v1788_v26, %v7409_v55  ;;  %v1799_v31 = vrot.slane %v1788_v26, %v7412_v53  ;;  %v1803_v16 = vrot.slane %v1788_v26, %v7428_v32  ;;  %v1807_v20 = vrot.slane %v1788_v26, %v7434_v44 }
 0x185   : > { %v1811_v60 = vrot.slane %v1788_v26, %v7444_v49  ;;  %v1815_v8 = vrot.slane %v1788_v26, %v7451_v61  ;;  %v1819_v38 = vrot.slane %v1788_v26, %v7455_v46  ;;  %v1823_v11 = vrot.slane %v1788_v26, %v7468_v4 }
 0x186   : > { %v1872_v27 = vmul.f32 %v1795_v35, %v7385_v54  ;;  %v1873_v56 = vmul.f32 %v1799_v31, %v7388_v45  ;;  %v1874_v59 = vmul.f32 %v1803_v16, %v8130_v10  ;;  %v1875_v41 = vmul.f32 %v1807_v20, %v8131_v6  ;;  %v8139_v20 = vld [vmem:[#allocation51_spill] sm:$0xff] }
 0x187   : > { %v1876_v40 = vmul.f32 %v1811_v60, %v8132_v48  ;;  %v1877_v24 = vmul.f32 %v1815_v8, %v8133_v37  ;;  %v1878_v17 = vmul.f32 %v1819_v38, %v8134_v21  ;;  %v1879_v63 = vmul.f32 %v1823_v11, %v8135_v19  ;;  %v8140_v8 = vld [vmem:[#allocation52_spill] sm:$0xff]  ;;  %v8141_v38 = vld [vmem:[#allocation41_spill] sm:$0xff]  ;;  %v8142_v11 = vld [vmem:[#allocation42_spill] sm:$0xff] }
 0x188   : > { %v1888_v57 = vadd.f32 %v1872_v27, %v7419_v62  ;;  %v1889_v13 = vadd.f32 %v1873_v56, %v7423_v43  ;;  %v1890_v54 = vadd.f32 %v1874_v59, %v7440_v28  ;;  %v1891_v45 = vadd.f32 %v1875_v41, %v7448_v39  ;;  %v8137_v62 = vld [vmem:[#allocation50_spill] sm:$0xff]  ;;  %v8143_v27 = vld [vmem:[#allocation43_spill] sm:$0xff]  ;;  %v8144_v56 = vld [vmem:[#allocation44_spill] sm:$0xff] }
 0x189   : > { %v1892_v52 = vadd.f32 %v1876_v40, %v7472_v51  ;;  %v1893_v22 = vadd.f32 %v1877_v24, %v7476_v29  ;;  %v1894_v2 = vadd.f32 %v1878_v17, %v7481_v12  ;;  %v1895_v7 = vadd.f32 %v1879_v63, %v7485_v36  ;;  %v8145_v10 = vld [vmem:[#allocation47_spill] sm:$0xff]  ;;  %v8146_v59 = vld [vmem:[#allocation48_spill] sm:$0xff] }
 0x18a   : > { %v5493_v14 = vpack.c.bf16 %v1889_v13, %v1888_v57  ;;  %v5494_v42 = vpack.c.bf16 %v1891_v45, %v1890_v54  ;;  %v1769_v26 = vcombine.low %v1747_v58, %v1754_v0  ;;  %v8138_v18 = vcombine.low %v8136_v25, %v8137_v62 }
 0x18b   : > { %v5495_v50 = vpack.c.bf16 %v1893_v22, %v1892_v52  ;;  %v5496_v28 = vpack.c.bf16 %v1895_v7, %v1894_v2 }
 0x18c   : > { %v1784_v43 = vrot.slane %v8138_v18, %v7149_v34  ;;  %1968 = vst [vmem:[#allocation3 + $0x28] sm:$0xff] %v5493_v14  ;;  %1969 = vst [vmem:[#allocation3 + $0x40] sm:$0xff] %v5494_v42  ;;  %v1777_v39 = vrot.slane %v1769_v26, %v7149_v34 }
 0x18d   : > { %1970 = vst [vmem:[#allocation3 + $0x38] sm:$0xff] %v5495_v50  ;;  %1971 = vst [vmem:[#allocation3 + $0x8] sm:$0xff] %v5496_v28 }
 0x18e   : > { %v1785_v51 = vcombine.low %v1777_v39, %v1784_v43 }
 0x190   : > { %v1789_v29 = vmul.f32 %v1785_v51, %v7519_v5 }
 0x192   : > { %v1827_v12 = vrot.slane %v1789_v29, %v7409_v55  ;;  %v1831_v36 = vrot.slane %v1789_v29, %v7412_v53  ;;  %v1835_v58 = vrot.slane %v1789_v29, %v7428_v32  ;;  %v1839_v0 = vrot.slane %v1789_v29, %v7434_v44 }
 0x193   : > { %v1843_v35 = vrot.slane %v1789_v29, %v7444_v49  ;;  %v1847_v31 = vrot.slane %v1789_v29, %v7451_v61  ;;  %v1851_v16 = vrot.slane %v1789_v29, %v7455_v46  ;;  %v1855_v34 = vrot.slane %v1789_v29, %v7468_v4 }
 0x194   : > { %v1880_v60 = vmul.f32 %v1827_v12, %v8139_v20  ;;  %v1881_v5 = vmul.f32 %v1831_v36, %v8140_v8  ;;  %v1882_v55 = vmul.f32 %v1835_v58, %v8141_v38  ;;  %v1883_v53 = vmul.f32 %v1839_v0, %v8142_v11 }
 0x195   : > { %v1884_v32 = vmul.f32 %v1843_v35, %v8143_v27  ;;  %v1885_v44 = vmul.f32 %v1847_v31, %v8144_v56  ;;  %v1886_v49 = vmul.f32 %v1851_v16, %v8145_v10  ;;  %v1887_v61 = vmul.f32 %v1855_v34, %v8146_v59 }
 0x196   : > { %v1896_v46 = vadd.f32 %v1880_v60, %v7527_v47  ;;  %v1897_v4 = vadd.f32 %v1881_v5, %v7530_v3  ;;  %v1898_v6 = vadd.f32 %v1882_v55, %v7533_v15  ;;  %v1899_v41 = vadd.f32 %v1883_v53, %v7537_v33 }
 0x197   : > { %v1900_v48 = vadd.f32 %v1884_v32, %v7540_v1  ;;  %v1901_v40 = vadd.f32 %v1885_v44, %v7543_v9  ;;  %v1902_v37 = vadd.f32 %v1886_v49, %v7546_v23  ;;  %v1903_v24 = vadd.f32 %v1887_v61, %v7549_v30 }
 0x198   : > { %v5497_v21 = vpack.c.bf16 %v1897_v4, %v1896_v46  ;;  %v5498_v17 = vpack.c.bf16 %v1899_v41, %v1898_v6 }
 0x199   : > { %v5499_v19 = vpack.c.bf16 %v1901_v40, %v1900_v48  ;;  %v5500_v63 = vpack.c.bf16 %v1903_v24, %v1902_v37 }
 0x19a   : > { %1972 = vst [vmem:[#allocation3 + $0x58] sm:$0xff] %v5497_v21  ;;  %1973 = vst [vmem:[#allocation3 + $0x48] sm:$0xff] %v5498_v17 }
 0x19b   : > { %1974 = vst [vmem:[#allocation3 + $0x78] sm:$0xff] %v5499_v19  ;;  %1975 = vst [vmem:[#allocation3 + $0x30] sm:$0xff] %v5500_v63 }
 0x19c PF: > { %v6051_v47 = vld [vmem:[%s7023_s24 + $0x78] sm:$0xff]   ;;  %v6055_v1 = vld [vmem:[%s7023_s24 + $0x70] sm:$0xff]   ;;  %v6059_v57 = vld [vmem:[%s7023_s24 + $0x68] sm:$0xff]   ;;  %s7899_s23 = sshll.u32 %s6813_s21, 7  ;;  %s4872_s17 = sshll.u32 %s504_s15, 4  ;;  %s4873_s17 = int_to_ptr.vmem [resolvable:$true] %s4872_s17 }
 0x19d   : > { %v6052_v3 = vld [vmem:[%s7023_s24 + $0xf8] sm:$0xff]   ;;  %5501 = vmatprep.subr.bf16.mxu0 %v6051_v47  ;;  %v6056_v9 = vld [vmem:[%s7023_s24 + $0xf0] sm:$0xff]   ;;  %v6060_v13 = vld [vmem:[%s7023_s24 + $0xe8] sm:$0xff]   ;;  %s8147_s14 = sld [smem:[#allocation57_spill]]  ;;  %s6727_s3 = smov [#allocation20]  }
 0x19e   : > { %v6053_v15 = vld [vmem:[%s7023_s24 + $0x38] sm:$0xff]   ;;  %5523 = vmatprep.subr.bf16.mxu1 %v6052_v3  ;;  %v6057_v23 = vld [vmem:[%s7023_s24 + $0x30] sm:$0xff]   ;;  %v6061_v54 = vld [vmem:[%s7023_s24 + $0x28] sm:$0xff]   ;;  %s4896_s16 = sshll.u32 %s6727_s3, 4  ;;  %s7913_s30 = scalar_lea.sflag [#allocation18], %s449_s5  ;;  %s4897_s16 = int_to_ptr.vmem [resolvable:$true] %s4896_s16 }
 0x19f   : > { %v6054_v33 = vld [vmem:[%s7023_s24 + $0xb8] sm:$0xff]   ;;  %5502 = vmatpush3.bf16.msra.mxu0 %v6053_v15  ;;  %v6058_v30 = vld [vmem:[%s7023_s24 + $0xb0] sm:$0xff]   ;;  %v6062_v45 = vld [vmem:[%s7023_s24 + $0xa8] sm:$0xff]   ;;  %s6530_s7 = scalar_lea.vmem %s4873_s17, 128  ;;  %p8148_p8 = scmp.ne.s32.totalorder %s8086_s22, 0 }
 0x1a0   : > { %5524 = vmatpush3.bf16.msra.mxu1 %v6054_v33  ;;  %5503 = vmatprep.subr.bf16.mxu0 %v6055_v1  ;;  %v6063_v52 = vld [vmem:[%s7023_s24 + $0x60] sm:$0xff]   ;;  %v6067_v14 = vld [vmem:[%s7023_s24 + $0x58] sm:$0xff]   ;;  %v6071_v62 = vld [vmem:[%s7023_s24 + $0x50] sm:$0xff]   ;;  %p6531_p5 = scmp.ne.s32.totalorder %s4873_s17, %s6530_s7  ;;  %s6728_s8 = smov [#allocation17]  }
 0x1a1   : > { %5525 = vmatprep.subr.bf16.mxu1 %v6056_v9  ;;  %v6064_v22 = vld [vmem:[%s7023_s24 + $0xe0] sm:$0xff]   ;;  %v6068_v42 = vld [vmem:[%s7023_s24 + $0xd8] sm:$0xff]   ;;  %v6072_v18 = vld [vmem:[%s7023_s24 + $0xd0] sm:$0xff]   ;;  %s6534_s9 = sshll.u32 %s6728_s8, 4  ;;  %s6535_s9 = int_to_ptr.vmem [resolvable:$false] %s6534_s9 }
 0x1a2   : > { %v6065_v2 = vld [vmem:[%s7023_s24 + $0x20] sm:$0xff]   ;;  %v6069_v26 = vld [vmem:[%s7023_s24 + $0x18] sm:$0xff]   ;;  %v6073_v43 = vld [vmem:[%s7023_s24 + $0x10] sm:$0xff]   ;;  %p6532_p7 = pnand %p6531_p5, %p8148_p8  ;;  %s6536_s11 = scalar_lea.vmem %s6535_s9, 256 }
 0x1a3   : > { %5504 = vmatpush3.bf16.msra.mxu0 %v6057_v23  ;;  %v6066_v7 = vld [vmem:[%s7023_s24 + $0xa0] sm:$0xff]   ;;  %v6070_v25 = vld [vmem:[%s7023_s24 + $0x98] sm:$0xff]   ;;  %v6074_v50 = vld [vmem:[%s7023_s24 + $0x90] sm:$0xff]   ;;  %s7909_s13 = scalar_lea.hbm %s8147_s14, %s7899_s23  ;;  %p6537_p1 = scmp.lt.s32.totalorder %s4873_s17, %s6535_s9 }
 0x1a4   : > { %5526 = vmatpush3.bf16.msra.mxu1 %v6058_v30  ;;  %5505 = vmatprep.subr.bf16.mxu0 %v6059_v57  ;;  %v6075_v28 = vld [vmem:[%s7023_s24 + $0x48] sm:$0xff]   ;;  %v6079_v12 = vld [vmem:[%s7023_s24 + $0x40] sm:$0xff]   ;;  %v6089_v20 = vld [vmem:[%s7023_s24 + $0x178] sm:$0xff]   ;;  %p6533_p13 = pneg %p6532_p7  ;;  %p6538_p12 = scmp.lt.s32.totalorder %s6536_s11, %s6530_s7 }
 0x1a5   : > { %5527 = vmatprep.subr.bf16.mxu1 %v6060_v13  ;;  %v6076_v39 = vld [vmem:[%s7023_s24 + $0xc8] sm:$0xff]   ;;  %v6080_v36 = vld [vmem:[%s7023_s24 + $0xc0] sm:$0xff]   ;;  %v6090_v60 = vld [vmem:[%s7023_s24 + $0x1f8] sm:$0xff]  }
 0x1a6   : > { %v6077_v51 = vld [vmem:[%s7023_s24 + $0x8] sm:$0xff]   ;;  %v6081_v58 = vld [vmem:[%s7023_s24] sm:$0xff]   ;;  %v6091_v8 = vld [vmem:[%s7023_s24 + $0x138] sm:$0xff]   ;;  %p6539_p9 = por %p6538_p12, %p6537_p1 }
 0x1a7   : > { %5506 = vmatpush3.bf16.msra.mxu0 %v6061_v54  ;;  %v6078_v29 = vld [vmem:[%s7023_s24 + $0x88] sm:$0xff]   ;;  %v6082_v0 = vld [vmem:[%s7023_s24 + $0x80] sm:$0xff]   ;;  %v6092_v5 = vld [vmem:[%s7023_s24 + $0x1b8] sm:$0xff]  }
 0x1a8   : > { %5528 = vmatpush3.bf16.msra.mxu1 %v6062_v45  ;;  %5507 = vmatprep.subr.bf16.mxu0 %v6063_v52  ;;  %v6083_v35 = vld [vmem:[#allocation3] ss:$40 sps:$4 sm:$0xff]   ;;  %v6085_v31 = vld [vmem:[#allocation3 + $0x4] ss:$40 sps:$4 sm:$0xff]   ;;  %v6093_v38 = vld [vmem:[%s7023_s24 + $0x170] sm:$0xff]   ;;  %p6540_p3 = pnand %p6539_p9, %p6533_p13 }
 0x1a9   : > { %5529 = vmatprep.subr.bf16.mxu1 %v6064_v22  ;;  %v6086_v16 = vld [vmem:[#allocation3 + $0x18] ss:$40 sps:$4 sm:$0xff]   ;;  %v6088_v34 = vld [vmem:[#allocation3 + $0x1c] ss:$40 sps:$4 sm:$0xff]   ;;  %3128 = vmatprep.mubr.bf16.mxu0 %v6085_v31  ;;  %v6094_v55 = vld [vmem:[%s7023_s24 + $0x1f0] sm:$0xff]  }
 0x1aa   : > { %3169 = vmatprep.mubr.bf16.mxu1 %v6088_v34  ;;  %v6095_v11 = vld [vmem:[%s7023_s24 + $0x130] sm:$0xff]   ;;  %v6097_v27 = vld [vmem:[%s7023_s24 + $0x168] sm:$0xff]   ;;  %v6101_v10 = vld [vmem:[%s7023_s24 + $0x160] sm:$0xff]  }
 0x1ab   : > { %5508 = vmatpush3.bf16.msra.mxu0 %v6065_v2  ;;  %v6096_v53 = vld [vmem:[%s7023_s24 + $0x1b0] sm:$0xff]   ;;  %v6098_v32 = vld [vmem:[%s7023_s24 + $0x1e8] sm:$0xff]   ;;  %v6102_v49 = vld [vmem:[%s7023_s24 + $0x1e0] sm:$0xff]  }
 0x1ac   : > { %5530 = vmatpush3.bf16.msra.mxu1 %v6066_v7  ;;  %5509 = vmatprep.subr.bf16.mxu0 %v6067_v14  ;;  %v6099_v56 = vld [vmem:[%s7023_s24 + $0x128] sm:$0xff]   ;;  %v6103_v59 = vld [vmem:[%s7023_s24 + $0x120] sm:$0xff]   ;;  %v6105_v46 = vld [vmem:[%s7023_s24 + $0x158] sm:$0xff]  }
 0x1ad   : > { %5531 = vmatprep.subr.bf16.mxu1 %v6068_v42  ;;  %v6100_v44 = vld [vmem:[%s7023_s24 + $0x1a8] sm:$0xff]   ;;  %v6104_v61 = vld [vmem:[%s7023_s24 + $0x1a0] sm:$0xff]   ;;  %v6106_v4 = vld [vmem:[%s7023_s24 + $0x1d8] sm:$0xff]  }
 0x1ae   : > { %v6107_v6 = vld [vmem:[%s7023_s24 + $0x118] sm:$0xff]   ;;  %v6109_v48 = vld [vmem:[%s7023_s24 + $0x150] sm:$0xff]   ;;  %v6113_v21 = vld [vmem:[%s7023_s24 + $0x148] sm:$0xff]  }
 0x1af   : > { %5510 = vmatpush3.bf16.msra.mxu0 %v6069_v26  ;;  %v6108_v41 = vld [vmem:[%s7023_s24 + $0x198] sm:$0xff]   ;;  %v6110_v40 = vld [vmem:[%s7023_s24 + $0x1d0] sm:$0xff]   ;;  %v6114_v17 = vld [vmem:[%s7023_s24 + $0x1c8] sm:$0xff]  }
 0x1b0   : > { %5532 = vmatpush3.bf16.msra.mxu1 %v6070_v25  ;;  %5511 = vmatprep.subr.bf16.mxu0 %v6071_v62  ;;  %v6111_v37 = vld [vmem:[%s7023_s24 + $0x110] sm:$0xff]   ;;  %v6115_v19 = vld [vmem:[%s7023_s24 + $0x108] sm:$0xff]   ;;  %v6117_v47 = vld [vmem:[%s7023_s24 + $0x140] sm:$0xff]  }
 0x1b1   : > { %5533 = vmatprep.subr.bf16.mxu1 %v6072_v18  ;;  %v6112_v24 = vld [vmem:[%s7023_s24 + $0x190] sm:$0xff]   ;;  %v6116_v63 = vld [vmem:[%s7023_s24 + $0x188] sm:$0xff]   ;;  %v6118_v3 = vld [vmem:[%s7023_s24 + $0x1c0] sm:$0xff]  }
 0x1b2   : > { %v6119_v15 = vld [vmem:[%s7023_s24 + $0x100] sm:$0xff]   ;;  %v6121_v1 = vld [vmem:[#allocation3 + $0x50] ss:$-24 sps:$4 sm:$0xff]   ;;  %v6123_v9 = vld [vmem:[#allocation3 + $0x54] ss:$-24 sps:$4 sm:$0xff]  }
 0x1b3   : > { %5512 = vmatpush3.bf16.msra.mxu0 %v6073_v43  ;;  %v6120_v33 = vld [vmem:[%s7023_s24 + $0x180] sm:$0xff]   ;;  %v6127_v57 = vld [vmem:[%s7023_s24 + $0x278] sm:$0xff]   ;;  %v6131_v52 = vld [vmem:[%s7023_s24 + $0x270] sm:$0xff]  }
 0x1b4   : > { %5534 = vmatpush3.bf16.msra.mxu1 %v6074_v50  ;;  %5513 = vmatprep.subr.bf16.mxu0 %v6075_v28  ;;  %v6124_v23 = vld [vmem:[#allocation3 + $0x60] ss:$-88 sps:$4 sm:$0xff]   ;;  %v6126_v30 = vld [vmem:[#allocation3 + $0x64] ss:$-88 sps:$4 sm:$0xff]   ;;  %v6128_v13 = vld [vmem:[%s7023_s24 + $0x2f8] sm:$0xff]  }
 0x1b5   : > { %5535 = vmatprep.subr.bf16.mxu1 %v6076_v39  ;;  %v6129_v54 = vld [vmem:[%s7023_s24 + $0x238] sm:$0xff]   ;;  %v6132_v22 = vld [vmem:[%s7023_s24 + $0x2f0] sm:$0xff]   ;;  %v6135_v14 = vld [vmem:[%s7023_s24 + $0x268] sm:$0xff]  }
 0x1b6   : > { %v6130_v45 = vld [vmem:[%s7023_s24 + $0x2b8] sm:$0xff]   ;;  %v6133_v2 = vld [vmem:[%s7023_s24 + $0x230] sm:$0xff]   ;;  %v6136_v42 = vld [vmem:[%s7023_s24 + $0x2e8] sm:$0xff]  }
 0x1b7   : > { %5514 = vmatpush3.bf16.msra.mxu0 %v6077_v51  ;;  %v6134_v7 = vld [vmem:[%s7023_s24 + $0x2b0] sm:$0xff]   ;;  %v6137_v26 = vld [vmem:[%s7023_s24 + $0x228] sm:$0xff]   ;;  %v6139_v62 = vld [vmem:[%s7023_s24 + $0x260] sm:$0xff]  }
 0x1b8   : > { %5536 = vmatpush3.bf16.msra.mxu1 %v6078_v29  ;;  %5515 = vmatprep.subr.bf16.mxu0 %v6079_v12  ;;  %v6138_v25 = vld [vmem:[%s7023_s24 + $0x2a8] sm:$0xff]   ;;  %v6140_v18 = vld [vmem:[%s7023_s24 + $0x2e0] sm:$0xff]   ;;  %v6143_v28 = vld [vmem:[%s7023_s24 + $0x258] sm:$0xff]  }
 0x1b9   : > { %5537 = vmatprep.subr.bf16.mxu1 %v6080_v36  ;;  %v6141_v43 = vld [vmem:[%s7023_s24 + $0x220] sm:$0xff]   ;;  %v6144_v39 = vld [vmem:[%s7023_s24 + $0x2d8] sm:$0xff]   ;;  %v6147_v12 = vld [vmem:[%s7023_s24 + $0x250] sm:$0xff]  }
 0x1ba   : > { %v6142_v50 = vld [vmem:[%s7023_s24 + $0x2a0] sm:$0xff]   ;;  %v6145_v51 = vld [vmem:[%s7023_s24 + $0x218] sm:$0xff]   ;;  %v6148_v36 = vld [vmem:[%s7023_s24 + $0x2d0] sm:$0xff]  }
 0x1bb   : > { %5516 = vmatpush3.bf16.msra.mxu0 %v6081_v58  ;;  %v6146_v29 = vld [vmem:[%s7023_s24 + $0x298] sm:$0xff]   ;;  %v6149_v58 = vld [vmem:[%s7023_s24 + $0x210] sm:$0xff]   ;;  %v6152_v31 = vld [vmem:[%s7023_s24 + $0x2c8] sm:$0xff]  }
 0x1bc   : > { %5538 = vmatpush3.bf16.msra.mxu1 %v6082_v0  ;;  %5545 = vmatprep.subr.bf16.mxu0 %v6089_v20  ;;  %v6150_v0 = vld [vmem:[%s7023_s24 + $0x290] sm:$0xff]   ;;  %v6154_v34 = vld [vmem:[%s7023_s24 + $0x288] sm:$0xff]   ;;  %v6155_v20 = vld [vmem:[%s7023_s24 + $0x240] sm:$0xff]  }
 0x1bd   : > { %5567 = vmatprep.subr.bf16.mxu1 %v6090_v60  ;;  %v6156_v60 = vld [vmem:[%s7023_s24 + $0x2c0] sm:$0xff]  }
 0x1be   : > { %3129 = vmatmul.mubr.bf16.vlgmr.msra.gmra.mxu0 %v6083_v35  ;;  %v6151_v35 = vld [vmem:[%s7023_s24 + $0x248] sm:$0xff]  }
 0x1bf   : > { %3170 = vmatmul.mubr.bf16.vlgmr.msra.gmra.mxu1 %v6086_v16  ;;  %5546 = vmatpush3.bf16.msra.mxu0 %v6091_v8  ;;  %v6153_v16 = vld [vmem:[%s7023_s24 + $0x208] sm:$0xff]   ;;  %v6157_v8 = vld [vmem:[%s7023_s24 + $0x200] sm:$0xff]  }
 0x1c0   : > { %5568 = vmatpush3.bf16.msra.mxu1 %v6092_v5  ;;  %5547 = vmatprep.subr.bf16.mxu0 %v6093_v38  ;;  %v6158_v5 = vld [vmem:[%s7023_s24 + $0x280] sm:$0xff]   ;;  %v6159_v38 = vld [vmem:[#allocation3 + $0x68] ss:$-16 sps:$4 sm:$0xff]  }
 0x1c1   : > { %5569 = vmatprep.subr.bf16.mxu1 %v6094_v55  ;;  %3210 = vmatprep.mubr.bf16.mxu0 %v6123_v9  ;;  %v6161_v55 = vld [vmem:[#allocation3 + $0x6c] ss:$-16 sps:$4 sm:$0xff]  }
 0x1c2   : > { %3251 = vmatprep.mubr.bf16.mxu1 %v6126_v30  ;;  %v6190_v9 = vld [vmem:[%s7023_s24 + $0x3c8] sm:$0xff]  }
 0x1c3   : > { %5548 = vmatpush3.bf16.msra.mxu0 %v6095_v11  ;;  %v6162_v11 = vld [vmem:[#allocation3 + $0x20] ss:$40 sps:$4 sm:$0xff]  }
 0x1c4   : > { %5570 = vmatpush3.bf16.msra.mxu1 %v6096_v53  ;;  %5549 = vmatprep.subr.bf16.mxu0 %v6097_v27  ;;  %v6164_v53 = vld [vmem:[#allocation3 + $0x24] ss:$40 sps:$4 sm:$0xff]   ;;  %v6165_v27 = vld [vmem:[%s7023_s24 + $0x378] sm:$0xff]  }
 0x1c5   : > { %5571 = vmatprep.subr.bf16.mxu1 %v6098_v32  ;;  %v6166_v32 = vld [vmem:[%s7023_s24 + $0x3f8] sm:$0xff]   ;;  %v6192_v30 = vld [vmem:[%s7023_s24 + $0x388] sm:$0xff]  }
 0x1c7   : > { %5550 = vmatpush3.bf16.msra.mxu0 %v6099_v56  ;;  %v6167_v56 = vld [vmem:[%s7023_s24 + $0x338] sm:$0xff]  }
 0x1c8   : > { %5572 = vmatpush3.bf16.msra.mxu1 %v6100_v44  ;;  %5551 = vmatprep.subr.bf16.mxu0 %v6101_v10  ;;  %v6168_v44 = vld [vmem:[%s7023_s24 + $0x3b8] sm:$0xff]   ;;  %v6169_v10 = vld [vmem:[%s7023_s24 + $0x370] sm:$0xff]  }
 0x1c9   : > { %5573 = vmatprep.subr.bf16.mxu1 %v6102_v49  ;;  %v6170_v49 = vld [vmem:[%s7023_s24 + $0x3f0] sm:$0xff]  }
 0x1cb   : > { %5552 = vmatpush3.bf16.msra.mxu0 %v6103_v59  ;;  %v6171_v59 = vld [vmem:[%s7023_s24 + $0x330] sm:$0xff]  }
 0x1cc   : > { %5574 = vmatpush3.bf16.msra.mxu1 %v6104_v61  ;;  %5553 = vmatprep.subr.bf16.mxu0 %v6105_v46  ;;  %v6172_v61 = vld [vmem:[%s7023_s24 + $0x3b0] sm:$0xff]   ;;  %v6173_v46 = vld [vmem:[%s7023_s24 + $0x368] sm:$0xff]  }
 0x1cd   : > { %5575 = vmatprep.subr.bf16.mxu1 %v6106_v4  ;;  %v6174_v4 = vld [vmem:[%s7023_s24 + $0x3e8] sm:$0xff]  }
 0x1cf   : > { %5554 = vmatpush3.bf16.msra.mxu0 %v6107_v6  ;;  %v6175_v6 = vld [vmem:[%s7023_s24 + $0x328] sm:$0xff]  }
 0x1d0   : > { %5576 = vmatpush3.bf16.msra.mxu1 %v6108_v41  ;;  %5555 = vmatprep.subr.bf16.mxu0 %v6109_v48  ;;  %v6176_v41 = vld [vmem:[%s7023_s24 + $0x3a8] sm:$0xff]   ;;  %v6177_v48 = vld [vmem:[%s7023_s24 + $0x360] sm:$0xff]  }
 0x1d1   : > { %5577 = vmatprep.subr.bf16.mxu1 %v6110_v40  ;;  %v6178_v40 = vld [vmem:[%s7023_s24 + $0x3e0] sm:$0xff]  }
 0x1d3   : > { %5556 = vmatpush3.bf16.msra.mxu0 %v6111_v37  ;;  %v6179_v37 = vld [vmem:[%s7023_s24 + $0x320] sm:$0xff]  }
 0x1d4   : > { %5578 = vmatpush3.bf16.msra.mxu1 %v6112_v24  ;;  %5557 = vmatprep.subr.bf16.mxu0 %v6113_v21  ;;  %v6180_v24 = vld [vmem:[%s7023_s24 + $0x3a0] sm:$0xff]   ;;  %v6181_v21 = vld [vmem:[%s7023_s24 + $0x358] sm:$0xff]  }
 0x1d5   : > { %5579 = vmatprep.subr.bf16.mxu1 %v6114_v17  ;;  %v6182_v17 = vld [vmem:[%s7023_s24 + $0x3d8] sm:$0xff]  }
 0x1d7   : > { %5558 = vmatpush3.bf16.msra.mxu0 %v6115_v19  ;;  %v6183_v19 = vld [vmem:[%s7023_s24 + $0x318] sm:$0xff]  }
 0x1d8   : > { %5580 = vmatpush3.bf16.msra.mxu1 %v6116_v63  ;;  %5559 = vmatprep.subr.bf16.mxu0 %v6117_v47  ;;  %v6184_v63 = vld [vmem:[%s7023_s24 + $0x398] sm:$0xff]   ;;  %v6185_v47 = vld [vmem:[%s7023_s24 + $0x350] sm:$0xff]  }
 0x1d9   : > { %5581 = vmatprep.subr.bf16.mxu1 %v6118_v3  ;;  %v6186_v3 = vld [vmem:[%s7023_s24 + $0x3d0] sm:$0xff]  }
 0x1db   : > { %5560 = vmatpush3.bf16.msra.mxu0 %v6119_v15  ;;  %v6187_v15 = vld [vmem:[%s7023_s24 + $0x310] sm:$0xff]  }
 0x1dc   : > { %5582 = vmatpush3.bf16.msra.mxu1 %v6120_v33  ;;  %5589 = vmatprep.subr.bf16.mxu0 %v6127_v57  ;;  %v6188_v33 = vld [vmem:[%s7023_s24 + $0x390] sm:$0xff]   ;;  %v6193_v57 = vld [vmem:[%s7023_s24 + $0x340] sm:$0xff]  }
 0x1dd   : > { %5611 = vmatprep.subr.bf16.mxu1 %v6128_v13  ;;  %v6194_v13 = vld [vmem:[%s7023_s24 + $0x3c0] sm:$0xff]  }
 0x1de   : > { %3211 = vmatmul.mubr.bf16.vlgmr.msra.gmra.mxu0 %v6121_v1  ;;  %v6189_v1 = vld [vmem:[%s7023_s24 + $0x348] sm:$0xff]  }
 0x1df   : > { %3252 = vmatmul.mubr.bf16.vlgmr.msra.gmra.mxu1 %v6124_v23  ;;  %5590 = vmatpush3.bf16.msra.mxu0 %v6129_v54  ;;  %v6191_v23 = vld [vmem:[%s7023_s24 + $0x308] sm:$0xff]   ;;  %v6195_v54 = vld [vmem:[%s7023_s24 + $0x300] sm:$0xff]  }
 0x1e0   : > { %5612 = vmatpush3.bf16.msra.mxu1 %v6130_v45  ;;  %5591 = vmatprep.subr.bf16.mxu0 %v6131_v52  ;;  %v6196_v45 = vld [vmem:[%s7023_s24 + $0x380] sm:$0xff]   ;;  %v6197_v52 = vld [vmem:[#allocation3 + $0x70] ss:$8 sps:$4 sm:$0xff]  }
 0x1e1   : > { %5613 = vmatprep.subr.bf16.mxu1 %v6132_v22  ;;  %3292 = vmatprep.mubr.bf16.mxu0 %v6161_v55  ;;  %v6199_v22 = vld [vmem:[#allocation3 + $0x74] ss:$8 sps:$4 sm:$0xff]  }
 0x1e2   : > { %3333 = vmatprep.mubr.bf16.mxu1 %v6164_v53  ;;  %v6223_v55 = vld [vmem:[%s7014_s1 + $0x90] sm:$0xff]   ;;  %v6225_v53 = vld [vmem:[%s7014_s1 + $0xc8] sm:$0xff]  }
 0x1e3   : > { %5592 = vmatpush3.bf16.msra.mxu0 %v6133_v2  ;;  %v1983_v2 = vld [vmem:[#allocation3 + $0x10] sm:$0xff] }
 0x1e4   : > { %5614 = vmatpush3.bf16.msra.mxu1 %v6134_v7  ;;  %5593 = vmatprep.subr.bf16.mxu0 %v6135_v14  ;;  %v1991_v7 = vld [vmem:[#allocation3 + $0x30] sm:$0xff] }
 0x1e5   : > { %5615 = vmatprep.subr.bf16.mxu1 %v6136_v42  ;;  %v5191_v14 = vcombine.low %v1983_v2, %v1991_v7  ;;  %v5192_v42 = vcombine.high %v1983_v2, %v1991_v7  ;;  %v6258_v2 = vld [vmem:[%s7014_s1 + $0x110] sm:$0xff]  }
 0x1e6   : > { %v6259_v7 = vld [vmem:[%s7014_s1 + $0x190] sm:$0xff]  }
 0x1e7   : > { %5594 = vmatpush3.bf16.msra.mxu0 %v6137_v26  ;;  %v6200_v26 = vld [vmem:[%s7014_s1 + $0x78] sm:$0xff]  }
 0x1e8   : > { %5616 = vmatpush3.bf16.msra.mxu1 %v6138_v25  ;;  %5595 = vmatprep.subr.bf16.mxu0 %v6139_v62  ;;  %v6201_v25 = vld [vmem:[%s7014_s1 + $0xf8] sm:$0xff]  }
 0x1e9   : > { %5617 = vmatprep.subr.bf16.mxu1 %v6140_v18  ;;  %v6202_v62 = vld [vmem:[%s7014_s1 + $0x38] sm:$0xff]  }
 0x1ea   : > { %v6203_v18 = vld [vmem:[%s7014_s1 + $0xb8] sm:$0xff]  }
 0x1eb   : > { %5596 = vmatpush3.bf16.msra.mxu0 %v6141_v43  ;;  %v6204_v43 = vld [vmem:[%s7014_s1 + $0x70] sm:$0xff]  }
 0x1ec   : > { %5618 = vmatpush3.bf16.msra.mxu1 %v6142_v50  ;;  %5597 = vmatprep.subr.bf16.mxu0 %v6143_v28  ;;  %v6205_v50 = vld [vmem:[%s7014_s1 + $0xf0] sm:$0xff]  }
 0x1ed   : > { %5619 = vmatprep.subr.bf16.mxu1 %v6144_v39  ;;  %v6206_v28 = vld [vmem:[%s7014_s1 + $0x30] sm:$0xff]  }
 0x1ee   : > { %v6207_v39 = vld [vmem:[%s7014_s1 + $0xb0] sm:$0xff]  }
 0x1ef   : > { %5598 = vmatpush3.bf16.msra.mxu0 %v6145_v51  ;;  %v6208_v51 = vld [vmem:[%s7014_s1 + $0x68] sm:$0xff]  }
 0x1f0   : > { %5620 = vmatpush3.bf16.msra.mxu1 %v6146_v29  ;;  %5599 = vmatprep.subr.bf16.mxu0 %v6147_v12  ;;  %v6209_v29 = vld [vmem:[%s7014_s1 + $0xe8] sm:$0xff]  }
 0x1f1   : > { %5621 = vmatprep.subr.bf16.mxu1 %v6148_v36  ;;  %v6210_v12 = vld [vmem:[%s7014_s1 + $0x28] sm:$0xff]  }
 0x1f2   : > { %v6211_v36 = vld [vmem:[%s7014_s1 + $0xa8] sm:$0xff]  }
 0x1f3   : > { %5600 = vmatpush3.bf16.msra.mxu0 %v6149_v58  ;;  %v6212_v58 = vld [vmem:[%s7014_s1 + $0x60] sm:$0xff]  }
 0x1f4   : > { %5622 = vmatpush3.bf16.msra.mxu1 %v6150_v0  ;;  %5601 = vmatprep.subr.bf16.mxu0 %v6151_v35  ;;  %v6213_v0 = vld [vmem:[%s7014_s1 + $0xe0] sm:$0xff]  }
 0x1f5   : > { %5623 = vmatprep.subr.bf16.mxu1 %v6152_v31  ;;  %v6214_v35 = vld [vmem:[%s7014_s1 + $0x20] sm:$0xff]  }
 0x1f6   : > { %v6215_v31 = vld [vmem:[%s7014_s1 + $0xa0] sm:$0xff]  }
 0x1f7   : > { %5602 = vmatpush3.bf16.msra.mxu0 %v6153_v16  ;;  %v6216_v16 = vld [vmem:[%s7014_s1 + $0x58] sm:$0xff]  }
 0x1f8   : > { %5624 = vmatpush3.bf16.msra.mxu1 %v6154_v34  ;;  %5603 = vmatprep.subr.bf16.mxu0 %v6155_v20  ;;  %v6217_v34 = vld [vmem:[%s7014_s1 + $0xd8] sm:$0xff]  }
 0x1f9   : > { %5625 = vmatprep.subr.bf16.mxu1 %v6156_v60  ;;  %v6218_v20 = vld [vmem:[%s7014_s1 + $0x18] sm:$0xff]  }
 0x1fa   : > { %v6219_v60 = vld [vmem:[%s7014_s1 + $0x98] sm:$0xff]  }
 0x1fb   : > { %5604 = vmatpush3.bf16.msra.mxu0 %v6157_v8  ;;  %v6220_v8 = vld [vmem:[%s7014_s1 + $0x50] sm:$0xff]  }
 0x1fc   : > { %5626 = vmatpush3.bf16.msra.mxu1 %v6158_v5  ;;  %5633 = vmatprep.subr.bf16.mxu0 %v6165_v27  ;;  %v6221_v5 = vld [vmem:[%s7014_s1 + $0xd0] sm:$0xff]   ;;  %v6226_v27 = vld [vmem:[%s7014_s1 + $0x8] sm:$0xff]  }
 0x1fd   : > { %5655 = vmatprep.subr.bf16.mxu1 %v6166_v32  ;;  %v6227_v32 = vld [vmem:[%s7014_s1 + $0x88] sm:$0xff]  }
 0x1fe   : > { %3293 = vmatmul.mubr.bf16.vlgmr.msra.gmra.mxu0 %v6159_v38  ;;  %v6222_v38 = vld [vmem:[%s7014_s1 + $0x10] sm:$0xff]  }
 0x1ff   : > { %3334 = vmatmul.mubr.bf16.vlgmr.msra.gmra.mxu1 %v6162_v11  ;;  %5634 = vmatpush3.bf16.msra.mxu0 %v6167_v56  ;;  %v6224_v11 = vld [vmem:[%s7014_s1 + $0x48] sm:$0xff]   ;;  %v6228_v56 = vld [vmem:[%s7014_s1 + $0x40] sm:$0xff]  }
 0x200   : > { %5656 = vmatpush3.bf16.msra.mxu1 %v6168_v44  ;;  %5635 = vmatprep.subr.bf16.mxu0 %v6169_v10  ;;  %v6229_v44 = vld [vmem:[%s7014_s1 + $0xc0] sm:$0xff]  }
 0x201   : > { %5657 = vmatprep.subr.bf16.mxu1 %v6170_v49  ;;  %3374 = vmatprep.mubr.bf16.mxu0 %v6199_v22  ;;  %v6230_v10 = vld [vmem:[%s7014_s1] sm:$0xff]   ;;  %v6257_v22 = vld [vmem:[%s7014_s1 + $0x1d0] sm:$0xff]  }
 0x202   : > { %3415 = vmatprep.mubr.bf16.mxu1 %v5192_v42  ;;  %v6231_v49 = vld [vmem:[%s7014_s1 + $0x80] sm:$0xff]   ;;  %v6261_v42 = vld [vmem:[%s7014_s1 + $0x1c8] sm:$0xff]  }
 0x203   : > { %5636 = vmatpush3.bf16.msra.mxu0 %v6171_v59  ;;  %v3426_v59 = vld [vmem:[#allocation2 + $0x30] sm:$0xff] }
 0x204   : > { %5658 = vmatpush3.bf16.msra.mxu1 %v6172_v61  ;;  %5637 = vmatprep.subr.bf16.mxu0 %v6173_v46  ;;  %v3427_v61 = vld [vmem:[#allocation2] sm:$0xff]  ;;  %v5321_v46 = vcombine.low %v3426_v59, %v3426_v59 }
 0x205   : > { %5659 = vmatprep.subr.bf16.mxu1 %v6174_v4  ;;  %v5322_v4 = vcombine.high %v3426_v59, %v3426_v59  ;;  %v6292_v59 = vld [vmem:[%s7014_s1 + $0x250] sm:$0xff]  }
 0x207   : > { %5638 = vmatpush3.bf16.msra.mxu0 %v6175_v6  ;;  %v5323_v6 = vcombine.low %v3427_v61, %v3427_v61 }
 0x208   : > { %5660 = vmatpush3.bf16.msra.mxu1 %v6176_v41  ;;  %5639 = vmatprep.subr.bf16.mxu0 %v6177_v48  ;;  %v5324_v41 = vcombine.high %v3427_v61, %v3427_v61  ;;  %v6236_v48 = vld [vmem:[%s7014_s1 + $0x178] sm:$0xff]   ;;  %v6293_v61 = vld [vmem:[%s7014_s1 + $0x2d0] sm:$0xff]  }
 0x209   : > { %5661 = vmatprep.subr.bf16.mxu1 %v6178_v40  ;;  %v6237_v40 = vld [vmem:[%s7014_s1 + $0x1f8] sm:$0xff]  }
 0x20b   : > { %5640 = vmatpush3.bf16.msra.mxu0 %v6179_v37  ;;  %v6238_v37 = vld [vmem:[%s7014_s1 + $0x138] sm:$0xff]  }
 0x20c   : > { %5662 = vmatpush3.bf16.msra.mxu1 %v6180_v24  ;;  %5641 = vmatprep.subr.bf16.mxu0 %v6181_v21  ;;  %v6239_v24 = vld [vmem:[%s7014_s1 + $0x1b8] sm:$0xff]   ;;  %v6240_v21 = vld [vmem:[%s7014_s1 + $0x170] sm:$0xff]  }
 0x20d   : > { %5663 = vmatprep.subr.bf16.mxu1 %v6182_v17  ;;  %v6241_v17 = vld [vmem:[%s7014_s1 + $0x1f0] sm:$0xff]  }
 0x20f   : > { %5642 = vmatpush3.bf16.msra.mxu0 %v6183_v19  ;;  %v6242_v19 = vld [vmem:[%s7014_s1 + $0x130] sm:$0xff]  }
 0x210   : > { %5664 = vmatpush3.bf16.msra.mxu1 %v6184_v63  ;;  %5643 = vmatprep.subr.bf16.mxu0 %v6185_v47  ;;  %v6243_v63 = vld [vmem:[%s7014_s1 + $0x1b0] sm:$0xff]   ;;  %v6244_v47 = vld [vmem:[%s7014_s1 + $0x168] sm:$0xff]  }
 0x211   : > { %5665 = vmatprep.subr.bf16.mxu1 %v6186_v3  ;;  %v6245_v3 = vld [vmem:[%s7014_s1 + $0x1e8] sm:$0xff]  }
 0x213   : > { %5644 = vmatpush3.bf16.msra.mxu0 %v6187_v15  ;;  %v6246_v15 = vld [vmem:[%s7014_s1 + $0x128] sm:$0xff]  }
 0x214   : > { %5666 = vmatpush3.bf16.msra.mxu1 %v6188_v33  ;;  %5645 = vmatprep.subr.bf16.mxu0 %v6189_v1  ;;  %v6247_v33 = vld [vmem:[%s7014_s1 + $0x1a8] sm:$0xff]   ;;  %v6248_v1 = vld [vmem:[%s7014_s1 + $0x160] sm:$0xff]  }
 0x215   : > { %5667 = vmatprep.subr.bf16.mxu1 %v6190_v9  ;;  %v6249_v9 = vld [vmem:[%s7014_s1 + $0x1e0] sm:$0xff]  }
 0x217   : > { %5646 = vmatpush3.bf16.msra.mxu0 %v6191_v23  ;;  %v6250_v23 = vld [vmem:[%s7014_s1 + $0x120] sm:$0xff]  }
 0x218   : > { %5668 = vmatpush3.bf16.msra.mxu1 %v6192_v30  ;;  %5647 = vmatprep.subr.bf16.mxu0 %v6193_v57  ;;  %v6251_v30 = vld [vmem:[%s7014_s1 + $0x1a0] sm:$0xff]   ;;  %v6252_v57 = vld [vmem:[%s7014_s1 + $0x158] sm:$0xff]  }
 0x219   : > { %5669 = vmatprep.subr.bf16.mxu1 %v6194_v13  ;;  %v6253_v13 = vld [vmem:[%s7014_s1 + $0x1d8] sm:$0xff]  }
 0x21b   : > { %5648 = vmatpush3.bf16.msra.mxu0 %v6195_v54  ;;  %v6254_v54 = vld [vmem:[%s7014_s1 + $0x118] sm:$0xff]  }
 0x21c   : > { %5670 = vmatpush3.bf16.msra.mxu1 %v6196_v45  ;;  %5677 = vmatprep.subr.bf16.mxu0 %v6200_v26  ;;  %v6255_v45 = vld [vmem:[%s7014_s1 + $0x198] sm:$0xff]   ;;  %v6262_v26 = vld [vmem:[%s7014_s1 + $0x108] sm:$0xff]  }
 0x21d   : > { %5699 = vmatprep.subr.bf16.mxu1 %v6201_v25  ;;  %v6263_v25 = vld [vmem:[%s7014_s1 + $0x188] sm:$0xff]  }
 0x21e   : > { %3375 = vmatmul.mubr.bf16.vlgmr.msra.gmra.mxu0 %v6197_v52  ;;  %v6256_v52 = vld [vmem:[%s7014_s1 + $0x150] sm:$0xff]  }
 0x21f   : > { %3416 = vmatmul.mubr.bf16.vlgmr.msra.gmra.mxu1 %v5191_v14  ;;  %5678 = vmatpush3.bf16.msra.mxu0 %v6202_v62  ;;  %v6260_v14 = vld [vmem:[%s7014_s1 + $0x148] sm:$0xff]   ;;  %v6264_v62 = vld [vmem:[%s7014_s1 + $0x140] sm:$0xff]  }
 0x220   : > { %5700 = vmatpush3.bf16.msra.mxu1 %v6203_v18  ;;  %5679 = vmatprep.subr.bf16.mxu0 %v6204_v43  ;;  %v6265_v18 = vld [vmem:[%s7014_s1 + $0x1c0] sm:$0xff]  }
 0x221   : > { %5701 = vmatprep.subr.bf16.mxu1 %v6205_v50  ;;  %4546 = vmatprep.mubr.bf16.mxu0 %v5322_v4  ;;  %v6266_v43 = vld [vmem:[%s7014_s1 + $0x100] sm:$0xff]   ;;  %v6295_v4 = vld [vmem:[%s7014_s1 + $0x290] sm:$0xff]  }
 0x222   : > { %4586 = vmatprep.mubr.bf16.mxu1 %v5324_v41  ;;  %v6267_v50 = vld [vmem:[%s7014_s1 + $0x180] sm:$0xff]   ;;  %v6297_v41 = vld [vmem:[%s7014_s1 + $0x2c8] sm:$0xff]  }
 0x223   : > { %5680 = vmatpush3.bf16.msra.mxu0 %v6206_v28  ;;  %v3428_v28 = vld [vmem:[#allocation2 + $0x18] sm:$0xff] }
 0x224   : > { %5702 = vmatpush3.bf16.msra.mxu1 %v6207_v39  ;;  %5681 = vmatprep.subr.bf16.mxu0 %v6208_v51  ;;  %v5325_v39 = vcombine.low %v3428_v28, %v3428_v28  ;;  %v5326_v51 = vcombine.high %v3428_v28, %v3428_v28  ;;  %v6328_v28 = vld [vmem:[%s7014_s1 + $0x350] sm:$0xff]  }
 0x225   : > { %5703 = vmatprep.subr.bf16.mxu1 %v6209_v29  ;;  %v3429_v29 = vld [vmem:[#allocation2 + $0x10] sm:$0xff] }
 0x227   : > { %5682 = vmatpush3.bf16.msra.mxu0 %v6210_v12  ;;  %v5327_v12 = vcombine.low %v3429_v29, %v3429_v29 }
 0x228   : > { %5704 = vmatpush3.bf16.msra.mxu1 %v6211_v36  ;;  %5683 = vmatprep.subr.bf16.mxu0 %v6212_v58  ;;  %v5328_v36 = vcombine.high %v3429_v29, %v3429_v29  ;;  %v6272_v58 = vld [vmem:[%s7014_s1 + $0x278] sm:$0xff]   ;;  %v6331_v29 = vld [vmem:[%s7014_s1 + $0x390] sm:$0xff]  }
 0x229   : > { %5705 = vmatprep.subr.bf16.mxu1 %v6213_v0  ;;  %v6273_v0 = vld [vmem:[%s7014_s1 + $0x2f8] sm:$0xff]  }
 0x22b   : > { %5684 = vmatpush3.bf16.msra.mxu0 %v6214_v35  ;;  %v6274_v35 = vld [vmem:[%s7014_s1 + $0x238] sm:$0xff]  }
 0x22c   : > { %5706 = vmatpush3.bf16.msra.mxu1 %v6215_v31  ;;  %5685 = vmatprep.subr.bf16.mxu0 %v6216_v16  ;;  %v6275_v31 = vld [vmem:[%s7014_s1 + $0x2b8] sm:$0xff]   ;;  %v6276_v16 = vld [vmem:[%s7014_s1 + $0x270] sm:$0xff]  }
 0x22d   : > { %5707 = vmatprep.subr.bf16.mxu1 %v6217_v34  ;;  %v6277_v34 = vld [vmem:[%s7014_s1 + $0x2f0] sm:$0xff]  }
 0x22f   : > { %5686 = vmatpush3.bf16.msra.mxu0 %v6218_v20  ;;  %v6278_v20 = vld [vmem:[%s7014_s1 + $0x230] sm:$0xff]  }
 0x230   : > { %5708 = vmatpush3.bf16.msra.mxu1 %v6219_v60  ;;  %5687 = vmatprep.subr.bf16.mxu0 %v6220_v8  ;;  %v6279_v60 = vld [vmem:[%s7014_s1 + $0x2b0] sm:$0xff]   ;;  %v6280_v8 = vld [vmem:[%s7014_s1 + $0x268] sm:$0xff]  }
 0x231   : > { %5709 = vmatprep.subr.bf16.mxu1 %v6221_v5  ;;  %v6281_v5 = vld [vmem:[%s7014_s1 + $0x2e8] sm:$0xff]  }
 0x233   : > { %5688 = vmatpush3.bf16.msra.mxu0 %v6222_v38  ;;  %v6282_v38 = vld [vmem:[%s7014_s1 + $0x228] sm:$0xff]  }
 0x234   : > { %5710 = vmatpush3.bf16.msra.mxu1 %v6223_v55  ;;  %5689 = vmatprep.subr.bf16.mxu0 %v6224_v11  ;;  %v6283_v55 = vld [vmem:[%s7014_s1 + $0x2a8] sm:$0xff]   ;;  %v6284_v11 = vld [vmem:[%s7014_s1 + $0x260] sm:$0xff]  }
 0x235   : > { %5711 = vmatprep.subr.bf16.mxu1 %v6225_v53  ;;  %v6285_v53 = vld [vmem:[%s7014_s1 + $0x2e0] sm:$0xff]  }
 0x237   : > { %5690 = vmatpush3.bf16.msra.mxu0 %v6226_v27  ;;  %v6286_v27 = vld [vmem:[%s7014_s1 + $0x220] sm:$0xff]  }
 0x238   : > { %5712 = vmatpush3.bf16.msra.mxu1 %v6227_v32  ;;  %5691 = vmatprep.subr.bf16.mxu0 %v6228_v56  ;;  %v6287_v32 = vld [vmem:[%s7014_s1 + $0x2a0] sm:$0xff]   ;;  %v6288_v56 = vld [vmem:[%s7014_s1 + $0x258] sm:$0xff]  }
 0x239   : > { %5713 = vmatprep.subr.bf16.mxu1 %v6229_v44  ;;  %v6289_v44 = vld [vmem:[%s7014_s1 + $0x2d8] sm:$0xff]  }
 0x23b   : > { %5692 = vmatpush3.bf16.msra.mxu0 %v6230_v10  ;;  %v6290_v10 = vld [vmem:[%s7014_s1 + $0x218] sm:$0xff]  }
 0x23c   : > { %5714 = vmatpush3.bf16.msra.mxu1 %v6231_v49  ;;  %5721 = vmatprep.subr.bf16.mxu0 %v6236_v48  ;;  %v6291_v49 = vld [vmem:[%s7014_s1 + $0x298] sm:$0xff]   ;;  %v6298_v48 = vld [vmem:[%s7014_s1 + $0x208] sm:$0xff]  }
 0x23d   : > { %5743 = vmatprep.subr.bf16.mxu1 %v6237_v40  ;;  %v6299_v40 = vld [vmem:[%s7014_s1 + $0x288] sm:$0xff]  }
 0x23e   : > { %4547 = vmatmul.mubr.bf16.vlgmr.msra.gmra.mxu0 %v5321_v46  ;;  %v6294_v46 = vld [vmem:[%s7014_s1 + $0x210] sm:$0xff]  }
 0x23f   : > { %4587 = vmatmul.mubr.bf16.vlgmr.msra.gmra.mxu1 %v5323_v6  ;;  %5722 = vmatpush3.bf16.msra.mxu0 %v6238_v37  ;;  %v6296_v6 = vld [vmem:[%s7014_s1 + $0x248] sm:$0xff]   ;;  %v6300_v37 = vld [vmem:[%s7014_s1 + $0x240] sm:$0xff]  }
 0x240   : > { %5744 = vmatpush3.bf16.msra.mxu1 %v6239_v24  ;;  %5723 = vmatprep.subr.bf16.mxu0 %v6240_v21  ;;  %v6301_v24 = vld [vmem:[%s7014_s1 + $0x2c0] sm:$0xff]  }
 0x241   : > { %5745 = vmatprep.subr.bf16.mxu1 %v6241_v17  ;;  %4626 = vmatprep.mubr.bf16.mxu0 %v5326_v51  ;;  %v6302_v21 = vld [vmem:[%s7014_s1 + $0x200] sm:$0xff]   ;;  %v6330_v51 = vld [vmem:[%s7014_s1 + $0x310] sm:$0xff]  }
 0x242   : > { %4666 = vmatprep.mubr.bf16.mxu1 %v5328_v36  ;;  %v6303_v17 = vld [vmem:[%s7014_s1 + $0x280] sm:$0xff]   ;;  %v6333_v36 = vld [vmem:[%s7014_s1 + $0x3c8] sm:$0xff]  }
 0x243   : > { %5724 = vmatpush3.bf16.msra.mxu0 %v6242_v19  ;;  %v3430_v19 = vld [vmem:[#allocation2 + $0x8] sm:$0xff] }
 0x244   : > { %5746 = vmatpush3.bf16.msra.mxu1 %v6243_v63  ;;  %5725 = vmatprep.subr.bf16.mxu0 %v6244_v47  ;;  %v3431_v63 = vld [vmem:[#allocation2 + $0x20] sm:$0xff]  ;;  %v5329_v47 = vcombine.low %v3430_v19, %v3430_v19 }
 0x245   : > { %5747 = vmatprep.subr.bf16.mxu1 %v6245_v3  ;;  %v5330_v3 = vcombine.high %v3430_v19, %v3430_v19 }
 0x247   : > { %5726 = vmatpush3.bf16.msra.mxu0 %v6246_v15  ;;  %v5331_v15 = vcombine.low %v3431_v63, %v3431_v63 }
 0x248   : > { %5748 = vmatpush3.bf16.msra.mxu1 %v6247_v33  ;;  %5727 = vmatprep.subr.bf16.mxu0 %v6248_v1  ;;  %v5332_v33 = vcombine.high %v3431_v63, %v3431_v63  ;;  %v6308_v1 = vld [vmem:[%s7014_s1 + $0x378] sm:$0xff]  }
 0x249   : > { %5749 = vmatprep.subr.bf16.mxu1 %v6249_v9  ;;  %v6309_v9 = vld [vmem:[%s7014_s1 + $0x3f8] sm:$0xff]  }
 0x24b   : > { %5728 = vmatpush3.bf16.msra.mxu0 %v6250_v23  ;;  %v6310_v23 = vld [vmem:[%s7014_s1 + $0x338] sm:$0xff]  }
 0x24c   : > { %5750 = vmatpush3.bf16.msra.mxu1 %v6251_v30  ;;  %5729 = vmatprep.subr.bf16.mxu0 %v6252_v57  ;;  %v6311_v30 = vld [vmem:[%s7014_s1 + $0x3b8] sm:$0xff]   ;;  %v6312_v57 = vld [vmem:[%s7014_s1 + $0x370] sm:$0xff]  }
 0x24d   : > { %5751 = vmatprep.subr.bf16.mxu1 %v6253_v13  ;;  %v6313_v13 = vld [vmem:[%s7014_s1 + $0x3f0] sm:$0xff]  }
 0x24f   : > { %5730 = vmatpush3.bf16.msra.mxu0 %v6254_v54  ;;  %v6314_v54 = vld [vmem:[%s7014_s1 + $0x330] sm:$0xff]  }
 0x250   : > { %5752 = vmatpush3.bf16.msra.mxu1 %v6255_v45  ;;  %5731 = vmatprep.subr.bf16.mxu0 %v6256_v52  ;;  %v6315_v45 = vld [vmem:[%s7014_s1 + $0x3b0] sm:$0xff]   ;;  %v6316_v52 = vld [vmem:[%s7014_s1 + $0x368] sm:$0xff]  }
 0x251   : > { %5753 = vmatprep.subr.bf16.mxu1 %v6257_v22  ;;  %v6317_v22 = vld [vmem:[%s7014_s1 + $0x3e8] sm:$0xff]  }
 0x253   : > { %5732 = vmatpush3.bf16.msra.mxu0 %v6258_v2  ;;  %v6318_v2 = vld [vmem:[%s7014_s1 + $0x328] sm:$0xff]  }
 0x254   : > { %5754 = vmatpush3.bf16.msra.mxu1 %v6259_v7  ;;  %5733 = vmatprep.subr.bf16.mxu0 %v6260_v14  ;;  %v6319_v7 = vld [vmem:[%s7014_s1 + $0x3a8] sm:$0xff]   ;;  %v6320_v14 = vld [vmem:[%s7014_s1 + $0x360] sm:$0xff]  }
 0x255   : > { %5755 = vmatprep.subr.bf16.mxu1 %v6261_v42  ;;  %v6321_v42 = vld [vmem:[%s7014_s1 + $0x3e0] sm:$0xff]  }
 0x257   : > { %5734 = vmatpush3.bf16.msra.mxu0 %v6262_v26  ;;  %v6322_v26 = vld [vmem:[%s7014_s1 + $0x320] sm:$0xff]  }
 0x258   : > { %5756 = vmatpush3.bf16.msra.mxu1 %v6263_v25  ;;  %5735 = vmatprep.subr.bf16.mxu0 %v6264_v62  ;;  %v6323_v25 = vld [vmem:[%s7014_s1 + $0x3a0] sm:$0xff]   ;;  %v6324_v62 = vld [vmem:[%s7014_s1 + $0x358] sm:$0xff]  }
 0x259   : > { %5757 = vmatprep.subr.bf16.mxu1 %v6265_v18  ;;  %v6325_v18 = vld [vmem:[%s7014_s1 + $0x3d8] sm:$0xff]  }
 0x25b   : > { %5736 = vmatpush3.bf16.msra.mxu0 %v6266_v43  ;;  %v6326_v43 = vld [vmem:[%s7014_s1 + $0x318] sm:$0xff]  }
 0x25c   : > { %5758 = vmatpush3.bf16.msra.mxu1 %v6267_v50  ;;  %5765 = vmatprep.subr.bf16.mxu0 %v6272_v58  ;;  %v6327_v50 = vld [vmem:[%s7014_s1 + $0x398] sm:$0xff]   ;;  %v6334_v58 = vld [vmem:[%s7014_s1 + $0x308] sm:$0xff]  }
 0x25d   : > { %5787 = vmatprep.subr.bf16.mxu1 %v6273_v0  ;;  %v6335_v0 = vld [vmem:[%s7014_s1 + $0x388] sm:$0xff]  }
 0x25e   : > { %4627 = vmatmul.mubr.bf16.vlgmr.msra.gmra.mxu0 %v5325_v39  ;;  %v6329_v39 = vld [vmem:[%s7014_s1 + $0x3d0] sm:$0xff]  }
 0x25f   : > { %4667 = vmatmul.mubr.bf16.vlgmr.msra.gmra.mxu1 %v5327_v12  ;;  %5766 = vmatpush3.bf16.msra.mxu0 %v6274_v35  ;;  %v6332_v12 = vld [vmem:[%s7014_s1 + $0x348] sm:$0xff]   ;;  %v6336_v35 = vld [vmem:[%s7014_s1 + $0x340] sm:$0xff]  }
 0x260   : > { %5788 = vmatpush3.bf16.msra.mxu1 %v6275_v31  ;;  %5767 = vmatprep.subr.bf16.mxu0 %v6276_v16  ;;  %v6337_v31 = vld [vmem:[%s7014_s1 + $0x3c0] sm:$0xff]  }
 0x261   : > { %5789 = vmatprep.subr.bf16.mxu1 %v6277_v34  ;;  %4706 = vmatprep.mubr.bf16.mxu0 %v5330_v3  ;;  %v6338_v16 = vld [vmem:[%s7014_s1 + $0x300] sm:$0xff]  }
 0x262   : > { %4746 = vmatprep.mubr.bf16.mxu1 %v5332_v33  ;;  %v6339_v34 = vld [vmem:[%s7014_s1 + $0x380] sm:$0xff]  }
 0x263   : > { %5768 = vmatpush3.bf16.msra.mxu0 %v6278_v20  ;;  %v3432_v20 = vld [vmem:[#allocation2 + $0x28] sm:$0xff] }
 0x264   : > { %5790 = vmatpush3.bf16.msra.mxu1 %v6279_v60  ;;  %5769 = vmatprep.subr.bf16.mxu0 %v6280_v8  ;;  %v3433_v60 = vld [vmem:[#allocation2 + $0x38] sm:$0xff]  ;;  %v5333_v8 = vcombine.low %v3432_v20, %v3432_v20 }
 0x265   : > { %5791 = vmatprep.subr.bf16.mxu1 %v6281_v5  ;;  %v5334_v5 = vcombine.high %v3432_v20, %v3432_v20 }
 0x267   : > { %5770 = vmatpush3.bf16.msra.mxu0 %v6282_v38  ;;  %v5335_v38 = vcombine.low %v3433_v60, %v3433_v60 }
 0x268   : > { %5792 = vmatpush3.bf16.msra.mxu1 %v6283_v55  ;;  %5771 = vmatprep.subr.bf16.mxu0 %v6284_v11  ;;  %v5336_v55 = vcombine.high %v3433_v60, %v3433_v60 }
 0x269   : > { %5793 = vmatprep.subr.bf16.mxu1 %v6285_v53 }
 0x26b   : > { %5772 = vmatpush3.bf16.msra.mxu0 %v6286_v27 }
 0x26c   : > { %5794 = vmatpush3.bf16.msra.mxu1 %v6287_v32  ;;  %5773 = vmatprep.subr.bf16.mxu0 %v6288_v56 }
 0x26d   : > { %5795 = vmatprep.subr.bf16.mxu1 %v6289_v44 }
 0x26f   : > { %5774 = vmatpush3.bf16.msra.mxu0 %v6290_v10 }
 0x270   : > { %5796 = vmatpush3.bf16.msra.mxu1 %v6291_v49  ;;  %5775 = vmatprep.subr.bf16.mxu0 %v6292_v59 }
 0x271   : > { %5797 = vmatprep.subr.bf16.mxu1 %v6293_v61 }
 0x273   : > { %5776 = vmatpush3.bf16.msra.mxu0 %v6294_v46 }
 0x274   : > { %5798 = vmatpush3.bf16.msra.mxu1 %v6295_v4  ;;  %5777 = vmatprep.subr.bf16.mxu0 %v6296_v6 }
 0x275   : > { %5799 = vmatprep.subr.bf16.mxu1 %v6297_v41 }
 0x277   : > { %5778 = vmatpush3.bf16.msra.mxu0 %v6298_v48 }
 0x278   : > { %5800 = vmatpush3.bf16.msra.mxu1 %v6299_v40  ;;  %5779 = vmatprep.subr.bf16.mxu0 %v6300_v37 }
 0x279   : > { %5801 = vmatprep.subr.bf16.mxu1 %v6301_v24 }
 0x27b   : > { %5780 = vmatpush3.bf16.msra.mxu0 %v6302_v21 }
 0x27c   : > { %5802 = vmatpush3.bf16.msra.mxu1 %v6303_v17  ;;  %5809 = vmatprep.subr.bf16.mxu0 %v6308_v1 }
 0x27d   : > { %5831 = vmatprep.subr.bf16.mxu1 %v6309_v9 }
 0x27e   : > { %4707 = vmatmul.mubr.bf16.vlgmr.msra.gmra.mxu0 %v5329_v47  ;;  %v5517_v11 = vpop.f32.mrf.mxu0 }
 0x27f   : > { %4747 = vmatmul.mubr.bf16.vlgmr.msra.gmra.mxu1 %v5331_v15  ;;  %5810 = vmatpush3.bf16.msra.mxu0 %v6310_v23  ;;  %v5539_v53 = vpop.f32.mrf.mxu1 }
 0x280   : > { %5832 = vmatpush3.bf16.msra.mxu1 %v6311_v30  ;;  %5811 = vmatprep.subr.bf16.mxu0 %v6312_v57  ;;  %v5518_v27 = vpop.f32.mrf.mxu0 }
 0x281   : > { %5833 = vmatprep.subr.bf16.mxu1 %v6313_v13  ;;  %4786 = vmatprep.mubr.bf16.mxu0 %v5334_v5  ;;  %v5540_v32 = vpop.f32.mrf.mxu1  ;;  %v5519_v24 = vadd.f32 %v5518_v27, %v5517_v11 }
 0x282   : > { %4826 = vmatprep.mubr.bf16.mxu1 %v5336_v55  ;;  %v5520_v56 = vpop.f32.mrf.mxu0  ;;  %v5541_v21 = vadd.f32 %v5540_v32, %v5539_v53 }
 0x283   : > { %5812 = vmatpush3.bf16.msra.mxu0 %v6314_v54  ;;  %v5542_v44 = vpop.f32.mrf.mxu1 }
 0x284   : > { %5834 = vmatpush3.bf16.msra.mxu1 %v6315_v45  ;;  %5813 = vmatprep.subr.bf16.mxu0 %v6316_v52  ;;  %v5521_v10 = vpop.f32.mrf.mxu0  ;;  %v3172_v47 = vadd.f32 %v5541_v21, %v5519_v24 }
 0x285   : > { %5835 = vmatprep.subr.bf16.mxu1 %v6317_v22  ;;  %v5543_v59 = vpop.f32.mrf.mxu1  ;;  %v5522_v3 = vadd.f32 %v5521_v10, %v5520_v56 }
 0x286   : > { %v5544_v15 = vadd.f32 %v5543_v59, %v5542_v44 }
 0x287   : > { %5814 = vmatpush3.bf16.msra.mxu0 %v6318_v2 }
 0x288   : > { %5836 = vmatpush3.bf16.msra.mxu1 %v6319_v7  ;;  %5815 = vmatprep.subr.bf16.mxu0 %v6320_v14  ;;  %v3175_v57 = vadd.f32 %v5544_v15, %v5522_v3 }
 0x289   : > { %5837 = vmatprep.subr.bf16.mxu1 %v6321_v42 }
 0x28b   : > { %5816 = vmatpush3.bf16.msra.mxu0 %v6322_v26 }
 0x28c   : > { %5838 = vmatpush3.bf16.msra.mxu1 %v6323_v25  ;;  %5817 = vmatprep.subr.bf16.mxu0 %v6324_v62 }
 0x28d   : > { %5839 = vmatprep.subr.bf16.mxu1 %v6325_v18 }
 0x28f   : > { %5818 = vmatpush3.bf16.msra.mxu0 %v6326_v43 }
 0x290   : > { %5840 = vmatpush3.bf16.msra.mxu1 %v6327_v50  ;;  %5819 = vmatprep.subr.bf16.mxu0 %v6328_v28 }
 0x291   : > { %5841 = vmatprep.subr.bf16.mxu1 %v6329_v39 }
 0x293   : > { %5820 = vmatpush3.bf16.msra.mxu0 %v6330_v51 }
 0x294   : > { %5842 = vmatpush3.bf16.msra.mxu1 %v6331_v29  ;;  %5821 = vmatprep.subr.bf16.mxu0 %v6332_v12 }
 0x295   : > { %5843 = vmatprep.subr.bf16.mxu1 %v6333_v36 }
 0x297   : > { %5822 = vmatpush3.bf16.msra.mxu0 %v6334_v58 }
 0x298   : > { %5844 = vmatpush3.bf16.msra.mxu1 %v6335_v0  ;;  %5823 = vmatprep.subr.bf16.mxu0 %v6336_v35 }
 0x299   : > { %5845 = vmatprep.subr.bf16.mxu1 %v6337_v31 }
 0x29b   : > { %5824 = vmatpush3.bf16.msra.mxu0 %v6338_v16 }
 0x29c   : > { %5846 = vmatpush3.bf16.msra.mxu1 %v6339_v34 }
 0x29e   : > { %4787 = vmatmul.mubr.bf16.vlgmr.msra.gmra.mxu0 %v5333_v8  ;;  %v5561_v49 = vpop.f32.mrf.mxu0 }
 0x29f   : > { %4827 = vmatmul.mubr.bf16.vlgmr.msra.gmra.mxu1 %v5335_v38  ;;  %v5583_v61 = vpop.f32.mrf.mxu1 }
 0x2a0   : > { %v5562_v46 = vpop.f32.mrf.mxu0 }
 0x2a1   : > { %v5584_v4 = vpop.f32.mrf.mxu1  ;;  %v5563_v63 = vadd.f32 %v5562_v46, %v5561_v49 }
 0x2a2   : > { %v5564_v6 = vpop.f32.mrf.mxu0  ;;  %v5585_v23 = vadd.f32 %v5584_v4, %v5583_v61 }
 0x2a3   : > { %v5586_v41 = vpop.f32.mrf.mxu1  ;;  %v3213_v9 = vadd.f32 %v5563_v63, %v3172_v47 }
 0x2a4   : > { %v5565_v48 = vpop.f32.mrf.mxu0 }
 0x2a5   : > { %v5587_v37 = vpop.f32.mrf.mxu1  ;;  %v5566_v30 = vadd.f32 %v5565_v48, %v5564_v6  ;;  %v3254_v52 = vadd.f32 %v5585_v23, %v3213_v9 }
 0x2a6   : > { %v5588_v2 = vadd.f32 %v5587_v37, %v5586_v41 }
 0x2a7   : > { %v3216_v22 = vadd.f32 %v5566_v30, %v3175_v57 }
 0x2a9   : > { %v3257_v62 = vadd.f32 %v5588_v2, %v3216_v22 }
 0x2be   : > { %v5605_v40 = vpop.f32.mrf.mxu0 }
 0x2bf   : > { %v5627_v17 = vpop.f32.mrf.mxu1 }
 0x2c0   : > { %v5606_v19 = vpop.f32.mrf.mxu0 }
 0x2c1   : > { %v5628_v33 = vpop.f32.mrf.mxu1  ;;  %v5607_v13 = vadd.f32 %v5606_v19, %v5605_v40 }
 0x2c2   : > { %v5608_v1 = vpop.f32.mrf.mxu0  ;;  %v5629_v14 = vadd.f32 %v5628_v33, %v5627_v17 }
 0x2c3   : > { %v5630_v54 = vpop.f32.mrf.mxu1  ;;  %v3295_v7 = vadd.f32 %v5607_v13, %v3254_v52 }
 0x2c4   : > { %v5609_v45 = vpop.f32.mrf.mxu0 }
 0x2c5   : > { %v5610_v42 = vadd.f32 %v5609_v45, %v5608_v1  ;;  %v5631_v26 = vpop.f32.mrf.mxu1  ;;  %v3336_v50 = vadd.f32 %v5629_v14, %v3295_v7 }
 0x2c6   : > { %v5632_v36 = vadd.f32 %v5631_v26, %v5630_v54 }
 0x2c7   : > { %v3298_v28 = vadd.f32 %v5610_v42, %v3257_v62 }
 0x2c9   : > { %v3339_v31 = vadd.f32 %v5632_v36, %v3298_v28 }
 0x2de   : > { %v5649_v25 = vpop.f32.mrf.mxu0 }
 0x2df   : > { %v5671_v18 = vpop.f32.mrf.mxu1 }
 0x2e0   : > { %v5650_v43 = vpop.f32.mrf.mxu0 }
 0x2e1   : > { %v5651_v39 = vadd.f32 %v5650_v43, %v5649_v25  ;;  %v5672_v51 = vpop.f32.mrf.mxu1 }
 0x2e2   : > { %v5673_v29 = vadd.f32 %v5672_v51, %v5671_v18  ;;  %v5652_v12 = vpop.f32.mrf.mxu0 }
 0x2e3   : > { %v3377_v58 = vadd.f32 %v5651_v39, %v3336_v50  ;;  %v5674_v0 = vpop.f32.mrf.mxu1 }
 0x2e4   : > { %v5653_v35 = vpop.f32.mrf.mxu0 }
 0x2e5   : > { %v3418_v16 = vadd.f32 %v5673_v29, %v3377_v58  ;;  %v5654_v34 = vadd.f32 %v5653_v35, %v5652_v12  ;;  %v5675_v20 = vpop.f32.mrf.mxu1 }
 0x2e6   : > { %v5676_v8 = vadd.f32 %v5675_v20, %v5674_v0 }
 0x2e7   : > { %3424 = vst [vmem:[%s504_s15] sm:$0xff] %v3418_v16  ;;  %v3380_v60 = vadd.f32 %v5654_v34, %v3339_v31 }
 0x2e9   : > { %v3421_v5 = vadd.f32 %v5676_v8, %v3380_v60 }
 0x2eb   : > { %3425 = vst [vmem:[%s511_s27] sm:$0xff] %v3421_v5 }
 0x2ec   : > { %6543 = shalt.err (!%p6540_p3)
}
 0x2ed   : > { %s6544_s5 = scalar_lea.hbm %s7909_s13, 128  ;;  %s6548_s1 = scalar_lea.hbm %s8147_s14, 256 }
 0x2ee   : > { %p6545_p2 = scmp.ne.s32.totalorder %s7909_s13, %s6544_s5  ;;  %p6549_p0 = scmp.lt.s32.totalorder %s7909_s13, %s8147_s14 }
 0x2ef   : > { %p6550_p6 = scmp.lt.s32.totalorder %s6548_s1, %s6544_s5 }
 0x2f0   : > { %p6546_p4 = pnand %p6545_p2, %p8148_p8 }
 0x2f1   : > { %p6551_p11 = por %p6550_p6, %p6549_p0 }
 0x2f2   : > { %p6547_p10 = pneg %p6546_p4 }
 0x2f4   : > { %p6552_p5 = pnand %p6551_p11, %p6547_p10 }
 0x2f6   : > { %6555 = shalt.err (!%p6552_p5)
}
 0x2f7   : > { %5878 = dma.vmem_to_hbm [thread:$0]  (%p8148_p8), %s4873_s17, 128, %s7909_s13, %s7913_s30  }
 0x2f8   : > { %s6556_s26 = scalar_lea.vmem %s4897_s16, 2048  ;;  %p8149_p13 = scmp.eq.s32.totalorder %s6813_s21, 1 }
 0x2f9   : > { %p6557_p7 = scmp.ne.s32.totalorder %s4897_s16, %s6556_s26  ;;  %p6563_p9 = scmp.lt.s32.totalorder %s4897_s16, %s4897_s16 }
 0x2fa   : > { %p6564_p3 = scmp.lt.s32.totalorder %s6556_s26, %s6556_s26 }
 0x2fb   : > { %p6558_p1 = pnand %p6557_p7, %p8149_p13 }
 0x2fc   : > { %p6565_p2 = por %p6564_p3, %p6563_p9 }
 0x2fd   : > { %p6559_p12 = pneg %p6558_p1 }
 0x2ff   : > { %p6566_p4 = pnand %p6565_p2, %p6559_p12 }
 0x301   : > { %6569 = shalt.err (!%p6566_p4)
}
 0x302   : > { %p8150_p10 = pmov %p8149_p13  ;;  %s8151_s7 = sld [smem:[#allocation59_spill]] }
 0x303   : > { %s8152_s8 = sld [smem:[#allocation58_spill]]  ;;  %s4885_s11 = sshll.u32 %s511_s27, 4  ;;  %s4886_s11 = int_to_ptr.vmem [resolvable:$true] %s4885_s11 }
 0x304   : > { %s6729_s5 = smov [#allocation22]   ;;  %s6580_s28 = scalar_lea.vmem %s4886_s11, 128 }
 0x305   : > { %s4907_s12 = sshll.u32 %s6729_s5, 4  ;;  %p6581_p0 = scmp.ne.s32.totalorder %s4886_s11, %s6580_s28  ;;  %s4908_s12 = int_to_ptr.vmem [resolvable:$true] %s4907_s12 }
 0x306   : > { %s6730_s1 = smov [#allocation19]  }
 0x307   : > { %p6582_p6 = pnand %p6581_p0, %p8148_p8  ;;  %s6584_s24 = sshll.u32 %s6730_s1, 4  ;;  %s6585_s24 = int_to_ptr.vmem [resolvable:$false] %s6584_s24 }
 0x308   : > { %5881 = dma.vmem_to_hbm [thread:$0]  (%p8150_p10), %s4897_s16, 2048, %s8151_s7, [#allocation21]  }
 0x309   : > { %s7943_s9 = scalar_lea.hbm %s8152_s8, %s7899_s23  ;;  %p6583_p11 = pneg %p6582_p6 }
 0x30a   : > { %s6586_s15 = scalar_lea.vmem %s6585_s24, 256  ;;  %p6587_p5 = scmp.lt.s32.totalorder %s4886_s11, %s6585_s24 }
 0x30b   : > { %p6588_p7 = scmp.lt.s32.totalorder %s6586_s15, %s6580_s28 }
 0x30d   : > { %p6589_p13 = por %p6588_p7, %p6587_p5 }
 0x30f   : > { %p6590_p1 = pnand %p6589_p13, %p6583_p11 }
 0x311   : > { %6593 = shalt.err (!%p6590_p1)
}
 0x312   : > { %s6594_s27 = scalar_lea.hbm %s7943_s9, 128  ;;  %s6598_s10 = scalar_lea.hbm %s8152_s8, 256 }
 0x313   : > { %p6595_p12 = scmp.ne.s32.totalorder %s7943_s9, %s6594_s27  ;;  %p6599_p2 = scmp.lt.s32.totalorder %s7943_s9, %s8152_s8 }
 0x314   : > { %p6600_p4 = scmp.lt.s32.totalorder %s6598_s10, %s6594_s27 }
 0x315   : > { %p6596_p9 = pnand %p6595_p12, %p8148_p8 }
 0x316   : > { %p6601_p10 = por %p6600_p4, %p6599_p2 }
 0x317   : > { %p6597_p3 = pneg %p6596_p9 }
 0x319   : > { %p6602_p0 = pnand %p6601_p10, %p6597_p3 }
 0x31b   : > { %6605 = shalt.err (!%p6602_p0)
}
 0x31c   : > { %5879 = dma.vmem_to_hbm [thread:$0]  (%p8148_p8), %s4886_s11, 128, %s7943_s9, %s7913_s30  }
 0x31d   : > { %s6606_s17 = scalar_lea.vmem %s4908_s12, 2048  ;;  %p8153_p11 = scmp.eq.s32.totalorder %s6813_s21, 1 }
 0x31e   : > { %p6607_p6 = scmp.ne.s32.totalorder %s4908_s12, %s6606_s17  ;;  %p6613_p13 = scmp.lt.s32.totalorder %s4908_s12, %s4908_s12 }
 0x31f   : > { %p6614_p1 = scmp.lt.s32.totalorder %s6606_s17, %s6606_s17 }
 0x320   : > { %p6608_p5 = pnand %p6607_p6, %p8153_p11 }
 0x321   : > { %p6615_p12 = por %p6614_p1, %p6613_p13 }
 0x322   : > { %p6609_p7 = pneg %p6608_p5 }
 0x324   : > { %p6616_p9 = pnand %p6615_p12, %p6609_p7 }
 0x326   : > { %6619 = shalt.err (!%p6616_p9)
}
 0x327   : > { %p8154_p3 = pmov %p8153_p11  ;;  %s8155_s28 = sld [smem:[#allocation60_spill]]  ;;  %v5693_v38 = vpop.f32.mrf.mxu0  ;;  %v5715_v55 = vpop.f32.mrf.mxu1 }
 0x328   : > { %s4859_s30 = sshll.u32 %s497_s29, 4  ;;  %s4836_s24 = scalar_lea.sflag [#allocation6], %s7009_s25  ;;  %s4860_s30 = int_to_ptr.vmem [resolvable:$true] %s4859_s30 }
 0x329   : > { %v5694_v11 = vpop.f32.mrf.mxu0  ;;  %v5716_v53 = vpop.f32.mrf.mxu1  ;;  %s6630_s15 = scalar_lea.vmem %s4860_s30, 128  ;;  %s6731_s27 = smov [#allocation16]  }
 0x32a   : > { %v5695_v27 = vadd.f32 %v5694_v11, %v5693_v38  ;;  %v5717_v32 = vadd.f32 %v5716_v53, %v5715_v55  ;;  %p6631_p2 = scmp.ne.s32.totalorder %s4860_s30, %s6630_s15  ;;  %s6634_s16 = sshll.u32 %s6731_s27, 4  ;;  %s6635_s16 = int_to_ptr.vmem [resolvable:$false] %s6634_s16 }
 0x32b   : > { %v5696_v56 = vpop.f32.mrf.mxu0  ;;  %v5718_v44 = vpop.f32.mrf.mxu1  ;;  %s6636_s26 = scalar_lea.vmem %s6635_s16, 256  ;;  %p6637_p0 = scmp.lt.s32.totalorder %s4860_s30, %s6635_s16 }
 0x32c   : > { %v4589_v10 = vadd.f32 %v5717_v32, %v5695_v27  ;;  %p6632_p4 = pnand %p6631_p2, %p8148_p8  ;;  %p6638_p6 = scmp.lt.s32.totalorder %s6636_s26, %s6630_s15 }
 0x32d   : > { %5883 = dma.vmem_to_hbm [thread:$0]  (%p8154_p3), %s4908_s12, 2048, %s8155_s28, [#allocation21]   ;;  %v5697_v49 = vpop.f32.mrf.mxu0  ;;  %v5719_v59 = vpop.f32.mrf.mxu1 }
 0x32e   : > { %s8156_s12 = sld [smem:[#allocation56_spill]]  ;;  %p6633_p10 = pneg %p6632_p4 }
 0x32f   : > { %v5737_v61 = vpop.f32.mrf.mxu0  ;;  %v5759_v46 = vpop.f32.mrf.mxu1  ;;  %p6639_p11 = por %p6638_p6, %p6637_p0 }
 0x331   : > { %v5738_v4 = vpop.f32.mrf.mxu0  ;;  %v5760_v6 = vpop.f32.mrf.mxu1  ;;  %p6640_p5 = pnand %p6639_p11, %p6633_p10 }
 0x332   : > { %v5739_v33 = vadd.f32 %v5738_v4, %v5737_v61  ;;  %v5761_v9 = vadd.f32 %v5760_v6, %v5759_v46 }
 0x333   : > { %v5740_v41 = vpop.f32.mrf.mxu0  ;;  %v5762_v48 = vpop.f32.mrf.mxu1 }
 0x334   : > { %v4629_v1 = vadd.f32 %v5739_v33, %v4589_v10  ;;  %s4857_s1 = scalar_lea.hbm %s8156_s12, %s7899_s23 }
 0x335   : > { %v5741_v40 = vpop.f32.mrf.mxu0  ;;  %v5763_v37 = vpop.f32.mrf.mxu1 }
 0x336   : > { %v4669_v30 = vadd.f32 %v5761_v9, %v4629_v1 }
 0x33e   : > { %v5781_v24 = vpop.f32.mrf.mxu0 }
 0x33f   : > { %v5803_v21 = vpop.f32.mrf.mxu1 }
 0x340   : > { %v5782_v17 = vpop.f32.mrf.mxu0 }
 0x341   : > { %v5804_v19 = vpop.f32.mrf.mxu1  ;;  %v5783_v23 = vadd.f32 %v5782_v17, %v5781_v24 }
 0x342   : > { %v5784_v63 = vpop.f32.mrf.mxu0  ;;  %v5805_v13 = vadd.f32 %v5804_v19, %v5803_v21 }
 0x343   : > { %v5806_v47 = vpop.f32.mrf.mxu1  ;;  %v4709_v57 = vadd.f32 %v5783_v23, %v4669_v30 }
 0x344   : > { %v5785_v3 = vpop.f32.mrf.mxu0 }
 0x345   : > { %v5807_v15 = vpop.f32.mrf.mxu1  ;;  %v4749_v22 = vadd.f32 %v5805_v13, %v4709_v57 }
 0x35e   : > { %v5825_v54 = vpop.f32.mrf.mxu0 }
 0x35f   : > { %v5847_v45 = vpop.f32.mrf.mxu1 }
 0x360   : > { %v5826_v52 = vpop.f32.mrf.mxu0 }
 0x361   : > { %v5827_v2 = vadd.f32 %v5826_v52, %v5825_v54  ;;  %v5848_v7 = vpop.f32.mrf.mxu1 }
 0x362   : > { %v5828_v14 = vpop.f32.mrf.mxu0  ;;  %v5849_v26 = vadd.f32 %v5848_v7, %v5847_v45 }
 0x363   : > { %v4789_v42 = vadd.f32 %v5827_v2, %v4749_v22  ;;  %v5850_v25 = vpop.f32.mrf.mxu1 }
 0x364   : > { %v5829_v62 = vpop.f32.mrf.mxu0 }
 0x365   : > { %v4829_v18 = vadd.f32 %v5849_v26, %v4789_v42  ;;  %v5851_v43 = vpop.f32.mrf.mxu1 }
 0x367   : > { %4834 = vst [vmem:[%s497_s29] sm:$0xff] %v4829_v18 }
 0x368   : > { %6643 = shalt.err (!%p6640_p5)
}
 0x369   : > { %s6644_s10 = scalar_lea.hbm %s4857_s1, 128  ;;  %s6648_s29 = scalar_lea.hbm %s8156_s12, 256 }
 0x36a   : > { %p6645_p7 = scmp.ne.s32.totalorder %s4857_s1, %s6644_s10  ;;  %p6649_p12 = scmp.lt.s32.totalorder %s4857_s1, %s8156_s12 }
 0x36b   : > { %p6650_p9 = scmp.lt.s32.totalorder %s6648_s29, %s6644_s10 }
 0x36c   : > { %p6646_p13 = pnand %p6645_p7, %p8148_p8 }
 0x36d   : > { %p6651_p3 = por %p6650_p9, %p6649_p12 }
 0x36e   : > { %p6647_p1 = pneg %p6646_p13 }
 0x370   : > { %p6652_p2 = pnand %p6651_p3, %p6647_p1 }
 0x372   : > { %6655 = shalt.err (!%p6652_p2)
}
 0x373   : > { %5877 = dma.vmem_to_hbm [thread:$0]  (%p8148_p8), %s4860_s30, 128, %s4857_s1, %s4836_s24  }
 0x374   : > { %p8157_p4 = scmp.eq.s32.totalorder %s6813_s21, 1 }
 0x376   : > { %6689 = dma.done.wait (%p8157_p4), [#allocation21], 4096   ;;  %p8158_p10 = pmov %p8157_p4 }
 0x378   : > { %6691 = vsyncadd (%p8158_p10), [#allocation21], 4294963200 }
 0x379 PF: > { %s8159_s7 = sld [smem:[#allocation30_spill]]  ;;  %p8162_p6 = scmp.ge.s32.totalorder %s6714_s20, 2 }
 0x37a   : > { %s8160_s17 = sld [smem:[#allocation32_spill]] }
 0x37f   : > { %s4927_s13 = sand.u32 1, %s8159_s7  }
 0x380   : > { %p8161_p0 = scmp.ne.s32.totalorder %s8160_s17, 0  ;;  %s4928_s5 = scalar_lea.sflag [#allocation6], %s4927_s13 }
 0x382   : > { %p5915_p11 = pnand %p8162_p6, %p8161_p0 }
 0x384   : > { %p5916_p5 = pneg %p5915_p11 }
 0x386   : > { %6693 = dma.done.wait (%p5916_p5), %s4928_s5, 128  }
 0x387   : > { %6695 = vsyncadd (%p5916_p5), %s4928_s5, 4294967168  ;;  %s8163_s22 = sadd.s32 4294967294, %s6714_s20  }
 0x388   : > { %s4936_s28 = sand.u32 1, %s8163_s22  }
 0x389   : > { %s4937_s30 = scalar_lea.sflag [#allocation18], %s4936_s28 }
 0x38a   : > { %6697 = dma.done.wait (%p5916_p5), %s4937_s30, 256  }
 0x38b   : > { %6699 = vsyncadd (%p5916_p5), %s4937_s30, 4294967040  ;;  %s8164_s20 = sld [smem:[#allocation33_spill]]  ;;  %s8167_s17 = smov %s6706_s18 }
 0x38c   : > { %s8165_s21 = sld [smem:[#allocation31_spill]] }
 0x38d   : > { %s8166_s19 = sld [smem:[#allocation34_spill]] }
 0x391   : > { %p32_p8 = scmp.ge.s32.totalorder %s8164_s20, 4  }
 0x392   : > { %s8168_s18 = smov %s8165_s21 }
 0x393   :  { %34 = sbr.rel (!%p32_p8) target bundleno = 20 (0x14), region = 177 }
 0x398   :  { %4951 = vsyncpa [#allocation5], 1 }
 0x399   :  { %4953 = vsyncpa [#allocation5 + $0x1], 1 }
 0x39a   :  { %4954 = vsyncpa [#allocation8], 1 }
 0x39b   :  { %4955 = vsyncpa [#allocation11], 1 }
 0x39c   :  { %4956 = vsyncpa [#allocation14], 1 }
 0x39d   :  { %4958 = vsyncpa [#allocation14 + $0x1], 1 }
 0x39e   :  { %4959 = vsyncpa [#allocation6], 1 }
 0x39f   :  { %4961 = vsyncpa [#allocation6 + $0x1], 1 }
 0x3a0   :  { %4962 = vsyncpa [#allocation18], 1 }
 0x3a1   :  { %4964 = vsyncpa [#allocation18 + $0x1], 1 }
 0x3a2   :  { %4965 = vsyncpa [#allocation21], 1 }

</bundles_post_ra>
